<compile_context>
chip_gen: v7x
topology: tpu7x:2x2x1
jax: 0.10.0
libtpu: 0.0.40
codegen_flags: <defaults>
</compile_context>

<pallas_src>
import jax
import jax.numpy as jnp
import numpy as np
from jax.experimental import pallas as pl
from jax.experimental.pallas import tpu as pltpu

_EPS = 1e-5
_DELTAS = (-1, 0, 1)
_TAPS = tuple((dd, dh, dw) for dd in _DELTAS for dh in _DELTAS for dw in _DELTAS)


def _round_up(x, m):
    return (x + m - 1) // m * m


# ----------------------------- fused Pallas kernel ---------------------------

def _make_conv_block_kernel(D, H, W, Cp, Co, M, PAD):
    """Fused BN(eval)+ReLU+Conv3d(3x3x3,pad=1)+bias kernel, one batch element."""
    HW = H * W

    def kernel(x_ref, scale_ref, shift_ref, w_ref, b_ref, mask_ref,
               o_ref, apad_ref, patch_ref):
        # x_ref:(1,Cp,M) f32, scale/shift:(Cp,1) f32, w_ref:(Co,27*Cp) bf16,
        # b_ref:(Co,1) f32, mask_ref:(27,1,M) f32, o_ref:(1,Co,M) f32,
        # apad_ref:(Cp, M+2*PAD) f32 scratch, patch_ref:(27*Cp, M) bf16 scratch.

        # Zero ONLY the two halo strips (the centre is fully overwritten next);
        # saves Cp*M redundant vector stores vs zeroing the whole buffer.
        apad_ref[:, :PAD] = jnp.zeros((Cp, PAD), jnp.float32)
        apad_ref[:, PAD + M:PAD + M + PAD] = jnp.zeros((Cp, PAD), jnp.float32)

        # Folded BatchNorm(eval) + ReLU, once per tile, f32 (broadcast hoisted).
        apad_ref[:, PAD:PAD + M] = jnp.maximum(
            x_ref[0] * scale_ref[...] + shift_ref[...], 0.0)

        # Build the (27*Cp, M) im2col slab.  Per tap: one statically shifted
        # read of the haloed buffer, the host-precomputed boundary mask applied
        # on the (narrow, f32) activation side, then a single bf16 cast.  All
        # realign / mask / cast work is paid once here, off the dot path.
        for t, (dd, dh, dw) in enumerate(_TAPS):
            off = dd * HW + dh * W + dw
            a_s = apad_ref[:, PAD + off:PAD + off + M]          # (Cp, M) f32
            patch_ref[t * Cp:(t + 1) * Cp, :] = (
                a_s * mask_ref[t]).astype(jnp.bfloat16)

        # Single MXU matmul: (Co, 27*Cp) @ (27*Cp, M) -> (Co, M), f32 accum.
        acc = jnp.dot(w_ref[...], patch_ref[...],
                      preferred_element_type=jnp.float32)

        # Bias add; Dropout(0.5) is identity in eval mode. Lane-dense store.
        o_ref[0] = (acc + b_ref[...]).astype(o_ref.dtype)

    return kernel


def _tap_masks(D, H, W):
    """Host-precomputed per-tap boundary-validity masks, shape (27, 1, M) f32."""
    M = D * H * W
    idx = np.arange(M)
    di, hi, wi = idx // (H * W), (idx // W) % H, idx % W
    masks = np.empty((27, 1, M), np.float32)
    for t, (dd, dh, dw) in enumerate(_TAPS):
        ok = ((di + dd >= 0) & (di + dd < D) &
              (hi + dh >= 0) & (hi + dh < H) &
              (wi + dw >= 0) & (wi + dw < W))
        masks[t, 0, :] = ok
    return jnp.asarray(masks)


def conv_block_apply(x_flat, p, spatial, masks):
    """BatchNorm3d(eval) -> ReLU -> Conv3d(k=3,pad=1) -> Dropout(identity)."""
    N, C, M = x_flat.shape
    D, H, W = spatial
    Co = p["conv_w"].shape[0]
    Cp = _round_up(C, 8)                       # sublane-aligned channel count
    PAD = _round_up(H * W + W + 1, 128)        # lane-aligned halo >= max |offset|

    # Fold BN (eval) into per-channel scale/shift; zero-pad channels to Cp.
    scale = p["gamma"] / jnp.sqrt(p["var"] + _EPS)
    shift = p["beta"] - p["mean"] * scale
    scale = jnp.pad(scale, (0, Cp - C)).reshape(Cp, 1).astype(jnp.float32)
    shift = jnp.pad(shift, (0, Cp - C)).reshape(Cp, 1).astype(jnp.float32)

    # (O,I,kD,kH,kW) -> (O,kD,kH,kW,I) -> pad I to Cp -> (Co, 27*Cp) bf16.
    # Row layout is tap-major / channel-minor, matching the im2col slab.
    w_t = jnp.transpose(p["conv_w"], (0, 2, 3, 4, 1))
    w_t = jnp.pad(w_t, ((0, 0), (0, 0), (0, 0), (0, 0), (0, Cp - C)))
    w2 = w_t.reshape(Co, 27 * Cp).astype(jnp.bfloat16)

    # Zero-pad input channels to Cp (padded channels contribute exactly zero).
    x_pad = jnp.pad(x_flat, ((0, 0), (0, Cp - C), (0, 0))) if Cp > C else x_flat

    kernel = _make_conv_block_kernel(D, H, W, Cp, Co, M, PAD)
    cost = pl.CostEstimate(
        flops=2 * N * M * 27 * Cp * Co,
        transcendentals=0,
        bytes_accessed=(N * Cp * M * 4 + N * Co * M * 4
                        + Co * 27 * Cp * 2 + 27 * M * 4),
    )

    return pl.pallas_call(
        kernel,
        out_shape=jax.ShapeDtypeStruct((N, Co, M), jnp.float32),
        grid=(N,),
        in_specs=[
            pl.BlockSpec((1, Cp, M), lambda n: (n, 0, 0)),     # activations
            pl.BlockSpec((Cp, 1), lambda n: (0, 0)),           # BN scale (resident)
            pl.BlockSpec((Cp, 1), lambda n: (0, 0)),           # BN shift (resident)
            pl.BlockSpec((Co, 27 * Cp), lambda n: (0, 0)),     # conv weights
            pl.BlockSpec((Co, 1), lambda n: (0, 0)),           # conv bias
            pl.BlockSpec((27, 1, M), lambda n: (0, 0, 0)),     # tap masks (resident)
        ],
        out_specs=pl.BlockSpec((1, Co, M), lambda n: (n, 0, 0)),
        scratch_shapes=[
            pltpu.VMEM((Cp, M + 2 * PAD), jnp.float32),        # haloed activation
            pltpu.VMEM((27 * Cp, M), jnp.bfloat16),            # im2col patch slab
        ],
        compiler_params=pltpu.CompilerParams(
            dimension_semantics=("parallel",),
            vmem_limit_bytes=32 * 1024 * 1024),
        cost_estimate=cost,
    )(x_pad, scale, shift, w2,
      p["conv_b"].reshape(Co, 1).astype(jnp.float32), masks)


# ------------------------------ model wrapper --------------------------------

def dense_block_forward(x_ncdhw, params):
    """Equivalent of DenseBlock.forward: repeated conv_block + channel concat."""
    N, C, D, H, W = x_ncdhw.shape
    masks = _tap_masks(D, H, W)                 # shared by all layers
    x = x_ncdhw.reshape(N, C, D * H * W)        # NCDHW -> (N, C, M), free reshape
    for p in params:
        y = conv_block_apply(x, p, (D, H, W), masks)
        x = jnp.concatenate([x, y], axis=1)     # dense concat on channel dim
    return x.reshape(N, -1, D, H, W)            # back to NCDHW


# ------------------------- deterministic parameters --------------------------

def init_params(key, num_convs, in_channels, out_channels):
    params = []
    for i in range(num_convs):
        in_c = in_channels + i * out_channels
        key, k1, k2, k3, k4, k5, k6 = jax.random.split(key, 7)
        params.append(dict(
            gamma=jax.random.uniform(k1, (in_c,), jnp.float32, 0.5, 1.5),
            beta=0.1 * jax.random.normal(k2, (in_c,), jnp.float32),
            mean=0.1 * jax.random.normal(k3, (in_c,), jnp.float32),
            var=jax.random.uniform(k4, (in_c,), jnp.float32, 0.5, 1.5),
            conv_w=0.1 * jax.random.normal(
                k5, (out_channels, in_c, 3, 3, 3), jnp.float32),
            conv_b=0.1 * jax.random.normal(k6, (out_channels,), jnp.float32),
        ))
    return params


# ------------------------------ pure-JAX reference ---------------------------

def reference_forward(x, params):
    for p in params:
        scale = (p["gamma"] / jnp.sqrt(p["var"] + _EPS)).reshape(1, -1, 1, 1, 1)
        shift = (p["beta"] - p["mean"] * p["gamma"] / jnp.sqrt(p["var"] + _EPS)
                 ).reshape(1, -1, 1, 1, 1)
        a = jnp.maximum(x * scale + shift, 0.0)
        y = jax.lax.conv_general_dilated(
            a, p["conv_w"], window_strides=(1, 1, 1),
            padding=((1, 1), (1, 1), (1, 1)),
            dimension_numbers=("NCDHW", "OIDHW", "NCDHW"),
        ) + p["conv_b"].reshape(1, -1, 1, 1, 1)
        x = jnp.concatenate([x, y], axis=1)
    return x


# ----------------------------------- main ------------------------------------

if __name__ == "__main__":
    key = jax.random.PRNGKey(0)
    kx, kp = jax.random.split(key)

    # DenseBlock(num_convs=2, in_channels=4, out_channels=8)
    N, C, D, H, W = 2, 4, 8, 8, 8
    num_convs, out_channels = 2, 8

    x = jax.random.normal(kx, (N, C, D, H, W), jnp.float32)
    params = init_params(kp, num_convs, C, out_channels)

    fwd = jax.jit(dense_block_forward)
    out = jax.block_until_ready(fwd(x, params))

    expected_channels = C + num_convs * out_channels
    assert out.shape == (N, expected_channels, D, H, W), out.shape

    ref = jax.block_until_ready(reference_forward(x, params))
    # bf16 matmul operands (f32 accumulation) -> looser tolerance than pure f32.
    if not np.allclose(np.asarray(out), np.asarray(ref), atol=5e-2, rtol=5e-2):
        err = float(np.max(np.abs(np.asarray(out) - np.asarray(ref))))
        raise AssertionError(
            f"Pallas DenseBlock does not match reference (max abs err={err})")

    print("KERNEL_OK")
</pallas_src>

<mosaic_0001>
module attributes {stable_mosaic.version = 11 : i64} {
  func.func @kernel(%arg0: i32, %arg1: memref<1x8x512xf32, #tpu.memory_space<vmem>>, %arg2: memref<8x1xf32, #tpu.memory_space<vmem>>, %arg3: memref<8x1xf32, #tpu.memory_space<vmem>>, %arg4: memref<8x216xbf16, #tpu.memory_space<vmem>>, %arg5: memref<8x1xf32, #tpu.memory_space<vmem>>, %arg6: memref<27x1x512xf32, #tpu.memory_space<vmem>>, %arg7: memref<1x8x512xf32, #tpu.memory_space<vmem>>, %arg8: memref<8x768xf32, #tpu.memory_space<vmem>>, %arg9: memref<216x512xbf16, #tpu.memory_space<vmem>>) attributes {dimension_semantics = [#tpu.dimension_semantics<parallel>], iteration_bounds = array<i64: 2>, scalar_prefetch = 0 : i64, scratch_operands = 2 : i64, tpu.core_type = #tpu.core_type<tc>, window_params = [{transform_indices = @transform_0, window_bounds = array<i64: 1, 8, 512>}, {pipeline_mode = #tpu.pipeline_mode<synchronous>, transform_indices = @transform_1, window_bounds = array<i64: 8, 1>}, {pipeline_mode = #tpu.pipeline_mode<synchronous>, transform_indices = @transform_2, window_bounds = array<i64: 8, 1>}, {pipeline_mode = #tpu.pipeline_mode<synchronous>, transform_indices = @transform_3, window_bounds = array<i64: 8, 216>}, {pipeline_mode = #tpu.pipeline_mode<synchronous>, transform_indices = @transform_4, window_bounds = array<i64: 8, 1>}, {pipeline_mode = #tpu.pipeline_mode<synchronous>, transform_indices = @transform_5, window_bounds = array<i64: 27, 1, 512>}, {transform_indices = @transform_6, window_bounds = array<i64: 1, 8, 512>}]} {
    %cst = arith.constant 0.000000e+00 : f32
    %0 = vector.broadcast %cst : f32 to vector<8x128xf32>
    %c0 = arith.constant 0 : index
    %c0_0 = arith.constant 0 : index
    %1 = vector.load %arg8[%c0, %c0_0] : memref<8x768xf32, #tpu.memory_space<vmem>>, vector<8x128xf32>
    tpu.vector_store %arg8[%c0, %c0_0], %0 {strides = array<i32>} : memref<8x768xf32, #tpu.memory_space<vmem>>, vector<8x128xf32>,
    %cst_1 = arith.constant 0.000000e+00 : f32
    %2 = vector.broadcast %cst_1 : f32 to vector<8x128xf32>
    %c0_2 = arith.constant 0 : index
    %c640 = arith.constant 640 : index
    %3 = vector.load %arg8[%c0_2, %c640] : memref<8x768xf32, #tpu.memory_space<vmem>>, vector<8x128xf32>
    tpu.vector_store %arg8[%c0_2, %c640], %2 {strides = array<i32>} : memref<8x768xf32, #tpu.memory_space<vmem>>, vector<8x128xf32>,
    %c0_3 = arith.constant 0 : index
    %c0_4 = arith.constant 0 : index
    %c0_5 = arith.constant 0 : index
    %4 = vector.load %arg1[%c0_3, %c0_4, %c0_5] : memref<1x8x512xf32, #tpu.memory_space<vmem>>, vector<1x8x512xf32>
    %5 = vector.shape_cast %4 : vector<1x8x512xf32> to vector<8x512xf32>
    %c0_6 = arith.constant 0 : index
    %c0_7 = arith.constant 0 : index
    %6 = vector.load %arg2[%c0_6, %c0_7] : memref<8x1xf32, #tpu.memory_space<vmem>>, vector<8x1xf32>
    %7 = vector.broadcast %6 : vector<8x1xf32> to vector<8x512xf32>
    %8 = arith.mulf %5, %7 : vector<8x512xf32>
    %c0_8 = arith.constant 0 : index
    %c0_9 = arith.constant 0 : index
    %9 = vector.load %arg3[%c0_8, %c0_9] : memref<8x1xf32, #tpu.memory_space<vmem>>, vector<8x1xf32>
    %10 = vector.broadcast %9 : vector<8x1xf32> to vector<8x512xf32>
    %11 = arith.addf %8, %10 : vector<8x512xf32>
    %cst_10 = arith.constant 0.000000e+00 : f32
    %12 = vector.broadcast %cst_10 : f32 to vector<8x512xf32>
    %13 = arith.maximumf %11, %12 : vector<8x512xf32>
    %c0_11 = arith.constant 0 : index
    %c128 = arith.constant 128 : index
    %14 = vector.load %arg8[%c0_11, %c128] : memref<8x768xf32, #tpu.memory_space<vmem>>, vector<8x512xf32>
    tpu.vector_store %arg8[%c0_11, %c128], %13 {strides = array<i32>} : memref<8x768xf32, #tpu.memory_space<vmem>>, vector<8x512xf32>,
    %c0_12 = arith.constant 0 : index
    %c55 = arith.constant 55 : index
    %15 = vector.load %arg8[%c0_12, %c55] : memref<8x768xf32, #tpu.memory_space<vmem>>, vector<8x512xf32>
    %c0_13 = arith.constant 0 : index
    %c0_14 = arith.constant 0 : index
    %c0_15 = arith.constant 0 : index
    %16 = vector.load %arg6[%c0_13, %c0_14, %c0_15] : memref<27x1x512xf32, #tpu.memory_space<vmem>>, vector<1x1x512xf32>
    %17 = vector.shape_cast %16 : vector<1x1x512xf32> to vector<1x512xf32>
    %18 = vector.broadcast %17 : vector<1x512xf32> to vector<8x512xf32>
    %19 = arith.mulf %15, %18 : vector<8x512xf32>
    %20 = arith.truncf %19 : vector<8x512xf32> to vector<8x512xbf16>
    %c0_16 = arith.constant 0 : index
    %c0_17 = arith.constant 0 : index
    %21 = vector.load %arg9[%c0_16, %c0_17] : memref<216x512xbf16, #tpu.memory_space<vmem>>, vector<8x512xbf16>
    tpu.vector_store %arg9[%c0_16, %c0_17], %20 {strides = array<i32>} : memref<216x512xbf16, #tpu.memory_space<vmem>>, vector<8x512xbf16>,
    %c0_18 = arith.constant 0 : index
    %c56 = arith.constant 56 : index
    %22 = vector.load %arg8[%c0_18, %c56] : memref<8x768xf32, #tpu.memory_space<vmem>>, vector<8x512xf32>
    %c1 = arith.constant 1 : index
    %c0_19 = arith.constant 0 : index
    %c0_20 = arith.constant 0 : index
    %23 = vector.load %arg6[%c1, %c0_19, %c0_20] : memref<27x1x512xf32, #tpu.memory_space<vmem>>, vector<1x1x512xf32>
    %24 = vector.shape_cast %23 : vector<1x1x512xf32> to vector<1x512xf32>
    %25 = vector.broadcast %24 : vector<1x512xf32> to vector<8x512xf32>
    %26 = arith.mulf %22, %25 : vector<8x512xf32>
    %27 = arith.truncf %26 : vector<8x512xf32> to vector<8x512xbf16>
    %c8 = arith.constant 8 : index
    %c0_21 = arith.constant 0 : index
    %28 = vector.load %arg9[%c8, %c0_21] : memref<216x512xbf16, #tpu.memory_space<vmem>>, vector<8x512xbf16>
    tpu.vector_store %arg9[%c8, %c0_21], %27 {strides = array<i32>} : memref<216x512xbf16, #tpu.memory_space<vmem>>, vector<8x512xbf16>,
    %c0_22 = arith.constant 0 : index
    %c57 = arith.constant 57 : index
    %29 = vector.load %arg8[%c0_22, %c57] : memref<8x768xf32, #tpu.memory_space<vmem>>, vector<8x512xf32>
    %c2 = arith.constant 2 : index
    %c0_23 = arith.constant 0 : index
    %c0_24 = arith.constant 0 : index
    %30 = vector.load %arg6[%c2, %c0_23, %c0_24] : memref<27x1x512xf32, #tpu.memory_space<vmem>>, vector<1x1x512xf32>
    %31 = vector.shape_cast %30 : vector<1x1x512xf32> to vector<1x512xf32>
    %32 = vector.broadcast %31 : vector<1x512xf32> to vector<8x512xf32>
    %33 = arith.mulf %29, %32 : vector<8x512xf32>
    %34 = arith.truncf %33 : vector<8x512xf32> to vector<8x512xbf16>
    %c16 = arith.constant 16 : index
    %c0_25 = arith.constant 0 : index
    %35 = vector.load %arg9[%c16, %c0_25] : memref<216x512xbf16, #tpu.memory_space<vmem>>, vector<8x512xbf16>
    tpu.vector_store %arg9[%c16, %c0_25], %34 {strides = array<i32>} : memref<216x512xbf16, #tpu.memory_space<vmem>>, vector<8x512xbf16>,
    %c0_26 = arith.constant 0 : index
    %c63 = arith.constant 63 : index
    %36 = vector.load %arg8[%c0_26, %c63] : memref<8x768xf32, #tpu.memory_space<vmem>>, vector<8x512xf32>
    %c3 = arith.constant 3 : index
    %c0_27 = arith.constant 0 : index
    %c0_28 = arith.constant 0 : index
    %37 = vector.load %arg6[%c3, %c0_27, %c0_28] : memref<27x1x512xf32, #tpu.memory_space<vmem>>, vector<1x1x512xf32>
    %38 = vector.shape_cast %37 : vector<1x1x512xf32> to vector<1x512xf32>
    %39 = vector.broadcast %38 : vector<1x512xf32> to vector<8x512xf32>
    %40 = arith.mulf %36, %39 : vector<8x512xf32>
    %41 = arith.truncf %40 : vector<8x512xf32> to vector<8x512xbf16>
    %c24 = arith.constant 24 : index
    %c0_29 = arith.constant 0 : index
    %42 = vector.load %arg9[%c24, %c0_29] : memref<216x512xbf16, #tpu.memory_space<vmem>>, vector<8x512xbf16>
    tpu.vector_store %arg9[%c24, %c0_29], %41 {strides = array<i32>} : memref<216x512xbf16, #tpu.memory_space<vmem>>, vector<8x512xbf16>,
    %c0_30 = arith.constant 0 : index
    %c64 = arith.constant 64 : index
    %43 = vector.load %arg8[%c0_30, %c64] : memref<8x768xf32, #tpu.memory_space<vmem>>, vector<8x512xf32>
    %c4 = arith.constant 4 : index
    %c0_31 = arith.constant 0 : index
    %c0_32 = arith.constant 0 : index
    %44 = vector.load %arg6[%c4, %c0_31, %c0_32] : memref<27x1x512xf32, #tpu.memory_space<vmem>>, vector<1x1x512xf32>
    %45 = vector.shape_cast %44 : vector<1x1x512xf32> to vector<1x512xf32>
    %46 = vector.broadcast %45 : vector<1x512xf32> to vector<8x512xf32>
    %47 = arith.mulf %43, %46 : vector<8x512xf32>
    %48 = arith.truncf %47 : vector<8x512xf32> to vector<8x512xbf16>
    %c32 = arith.constant 32 : index
    %c0_33 = arith.constant 0 : index
    %49 = vector.load %arg9[%c32, %c0_33] : memref<216x512xbf16, #tpu.memory_space<vmem>>, vector<8x512xbf16>
    tpu.vector_store %arg9[%c32, %c0_33], %48 {strides = array<i32>} : memref<216x512xbf16, #tpu.memory_space<vmem>>, vector<8x512xbf16>,
    %c0_34 = arith.constant 0 : index
    %c65 = arith.constant 65 : index
    %50 = vector.load %arg8[%c0_34, %c65] : memref<8x768xf32, #tpu.memory_space<vmem>>, vector<8x512xf32>
    %c5 = arith.constant 5 : index
    %c0_35 = arith.constant 0 : index
    %c0_36 = arith.constant 0 : index
    %51 = vector.load %arg6[%c5, %c0_35, %c0_36] : memref<27x1x512xf32, #tpu.memory_space<vmem>>, vector<1x1x512xf32>
    %52 = vector.shape_cast %51 : vector<1x1x512xf32> to vector<1x512xf32>
    %53 = vector.broadcast %52 : vector<1x512xf32> to vector<8x512xf32>
    %54 = arith.mulf %50, %53 : vector<8x512xf32>
    %55 = arith.truncf %54 : vector<8x512xf32> to vector<8x512xbf16>
    %c40 = arith.constant 40 : index
    %c0_37 = arith.constant 0 : index
    %56 = vector.load %arg9[%c40, %c0_37] : memref<216x512xbf16, #tpu.memory_space<vmem>>, vector<8x512xbf16>
    tpu.vector_store %arg9[%c40, %c0_37], %55 {strides = array<i32>} : memref<216x512xbf16, #tpu.memory_space<vmem>>, vector<8x512xbf16>,
    %c0_38 = arith.constant 0 : index
    %c71 = arith.constant 71 : index
    %57 = vector.load %arg8[%c0_38, %c71] : memref<8x768xf32, #tpu.memory_space<vmem>>, vector<8x512xf32>
    %c6 = arith.constant 6 : index
    %c0_39 = arith.constant 0 : index
    %c0_40 = arith.constant 0 : index
    %58 = vector.load %arg6[%c6, %c0_39, %c0_40] : memref<27x1x512xf32, #tpu.memory_space<vmem>>, vector<1x1x512xf32>
    %59 = vector.shape_cast %58 : vector<1x1x512xf32> to vector<1x512xf32>
    %60 = vector.broadcast %59 : vector<1x512xf32> to vector<8x512xf32>
    %61 = arith.mulf %57, %60 : vector<8x512xf32>
    %62 = arith.truncf %61 : vector<8x512xf32> to vector<8x512xbf16>
    %c48 = arith.constant 48 : index
    %c0_41 = arith.constant 0 : index
    %63 = vector.load %arg9[%c48, %c0_41] : memref<216x512xbf16, #tpu.memory_space<vmem>>, vector<8x512xbf16>
    tpu.vector_store %arg9[%c48, %c0_41], %62 {strides = array<i32>} : memref<216x512xbf16, #tpu.memory_space<vmem>>, vector<8x512xbf16>,
    %c0_42 = arith.constant 0 : index
    %c72 = arith.constant 72 : index
    %64 = vector.load %arg8[%c0_42, %c72] : memref<8x768xf32, #tpu.memory_space<vmem>>, vector<8x512xf32>
    %c7 = arith.constant 7 : index
    %c0_43 = arith.constant 0 : index
    %c0_44 = arith.constant 0 : index
    %65 = vector.load %arg6[%c7, %c0_43, %c0_44] : memref<27x1x512xf32, #tpu.memory_space<vmem>>, vector<1x1x512xf32>
    %66 = vector.shape_cast %65 : vector<1x1x512xf32> to vector<1x512xf32>
    %67 = vector.broadcast %66 : vector<1x512xf32> to vector<8x512xf32>
    %68 = arith.mulf %64, %67 : vector<8x512xf32>
    %69 = arith.truncf %68 : vector<8x512xf32> to vector<8x512xbf16>
    %c56_45 = arith.constant 56 : index
    %c0_46 = arith.constant 0 : index
    %70 = vector.load %arg9[%c56_45, %c0_46] : memref<216x512xbf16, #tpu.memory_space<vmem>>, vector<8x512xbf16>
    tpu.vector_store %arg9[%c56_45, %c0_46], %69 {strides = array<i32>} : memref<216x512xbf16, #tpu.memory_space<vmem>>, vector<8x512xbf16>,
    %c0_47 = arith.constant 0 : index
    %c73 = arith.constant 73 : index
    %71 = vector.load %arg8[%c0_47, %c73] : memref<8x768xf32, #tpu.memory_space<vmem>>, vector<8x512xf32>
    %c8_48 = arith.constant 8 : index
    %c0_49 = arith.constant 0 : index
    %c0_50 = arith.constant 0 : index
    %72 = vector.load %arg6[%c8_48, %c0_49, %c0_50] : memref<27x1x512xf32, #tpu.memory_space<vmem>>, vector<1x1x512xf32>
    %73 = vector.shape_cast %72 : vector<1x1x512xf32> to vector<1x512xf32>
    %74 = vector.broadcast %73 : vector<1x512xf32> to vector<8x512xf32>
    %75 = arith.mulf %71, %74 : vector<8x512xf32>
    %76 = arith.truncf %75 : vector<8x512xf32> to vector<8x512xbf16>
    %c64_51 = arith.constant 64 : index
    %c0_52 = arith.constant 0 : index
    %77 = vector.load %arg9[%c64_51, %c0_52] : memref<216x512xbf16, #tpu.memory_space<vmem>>, vector<8x512xbf16>
    tpu.vector_store %arg9[%c64_51, %c0_52], %76 {strides = array<i32>} : memref<216x512xbf16, #tpu.memory_space<vmem>>, vector<8x512xbf16>,
    %c0_53 = arith.constant 0 : index
    %c119 = arith.constant 119 : index
    %78 = vector.load %arg8[%c0_53, %c119] : memref<8x768xf32, #tpu.memory_space<vmem>>, vector<8x512xf32>
    %c9 = arith.constant 9 : index
    %c0_54 = arith.constant 0 : index
    %c0_55 = arith.constant 0 : index
    %79 = vector.load %arg6[%c9, %c0_54, %c0_55] : memref<27x1x512xf32, #tpu.memory_space<vmem>>, vector<1x1x512xf32>
    %80 = vector.shape_cast %79 : vector<1x1x512xf32> to vector<1x512xf32>
    %81 = vector.broadcast %80 : vector<1x512xf32> to vector<8x512xf32>
    %82 = arith.mulf %78, %81 : vector<8x512xf32>
    %83 = arith.truncf %82 : vector<8x512xf32> to vector<8x512xbf16>
    %c72_56 = arith.constant 72 : index
    %c0_57 = arith.constant 0 : index
    %84 = vector.load %arg9[%c72_56, %c0_57] : memref<216x512xbf16, #tpu.memory_space<vmem>>, vector<8x512xbf16>
    tpu.vector_store %arg9[%c72_56, %c0_57], %83 {strides = array<i32>} : memref<216x512xbf16, #tpu.memory_space<vmem>>, vector<8x512xbf16>,
    %c0_58 = arith.constant 0 : index
    %c120 = arith.constant 120 : index
    %85 = vector.load %arg8[%c0_58, %c120] : memref<8x768xf32, #tpu.memory_space<vmem>>, vector<8x512xf32>
    %c10 = arith.constant 10 : index
    %c0_59 = arith.constant 0 : index
    %c0_60 = arith.constant 0 : index
    %86 = vector.load %arg6[%c10, %c0_59, %c0_60] : memref<27x1x512xf32, #tpu.memory_space<vmem>>, vector<1x1x512xf32>
    %87 = vector.shape_cast %86 : vector<1x1x512xf32> to vector<1x512xf32>
    %88 = vector.broadcast %87 : vector<1x512xf32> to vector<8x512xf32>
    %89 = arith.mulf %85, %88 : vector<8x512xf32>
    %90 = arith.truncf %89 : vector<8x512xf32> to vector<8x512xbf16>
    %c80 = arith.constant 80 : index
    %c0_61 = arith.constant 0 : index
    %91 = vector.load %arg9[%c80, %c0_61] : memref<216x512xbf16, #tpu.memory_space<vmem>>, vector<8x512xbf16>
    tpu.vector_store %arg9[%c80, %c0_61], %90 {strides = array<i32>} : memref<216x512xbf16, #tpu.memory_space<vmem>>, vector<8x512xbf16>,
    %c0_62 = arith.constant 0 : index
    %c121 = arith.constant 121 : index
    %92 = vector.load %arg8[%c0_62, %c121] : memref<8x768xf32, #tpu.memory_space<vmem>>, vector<8x512xf32>
    %c11 = arith.constant 11 : index
    %c0_63 = arith.constant 0 : index
    %c0_64 = arith.constant 0 : index
    %93 = vector.load %arg6[%c11, %c0_63, %c0_64] : memref<27x1x512xf32, #tpu.memory_space<vmem>>, vector<1x1x512xf32>
    %94 = vector.shape_cast %93 : vector<1x1x512xf32> to vector<1x512xf32>
    %95 = vector.broadcast %94 : vector<1x512xf32> to vector<8x512xf32>
    %96 = arith.mulf %92, %95 : vector<8x512xf32>
    %97 = arith.truncf %96 : vector<8x512xf32> to vector<8x512xbf16>
    %c88 = arith.constant 88 : index
    %c0_65 = arith.constant 0 : index
    %98 = vector.load %arg9[%c88, %c0_65] : memref<216x512xbf16, #tpu.memory_space<vmem>>, vector<8x512xbf16>
    tpu.vector_store %arg9[%c88, %c0_65], %97 {strides = array<i32>} : memref<216x512xbf16, #tpu.memory_space<vmem>>, vector<8x512xbf16>,
    %c0_66 = arith.constant 0 : index
    %c127 = arith.constant 127 : index
    %99 = vector.load %arg8[%c0_66, %c127] : memref<8x768xf32, #tpu.memory_space<vmem>>, vector<8x512xf32>
    %c12 = arith.constant 12 : index
    %c0_67 = arith.constant 0 : index
    %c0_68 = arith.constant 0 : index
    %100 = vector.load %arg6[%c12, %c0_67, %c0_68] : memref<27x1x512xf32, #tpu.memory_space<vmem>>, vector<1x1x512xf32>
    %101 = vector.shape_cast %100 : vector<1x1x512xf32> to vector<1x512xf32>
    %102 = vector.broadcast %101 : vector<1x512xf32> to vector<8x512xf32>
    %103 = arith.mulf %99, %102 : vector<8x512xf32>
    %104 = arith.truncf %103 : vector<8x512xf32> to vector<8x512xbf16>
    %c96 = arith.constant 96 : index
    %c0_69 = arith.constant 0 : index
    %105 = vector.load %arg9[%c96, %c0_69] : memref<216x512xbf16, #tpu.memory_space<vmem>>, vector<8x512xbf16>
    tpu.vector_store %arg9[%c96, %c0_69], %104 {strides = array<i32>} : memref<216x512xbf16, #tpu.memory_space<vmem>>, vector<8x512xbf16>,
    %c0_70 = arith.constant 0 : index
    %c128_71 = arith.constant 128 : index
    %106 = vector.load %arg8[%c0_70, %c128_71] : memref<8x768xf32, #tpu.memory_space<vmem>>, vector<8x512xf32>
    %c13 = arith.constant 13 : index
    %c0_72 = arith.constant 0 : index
    %c0_73 = arith.constant 0 : index
    %107 = vector.load %arg6[%c13, %c0_72, %c0_73] : memref<27x1x512xf32, #tpu.memory_space<vmem>>, vector<1x1x512xf32>
    %108 = vector.shape_cast %107 : vector<1x1x512xf32> to vector<1x512xf32>
    %109 = vector.broadcast %108 : vector<1x512xf32> to vector<8x512xf32>
    %110 = arith.mulf %106, %109 : vector<8x512xf32>
    %111 = arith.truncf %110 : vector<8x512xf32> to vector<8x512xbf16>
    %c104 = arith.constant 104 : index
    %c0_74 = arith.constant 0 : index
    %112 = vector.load %arg9[%c104, %c0_74] : memref<216x512xbf16, #tpu.memory_space<vmem>>, vector<8x512xbf16>
    tpu.vector_store %arg9[%c104, %c0_74], %111 {strides = array<i32>} : memref<216x512xbf16, #tpu.memory_space<vmem>>, vector<8x512xbf16>,
    %c0_75 = arith.constant 0 : index
    %c129 = arith.constant 129 : index
    %113 = vector.load %arg8[%c0_75, %c129] : memref<8x768xf32, #tpu.memory_space<vmem>>, vector<8x512xf32>
    %c14 = arith.constant 14 : index
    %c0_76 = arith.constant 0 : index
    %c0_77 = arith.constant 0 : index
    %114 = vector.load %arg6[%c14, %c0_76, %c0_77] : memref<27x1x512xf32, #tpu.memory_space<vmem>>, vector<1x1x512xf32>
    %115 = vector.shape_cast %114 : vector<1x1x512xf32> to vector<1x512xf32>
    %116 = vector.broadcast %115 : vector<1x512xf32> to vector<8x512xf32>
    %117 = arith.mulf %113, %116 : vector<8x512xf32>
    %118 = arith.truncf %117 : vector<8x512xf32> to vector<8x512xbf16>
    %c112 = arith.constant 112 : index
    %c0_78 = arith.constant 0 : index
    %119 = vector.load %arg9[%c112, %c0_78] : memref<216x512xbf16, #tpu.memory_space<vmem>>, vector<8x512xbf16>
    tpu.vector_store %arg9[%c112, %c0_78], %118 {strides = array<i32>} : memref<216x512xbf16, #tpu.memory_space<vmem>>, vector<8x512xbf16>,
    %c0_79 = arith.constant 0 : index
    %c135 = arith.constant 135 : index
    %120 = vector.load %arg8[%c0_79, %c135] : memref<8x768xf32, #tpu.memory_space<vmem>>, vector<8x512xf32>
    %c15 = arith.constant 15 : index
    %c0_80 = arith.constant 0 : index
    %c0_81 = arith.constant 0 : index
    %121 = vector.load %arg6[%c15, %c0_80, %c0_81] : memref<27x1x512xf32, #tpu.memory_space<vmem>>, vector<1x1x512xf32>
    %122 = vector.shape_cast %121 : vector<1x1x512xf32> to vector<1x512xf32>
    %123 = vector.broadcast %122 : vector<1x512xf32> to vector<8x512xf32>
    %124 = arith.mulf %120, %123 : vector<8x512xf32>
    %125 = arith.truncf %124 : vector<8x512xf32> to vector<8x512xbf16>
    %c120_82 = arith.constant 120 : index
    %c0_83 = arith.constant 0 : index
    %126 = vector.load %arg9[%c120_82, %c0_83] : memref<216x512xbf16, #tpu.memory_space<vmem>>, vector<8x512xbf16>
    tpu.vector_store %arg9[%c120_82, %c0_83], %125 {strides = array<i32>} : memref<216x512xbf16, #tpu.memory_space<vmem>>, vector<8x512xbf16>,
    %c0_84 = arith.constant 0 : index
    %c136 = arith.constant 136 : index
    %127 = vector.load %arg8[%c0_84, %c136] : memref<8x768xf32, #tpu.memory_space<vmem>>, vector<8x512xf32>
    %c16_85 = arith.constant 16 : index
    %c0_86 = arith.constant 0 : index
    %c0_87 = arith.constant 0 : index
    %128 = vector.load %arg6[%c16_85, %c0_86, %c0_87] : memref<27x1x512xf32, #tpu.memory_space<vmem>>, vector<1x1x512xf32>
    %129 = vector.shape_cast %128 : vector<1x1x512xf32> to vector<1x512xf32>
    %130 = vector.broadcast %129 : vector<1x512xf32> to vector<8x512xf32>
    %131 = arith.mulf %127, %130 : vector<8x512xf32>
    %132 = arith.truncf %131 : vector<8x512xf32> to vector<8x512xbf16>
    %c128_88 = arith.constant 128 : index
    %c0_89 = arith.constant 0 : index
    %133 = vector.load %arg9[%c128_88, %c0_89] : memref<216x512xbf16, #tpu.memory_space<vmem>>, vector<8x512xbf16>
    tpu.vector_store %arg9[%c128_88, %c0_89], %132 {strides = array<i32>} : memref<216x512xbf16, #tpu.memory_space<vmem>>, vector<8x512xbf16>,
    %c0_90 = arith.constant 0 : index
    %c137 = arith.constant 137 : index
    %134 = vector.load %arg8[%c0_90, %c137] : memref<8x768xf32, #tpu.memory_space<vmem>>, vector<8x512xf32>
    %c17 = arith.constant 17 : index
    %c0_91 = arith.constant 0 : index
    %c0_92 = arith.constant 0 : index
    %135 = vector.load %arg6[%c17, %c0_91, %c0_92] : memref<27x1x512xf32, #tpu.memory_space<vmem>>, vector<1x1x512xf32>
    %136 = vector.shape_cast %135 : vector<1x1x512xf32> to vector<1x512xf32>
    %137 = vector.broadcast %136 : vector<1x512xf32> to vector<8x512xf32>
    %138 = arith.mulf %134, %137 : vector<8x512xf32>
    %139 = arith.truncf %138 : vector<8x512xf32> to vector<8x512xbf16>
    %c136_93 = arith.constant 136 : index
    %c0_94 = arith.constant 0 : index
    %140 = vector.load %arg9[%c136_93, %c0_94] : memref<216x512xbf16, #tpu.memory_space<vmem>>, vector<8x512xbf16>
    tpu.vector_store %arg9[%c136_93, %c0_94], %139 {strides = array<i32>} : memref<216x512xbf16, #tpu.memory_space<vmem>>, vector<8x512xbf16>,
    %c0_95 = arith.constant 0 : index
    %c183 = arith.constant 183 : index
    %141 = vector.load %arg8[%c0_95, %c183] : memref<8x768xf32, #tpu.memory_space<vmem>>, vector<8x512xf32>
    %c18 = arith.constant 18 : index
    %c0_96 = arith.constant 0 : index
    %c0_97 = arith.constant 0 : index
    %142 = vector.load %arg6[%c18, %c0_96, %c0_97] : memref<27x1x512xf32, #tpu.memory_space<vmem>>, vector<1x1x512xf32>
    %143 = vector.shape_cast %142 : vector<1x1x512xf32> to vector<1x512xf32>
    %144 = vector.broadcast %143 : vector<1x512xf32> to vector<8x512xf32>
    %145 = arith.mulf %141, %144 : vector<8x512xf32>
    %146 = arith.truncf %145 : vector<8x512xf32> to vector<8x512xbf16>
    %c144 = arith.constant 144 : index
    %c0_98 = arith.constant 0 : index
    %147 = vector.load %arg9[%c144, %c0_98] : memref<216x512xbf16, #tpu.memory_space<vmem>>, vector<8x512xbf16>
    tpu.vector_store %arg9[%c144, %c0_98], %146 {strides = array<i32>} : memref<216x512xbf16, #tpu.memory_space<vmem>>, vector<8x512xbf16>,
    %c0_99 = arith.constant 0 : index
    %c184 = arith.constant 184 : index
    %148 = vector.load %arg8[%c0_99, %c184] : memref<8x768xf32, #tpu.memory_space<vmem>>, vector<8x512xf32>
    %c19 = arith.constant 19 : index
    %c0_100 = arith.constant 0 : index
    %c0_101 = arith.constant 0 : index
    %149 = vector.load %arg6[%c19, %c0_100, %c0_101] : memref<27x1x512xf32, #tpu.memory_space<vmem>>, vector<1x1x512xf32>
    %150 = vector.shape_cast %149 : vector<1x1x512xf32> to vector<1x512xf32>
    %151 = vector.broadcast %150 : vector<1x512xf32> to vector<8x512xf32>
    %152 = arith.mulf %148, %151 : vector<8x512xf32>
    %153 = arith.truncf %152 : vector<8x512xf32> to vector<8x512xbf16>
    %c152 = arith.constant 152 : index
    %c0_102 = arith.constant 0 : index
    %154 = vector.load %arg9[%c152, %c0_102] : memref<216x512xbf16, #tpu.memory_space<vmem>>, vector<8x512xbf16>
    tpu.vector_store %arg9[%c152, %c0_102], %153 {strides = array<i32>} : memref<216x512xbf16, #tpu.memory_space<vmem>>, vector<8x512xbf16>,
    %c0_103 = arith.constant 0 : index
    %c185 = arith.constant 185 : index
    %155 = vector.load %arg8[%c0_103, %c185] : memref<8x768xf32, #tpu.memory_space<vmem>>, vector<8x512xf32>
    %c20 = arith.constant 20 : index
    %c0_104 = arith.constant 0 : index
    %c0_105 = arith.constant 0 : index
    %156 = vector.load %arg6[%c20, %c0_104, %c0_105] : memref<27x1x512xf32, #tpu.memory_space<vmem>>, vector<1x1x512xf32>
    %157 = vector.shape_cast %156 : vector<1x1x512xf32> to vector<1x512xf32>
    %158 = vector.broadcast %157 : vector<1x512xf32> to vector<8x512xf32>
    %159 = arith.mulf %155, %158 : vector<8x512xf32>
    %160 = arith.truncf %159 : vector<8x512xf32> to vector<8x512xbf16>
    %c160 = arith.constant 160 : index
    %c0_106 = arith.constant 0 : index
    %161 = vector.load %arg9[%c160, %c0_106] : memref<216x512xbf16, #tpu.memory_space<vmem>>, vector<8x512xbf16>
    tpu.vector_store %arg9[%c160, %c0_106], %160 {strides = array<i32>} : memref<216x512xbf16, #tpu.memory_space<vmem>>, vector<8x512xbf16>,
    %c0_107 = arith.constant 0 : index
    %c191 = arith.constant 191 : index
    %162 = vector.load %arg8[%c0_107, %c191] : memref<8x768xf32, #tpu.memory_space<vmem>>, vector<8x512xf32>
    %c21 = arith.constant 21 : index
    %c0_108 = arith.constant 0 : index
    %c0_109 = arith.constant 0 : index
    %163 = vector.load %arg6[%c21, %c0_108, %c0_109] : memref<27x1x512xf32, #tpu.memory_space<vmem>>, vector<1x1x512xf32>
    %164 = vector.shape_cast %163 : vector<1x1x512xf32> to vector<1x512xf32>
    %165 = vector.broadcast %164 : vector<1x512xf32> to vector<8x512xf32>
    %166 = arith.mulf %162, %165 : vector<8x512xf32>
    %167 = arith.truncf %166 : vector<8x512xf32> to vector<8x512xbf16>
    %c168 = arith.constant 168 : index
    %c0_110 = arith.constant 0 : index
    %168 = vector.load %arg9[%c168, %c0_110] : memref<216x512xbf16, #tpu.memory_space<vmem>>, vector<8x512xbf16>
    tpu.vector_store %arg9[%c168, %c0_110], %167 {strides = array<i32>} : memref<216x512xbf16, #tpu.memory_space<vmem>>, vector<8x512xbf16>,
    %c0_111 = arith.constant 0 : index
    %c192 = arith.constant 192 : index
    %169 = vector.load %arg8[%c0_111, %c192] : memref<8x768xf32, #tpu.memory_space<vmem>>, vector<8x512xf32>
    %c22 = arith.constant 22 : index
    %c0_112 = arith.constant 0 : index
    %c0_113 = arith.constant 0 : index
    %170 = vector.load %arg6[%c22, %c0_112, %c0_113] : memref<27x1x512xf32, #tpu.memory_space<vmem>>, vector<1x1x512xf32>
    %171 = vector.shape_cast %170 : vector<1x1x512xf32> to vector<1x512xf32>
    %172 = vector.broadcast %171 : vector<1x512xf32> to vector<8x512xf32>
    %173 = arith.mulf %169, %172 : vector<8x512xf32>
    %174 = arith.truncf %173 : vector<8x512xf32> to vector<8x512xbf16>
    %c176 = arith.constant 176 : index
    %c0_114 = arith.constant 0 : index
    %175 = vector.load %arg9[%c176, %c0_114] : memref<216x512xbf16, #tpu.memory_space<vmem>>, vector<8x512xbf16>
    tpu.vector_store %arg9[%c176, %c0_114], %174 {strides = array<i32>} : memref<216x512xbf16, #tpu.memory_space<vmem>>, vector<8x512xbf16>,
    %c0_115 = arith.constant 0 : index
    %c193 = arith.constant 193 : index
    %176 = vector.load %arg8[%c0_115, %c193] : memref<8x768xf32, #tpu.memory_space<vmem>>, vector<8x512xf32>
    %c23 = arith.constant 23 : index
    %c0_116 = arith.constant 0 : index
    %c0_117 = arith.constant 0 : index
    %177 = vector.load %arg6[%c23, %c0_116, %c0_117] : memref<27x1x512xf32, #tpu.memory_space<vmem>>, vector<1x1x512xf32>
    %178 = vector.shape_cast %177 : vector<1x1x512xf32> to vector<1x512xf32>
    %179 = vector.broadcast %178 : vector<1x512xf32> to vector<8x512xf32>
    %180 = arith.mulf %176, %179 : vector<8x512xf32>
    %181 = arith.truncf %180 : vector<8x512xf32> to vector<8x512xbf16>
    %c184_118 = arith.constant 184 : index
    %c0_119 = arith.constant 0 : index
    %182 = vector.load %arg9[%c184_118, %c0_119] : memref<216x512xbf16, #tpu.memory_space<vmem>>, vector<8x512xbf16>
    tpu.vector_store %arg9[%c184_118, %c0_119], %181 {strides = array<i32>} : memref<216x512xbf16, #tpu.memory_space<vmem>>, vector<8x512xbf16>,
    %c0_120 = arith.constant 0 : index
    %c199 = arith.constant 199 : index
    %183 = vector.load %arg8[%c0_120, %c199] : memref<8x768xf32, #tpu.memory_space<vmem>>, vector<8x512xf32>
    %c24_121 = arith.constant 24 : index
    %c0_122 = arith.constant 0 : index
    %c0_123 = arith.constant 0 : index
    %184 = vector.load %arg6[%c24_121, %c0_122, %c0_123] : memref<27x1x512xf32, #tpu.memory_space<vmem>>, vector<1x1x512xf32>
    %185 = vector.shape_cast %184 : vector<1x1x512xf32> to vector<1x512xf32>
    %186 = vector.broadcast %185 : vector<1x512xf32> to vector<8x512xf32>
    %187 = arith.mulf %183, %186 : vector<8x512xf32>
    %188 = arith.truncf %187 : vector<8x512xf32> to vector<8x512xbf16>
    %c192_124 = arith.constant 192 : index
    %c0_125 = arith.constant 0 : index
    %189 = vector.load %arg9[%c192_124, %c0_125] : memref<216x512xbf16, #tpu.memory_space<vmem>>, vector<8x512xbf16>
    tpu.vector_store %arg9[%c192_124, %c0_125], %188 {strides = array<i32>} : memref<216x512xbf16, #tpu.memory_space<vmem>>, vector<8x512xbf16>,
    %c0_126 = arith.constant 0 : index
    %c200 = arith.constant 200 : index
    %190 = vector.load %arg8[%c0_126, %c200] : memref<8x768xf32, #tpu.memory_space<vmem>>, vector<8x512xf32>
    %c25 = arith.constant 25 : index
    %c0_127 = arith.constant 0 : index
    %c0_128 = arith.constant 0 : index
    %191 = vector.load %arg6[%c25, %c0_127, %c0_128] : memref<27x1x512xf32, #tpu.memory_space<vmem>>, vector<1x1x512xf32>
    %192 = vector.shape_cast %191 : vector<1x1x512xf32> to vector<1x512xf32>
    %193 = vector.broadcast %192 : vector<1x512xf32> to vector<8x512xf32>
    %194 = arith.mulf %190, %193 : vector<8x512xf32>
    %195 = arith.truncf %194 : vector<8x512xf32> to vector<8x512xbf16>
    %c200_129 = arith.constant 200 : index
    %c0_130 = arith.constant 0 : index
    %196 = vector.load %arg9[%c200_129, %c0_130] : memref<216x512xbf16, #tpu.memory_space<vmem>>, vector<8x512xbf16>
    tpu.vector_store %arg9[%c200_129, %c0_130], %195 {strides = array<i32>} : memref<216x512xbf16, #tpu.memory_space<vmem>>, vector<8x512xbf16>,
    %c0_131 = arith.constant 0 : index
    %c201 = arith.constant 201 : index
    %197 = vector.load %arg8[%c0_131, %c201] : memref<8x768xf32, #tpu.memory_space<vmem>>, vector<8x512xf32>
    %c26 = arith.constant 26 : index
    %c0_132 = arith.constant 0 : index
    %c0_133 = arith.constant 0 : index
    %198 = vector.load %arg6[%c26, %c0_132, %c0_133] : memref<27x1x512xf32, #tpu.memory_space<vmem>>, vector<1x1x512xf32>
    %199 = vector.shape_cast %198 : vector<1x1x512xf32> to vector<1x512xf32>
    %200 = vector.broadcast %199 : vector<1x512xf32> to vector<8x512xf32>
    %201 = arith.mulf %197, %200 : vector<8x512xf32>
    %202 = arith.truncf %201 : vector<8x512xf32> to vector<8x512xbf16>
    %c208 = arith.constant 208 : index
    %c0_134 = arith.constant 0 : index
    %203 = vector.load %arg9[%c208, %c0_134] : memref<216x512xbf16, #tpu.memory_space<vmem>>, vector<8x512xbf16>
    tpu.vector_store %arg9[%c208, %c0_134], %202 {strides = array<i32>} : memref<216x512xbf16, #tpu.memory_space<vmem>>, vector<8x512xbf16>,
    %c0_135 = arith.constant 0 : index
    %c0_136 = arith.constant 0 : index
    %204 = vector.load %arg4[%c0_135, %c0_136] : memref<8x216xbf16, #tpu.memory_space<vmem>>, vector<8x216xbf16>
    %c0_137 = arith.constant 0 : index
    %c0_138 = arith.constant 0 : index
    %205 = vector.load %arg9[%c0_137, %c0_138] : memref<216x512xbf16, #tpu.memory_space<vmem>>, vector<216x512xbf16>
    %cst_139 = arith.constant dense<0.000000e+00> : vector<8x512xf32>
    %206 = tpu.matmul %204, %205, %cst_139 {dimension_numbers = #tpu.dot_dimension_numbers<[1], [0], [0], [1], [0, 0, 1, 1], [], []>} : vector<8x216xbf16>, vector<216x512xbf16>, vector<8x512xf32> -> vector<8x512xf32>
    %c0_140 = arith.constant 0 : index
    %c0_141 = arith.constant 0 : index
    %207 = vector.load %arg5[%c0_140, %c0_141] : memref<8x1xf32, #tpu.memory_space<vmem>>, vector<8x1xf32>
    %208 = vector.broadcast %207 : vector<8x1xf32> to vector<8x512xf32>
    %209 = arith.addf %206, %208 : vector<8x512xf32>
    %c0_142 = arith.constant 0 : index
    %c0_143 = arith.constant 0 : index
    %c0_144 = arith.constant 0 : index
    %210 = vector.load %arg7[%c0_142, %c0_143, %c0_144] : memref<1x8x512xf32, #tpu.memory_space<vmem>>, vector<1x8x512xf32>
    %211 = vector.shape_cast %210 : vector<1x8x512xf32> to vector<8x512xf32>
    %212 = vector.shape_cast %209 : vector<8x512xf32> to vector<1x8x512xf32>
    tpu.vector_store %arg7[%c0_142, %c0_143, %c0_144], %212 {strides = array<i32>} : memref<1x8x512xf32, #tpu.memory_space<vmem>>, vector<1x8x512xf32>,
    return
  }
  func.func @transform_0(%arg0: i32) -> (i32, i32, i32) {
    %c0_i32 = arith.constant 0 : i32
    %c0_i32_0 = arith.constant 0 : i32
    %c0_i32_1 = arith.constant 0 : i32
    return %arg0, %c0_i32, %c0_i32_0 : i32, i32, i32
  }
  func.func @transform_1(%arg0: i32) -> (i32, i32) {
    %c0_i32 = arith.constant 0 : i32
    %c0_i32_0 = arith.constant 0 : i32
    %c0_i32_1 = arith.constant 0 : i32
    return %c0_i32, %c0_i32_0 : i32, i32
  }
  func.func @transform_2(%arg0: i32) -> (i32, i32) {
    %c0_i32 = arith.constant 0 : i32
    %c0_i32_0 = arith.constant 0 : i32
    %c0_i32_1 = arith.constant 0 : i32
    return %c0_i32, %c0_i32_0 : i32, i32
  }
  func.func @transform_3(%arg0: i32) -> (i32, i32) {
    %c0_i32 = arith.constant 0 : i32
    %c0_i32_0 = arith.constant 0 : i32
    %c0_i32_1 = arith.constant 0 : i32
    return %c0_i32, %c0_i32_0 : i32, i32
  }
  func.func @transform_4(%arg0: i32) -> (i32, i32) {
    %c0_i32 = arith.constant 0 : i32
    %c0_i32_0 = arith.constant 0 : i32
    %c0_i32_1 = arith.constant 0 : i32
    return %c0_i32, %c0_i32_0 : i32, i32
  }
  func.func @transform_5(%arg0: i32) -> (i32, i32, i32) {
    %c0_i32 = arith.constant 0 : i32
    %c0_i32_0 = arith.constant 0 : i32
    %c0_i32_1 = arith.constant 0 : i32
    %c0_i32_2 = arith.constant 0 : i32
    return %c0_i32, %c0_i32_0, %c0_i32_1 : i32, i32, i32
  }
  func.func @transform_6(%arg0: i32) -> (i32, i32, i32) {
    %c0_i32 = arith.constant 0 : i32
    %c0_i32_0 = arith.constant 0 : i32
    %c0_i32_1 = arith.constant 0 : i32
    return %arg0, %c0_i32, %c0_i32_0 : i32, i32, i32
  }
}

module attributes {stable_mosaic.version = 11 : i64} {
  func.func @kernel(%arg0: i32, %arg1: memref<1x16x512xf32, #tpu.memory_space<vmem>>, %arg2: memref<16x1xf32, #tpu.memory_space<vmem>>, %arg3: memref<16x1xf32, #tpu.memory_space<vmem>>, %arg4: memref<8x432xbf16, #tpu.memory_space<vmem>>, %arg5: memref<8x1xf32, #tpu.memory_space<vmem>>, %arg6: memref<27x1x512xf32, #tpu.memory_space<vmem>>, %arg7: memref<1x8x512xf32, #tpu.memory_space<vmem>>, %arg8: memref<16x768xf32, #tpu.memory_space<vmem>>, %arg9: memref<432x512xbf16, #tpu.memory_space<vmem>>) attributes {dimension_semantics = [#tpu.dimension_semantics<parallel>], iteration_bounds = array<i64: 2>, scalar_prefetch = 0 : i64, scratch_operands = 2 : i64, tpu.core_type = #tpu.core_type<tc>, window_params = [{transform_indices = @transform_0, window_bounds = array<i64: 1, 16, 512>}, {pipeline_mode = #tpu.pipeline_mode<synchronous>, transform_indices = @transform_1, window_bounds = array<i64: 16, 1>}, {pipeline_mode = #tpu.pipeline_mode<synchronous>, transform_indices = @transform_2, window_bounds = array<i64: 16, 1>}, {pipeline_mode = #tpu.pipeline_mode<synchronous>, transform_indices = @transform_3, window_bounds = array<i64: 8, 432>}, {pipeline_mode = #tpu.pipeline_mode<synchronous>, transform_indices = @transform_4, window_bounds = array<i64: 8, 1>}, {pipeline_mode = #tpu.pipeline_mode<synchronous>, transform_indices = @transform_5, window_bounds = array<i64: 27, 1, 512>}, {transform_indices = @transform_6, window_bounds = array<i64: 1, 8, 512>}]} {
    %cst = arith.constant 0.000000e+00 : f32
    %0 = vector.broadcast %cst : f32 to vector<16x128xf32>
    %c0 = arith.constant 0 : index
    %c0_0 = arith.constant 0 : index
    %1 = vector.load %arg8[%c0, %c0_0] : memref<16x768xf32, #tpu.memory_space<vmem>>, vector<16x128xf32>
    tpu.vector_store %arg8[%c0, %c0_0], %0 {strides = array<i32>} : memref<16x768xf32, #tpu.memory_space<vmem>>, vector<16x128xf32>,
    %cst_1 = arith.constant 0.000000e+00 : f32
    %2 = vector.broadcast %cst_1 : f32 to vector<16x128xf32>
    %c0_2 = arith.constant 0 : index
    %c640 = arith.constant 640 : index
    %3 = vector.load %arg8[%c0_2, %c640] : memref<16x768xf32, #tpu.memory_space<vmem>>, vector<16x128xf32>
    tpu.vector_store %arg8[%c0_2, %c640], %2 {strides = array<i32>} : memref<16x768xf32, #tpu.memory_space<vmem>>, vector<16x128xf32>,
    %c0_3 = arith.constant 0 : index
    %c0_4 = arith.constant 0 : index
    %c0_5 = arith.constant 0 : index
    %4 = vector.load %arg1[%c0_3, %c0_4, %c0_5] : memref<1x16x512xf32, #tpu.memory_space<vmem>>, vector<1x16x512xf32>
    %5 = vector.shape_cast %4 : vector<1x16x512xf32> to vector<16x512xf32>
    %c0_6 = arith.constant 0 : index
    %c0_7 = arith.constant 0 : index
    %6 = vector.load %arg2[%c0_6, %c0_7] : memref<16x1xf32, #tpu.memory_space<vmem>>, vector<16x1xf32>
    %7 = vector.broadcast %6 : vector<16x1xf32> to vector<16x512xf32>
    %8 = arith.mulf %5, %7 : vector<16x512xf32>
    %c0_8 = arith.constant 0 : index
    %c0_9 = arith.constant 0 : index
    %9 = vector.load %arg3[%c0_8, %c0_9] : memref<16x1xf32, #tpu.memory_space<vmem>>, vector<16x1xf32>
    %10 = vector.broadcast %9 : vector<16x1xf32> to vector<16x512xf32>
    %11 = arith.addf %8, %10 : vector<16x512xf32>
    %cst_10 = arith.constant 0.000000e+00 : f32
    %12 = vector.broadcast %cst_10 : f32 to vector<16x512xf32>
    %13 = arith.maximumf %11, %12 : vector<16x512xf32>
    %c0_11 = arith.constant 0 : index
    %c128 = arith.constant 128 : index
    %14 = vector.load %arg8[%c0_11, %c128] : memref<16x768xf32, #tpu.memory_space<vmem>>, vector<16x512xf32>
    tpu.vector_store %arg8[%c0_11, %c128], %13 {strides = array<i32>} : memref<16x768xf32, #tpu.memory_space<vmem>>, vector<16x512xf32>,
    %c0_12 = arith.constant 0 : index
    %c55 = arith.constant 55 : index
    %15 = vector.load %arg8[%c0_12, %c55] : memref<16x768xf32, #tpu.memory_space<vmem>>, vector<16x512xf32>
    %c0_13 = arith.constant 0 : index
    %c0_14 = arith.constant 0 : index
    %c0_15 = arith.constant 0 : index
    %16 = vector.load %arg6[%c0_13, %c0_14, %c0_15] : memref<27x1x512xf32, #tpu.memory_space<vmem>>, vector<1x1x512xf32>
    %17 = vector.shape_cast %16 : vector<1x1x512xf32> to vector<1x512xf32>
    %18 = vector.broadcast %17 : vector<1x512xf32> to vector<16x512xf32>
    %19 = arith.mulf %15, %18 : vector<16x512xf32>
    %20 = arith.truncf %19 : vector<16x512xf32> to vector<16x512xbf16>
    %c0_16 = arith.constant 0 : index
    %c0_17 = arith.constant 0 : index
    %21 = vector.load %arg9[%c0_16, %c0_17] : memref<432x512xbf16, #tpu.memory_space<vmem>>, vector<16x512xbf16>
    tpu.vector_store %arg9[%c0_16, %c0_17], %20 {strides = array<i32>} : memref<432x512xbf16, #tpu.memory_space<vmem>>, vector<16x512xbf16>,
    %c0_18 = arith.constant 0 : index
    %c56 = arith.constant 56 : index
    %22 = vector.load %arg8[%c0_18, %c56] : memref<16x768xf32, #tpu.memory_space<vmem>>, vector<16x512xf32>
    %c1 = arith.constant 1 : index
    %c0_19 = arith.constant 0 : index
    %c0_20 = arith.constant 0 : index
    %23 = vector.load %arg6[%c1, %c0_19, %c0_20] : memref<27x1x512xf32, #tpu.memory_space<vmem>>, vector<1x1x512xf32>
    %24 = vector.shape_cast %23 : vector<1x1x512xf32> to vector<1x512xf32>
    %25 = vector.broadcast %24 : vector<1x512xf32> to vector<16x512xf32>
    %26 = arith.mulf %22, %25 : vector<16x512xf32>
    %27 = arith.truncf %26 : vector<16x512xf32> to vector<16x512xbf16>
    %c16 = arith.constant 16 : index
    %c0_21 = arith.constant 0 : index
    %28 = vector.load %arg9[%c16, %c0_21] : memref<432x512xbf16, #tpu.memory_space<vmem>>, vector<16x512xbf16>
    tpu.vector_store %arg9[%c16, %c0_21], %27 {strides = array<i32>} : memref<432x512xbf16, #tpu.memory_space<vmem>>, vector<16x512xbf16>,
    %c0_22 = arith.constant 0 : index
    %c57 = arith.constant 57 : index
    %29 = vector.load %arg8[%c0_22, %c57] : memref<16x768xf32, #tpu.memory_space<vmem>>, vector<16x512xf32>
    %c2 = arith.constant 2 : index
    %c0_23 = arith.constant 0 : index
    %c0_24 = arith.constant 0 : index
    %30 = vector.load %arg6[%c2, %c0_23, %c0_24] : memref<27x1x512xf32, #tpu.memory_space<vmem>>, vector<1x1x512xf32>
    %31 = vector.shape_cast %30 : vector<1x1x512xf32> to vector<1x512xf32>
    %32 = vector.broadcast %31 : vector<1x512xf32> to vector<16x512xf32>
    %33 = arith.mulf %29, %32 : vector<16x512xf32>
    %34 = arith.truncf %33 : vector<16x512xf32> to vector<16x512xbf16>
    %c32 = arith.constant 32 : index
    %c0_25 = arith.constant 0 : index
    %35 = vector.load %arg9[%c32, %c0_25] : memref<432x512xbf16, #tpu.memory_space<vmem>>, vector<16x512xbf16>
    tpu.vector_store %arg9[%c32, %c0_25], %34 {strides = array<i32>} : memref<432x512xbf16, #tpu.memory_space<vmem>>, vector<16x512xbf16>,
    %c0_26 = arith.constant 0 : index
    %c63 = arith.constant 63 : index
    %36 = vector.load %arg8[%c0_26, %c63] : memref<16x768xf32, #tpu.memory_space<vmem>>, vector<16x512xf32>
    %c3 = arith.constant 3 : index
    %c0_27 = arith.constant 0 : index
    %c0_28 = arith.constant 0 : index
    %37 = vector.load %arg6[%c3, %c0_27, %c0_28] : memref<27x1x512xf32, #tpu.memory_space<vmem>>, vector<1x1x512xf32>
    %38 = vector.shape_cast %37 : vector<1x1x512xf32> to vector<1x512xf32>
    %39 = vector.broadcast %38 : vector<1x512xf32> to vector<16x512xf32>
    %40 = arith.mulf %36, %39 : vector<16x512xf32>
    %41 = arith.truncf %40 : vector<16x512xf32> to vector<16x512xbf16>
    %c48 = arith.constant 48 : index
    %c0_29 = arith.constant 0 : index
    %42 = vector.load %arg9[%c48, %c0_29] : memref<432x512xbf16, #tpu.memory_space<vmem>>, vector<16x512xbf16>
    tpu.vector_store %arg9[%c48, %c0_29], %41 {strides = array<i32>} : memref<432x512xbf16, #tpu.memory_space<vmem>>, vector<16x512xbf16>,
    %c0_30 = arith.constant 0 : index
    %c64 = arith.constant 64 : index
    %43 = vector.load %arg8[%c0_30, %c64] : memref<16x768xf32, #tpu.memory_space<vmem>>, vector<16x512xf32>
    %c4 = arith.constant 4 : index
    %c0_31 = arith.constant 0 : index
    %c0_32 = arith.constant 0 : index
    %44 = vector.load %arg6[%c4, %c0_31, %c0_32] : memref<27x1x512xf32, #tpu.memory_space<vmem>>, vector<1x1x512xf32>
    %45 = vector.shape_cast %44 : vector<1x1x512xf32> to vector<1x512xf32>
    %46 = vector.broadcast %45 : vector<1x512xf32> to vector<16x512xf32>
    %47 = arith.mulf %43, %46 : vector<16x512xf32>
    %48 = arith.truncf %47 : vector<16x512xf32> to vector<16x512xbf16>
    %c64_33 = arith.constant 64 : index
    %c0_34 = arith.constant 0 : index
    %49 = vector.load %arg9[%c64_33, %c0_34] : memref<432x512xbf16, #tpu.memory_space<vmem>>, vector<16x512xbf16>
    tpu.vector_store %arg9[%c64_33, %c0_34], %48 {strides = array<i32>} : memref<432x512xbf16, #tpu.memory_space<vmem>>, vector<16x512xbf16>,
    %c0_35 = arith.constant 0 : index
    %c65 = arith.constant 65 : index
    %50 = vector.load %arg8[%c0_35, %c65] : memref<16x768xf32, #tpu.memory_space<vmem>>, vector<16x512xf32>
    %c5 = arith.constant 5 : index
    %c0_36 = arith.constant 0 : index
    %c0_37 = arith.constant 0 : index
    %51 = vector.load %arg6[%c5, %c0_36, %c0_37] : memref<27x1x512xf32, #tpu.memory_space<vmem>>, vector<1x1x512xf32>
    %52 = vector.shape_cast %51 : vector<1x1x512xf32> to vector<1x512xf32>
    %53 = vector.broadcast %52 : vector<1x512xf32> to vector<16x512xf32>
    %54 = arith.mulf %50, %53 : vector<16x512xf32>
    %55 = arith.truncf %54 : vector<16x512xf32> to vector<16x512xbf16>
    %c80 = arith.constant 80 : index
    %c0_38 = arith.constant 0 : index
    %56 = vector.load %arg9[%c80, %c0_38] : memref<432x512xbf16, #tpu.memory_space<vmem>>, vector<16x512xbf16>
    tpu.vector_store %arg9[%c80, %c0_38], %55 {strides = array<i32>} : memref<432x512xbf16, #tpu.memory_space<vmem>>, vector<16x512xbf16>,
    %c0_39 = arith.constant 0 : index
    %c71 = arith.constant 71 : index
    %57 = vector.load %arg8[%c0_39, %c71] : memref<16x768xf32, #tpu.memory_space<vmem>>, vector<16x512xf32>
    %c6 = arith.constant 6 : index
    %c0_40 = arith.constant 0 : index
    %c0_41 = arith.constant 0 : index
    %58 = vector.load %arg6[%c6, %c0_40, %c0_41] : memref<27x1x512xf32, #tpu.memory_space<vmem>>, vector<1x1x512xf32>
    %59 = vector.shape_cast %58 : vector<1x1x512xf32> to vector<1x512xf32>
    %60 = vector.broadcast %59 : vector<1x512xf32> to vector<16x512xf32>
    %61 = arith.mulf %57, %60 : vector<16x512xf32>
    %62 = arith.truncf %61 : vector<16x512xf32> to vector<16x512xbf16>
    %c96 = arith.constant 96 : index
    %c0_42 = arith.constant 0 : index
    %63 = vector.load %arg9[%c96, %c0_42] : memref<432x512xbf16, #tpu.memory_space<vmem>>, vector<16x512xbf16>
    tpu.vector_store %arg9[%c96, %c0_42], %62 {strides = array<i32>} : memref<432x512xbf16, #tpu.memory_space<vmem>>, vector<16x512xbf16>,
    %c0_43 = arith.constant 0 : index
    %c72 = arith.constant 72 : index
    %64 = vector.load %arg8[%c0_43, %c72] : memref<16x768xf32, #tpu.memory_space<vmem>>, vector<16x512xf32>
    %c7 = arith.constant 7 : index
    %c0_44 = arith.constant 0 : index
    %c0_45 = arith.constant 0 : index
    %65 = vector.load %arg6[%c7, %c0_44, %c0_45] : memref<27x1x512xf32, #tpu.memory_space<vmem>>, vector<1x1x512xf32>
    %66 = vector.shape_cast %65 : vector<1x1x512xf32> to vector<1x512xf32>
    %67 = vector.broadcast %66 : vector<1x512xf32> to vector<16x512xf32>
    %68 = arith.mulf %64, %67 : vector<16x512xf32>
    %69 = arith.truncf %68 : vector<16x512xf32> to vector<16x512xbf16>
    %c112 = arith.constant 112 : index
    %c0_46 = arith.constant 0 : index
    %70 = vector.load %arg9[%c112, %c0_46] : memref<432x512xbf16, #tpu.memory_space<vmem>>, vector<16x512xbf16>
    tpu.vector_store %arg9[%c112, %c0_46], %69 {strides = array<i32>} : memref<432x512xbf16, #tpu.memory_space<vmem>>, vector<16x512xbf16>,
    %c0_47 = arith.constant 0 : index
    %c73 = arith.constant 73 : index
    %71 = vector.load %arg8[%c0_47, %c73] : memref<16x768xf32, #tpu.memory_space<vmem>>, vector<16x512xf32>
    %c8 = arith.constant 8 : index
    %c0_48 = arith.constant 0 : index
    %c0_49 = arith.constant 0 : index
    %72 = vector.load %arg6[%c8, %c0_48, %c0_49] : memref<27x1x512xf32, #tpu.memory_space<vmem>>, vector<1x1x512xf32>
    %73 = vector.shape_cast %72 : vector<1x1x512xf32> to vector<1x512xf32>
    %74 = vector.broadcast %73 : vector<1x512xf32> to vector<16x512xf32>
    %75 = arith.mulf %71, %74 : vector<16x512xf32>
    %76 = arith.truncf %75 : vector<16x512xf32> to vector<16x512xbf16>
    %c128_50 = arith.constant 128 : index
    %c0_51 = arith.constant 0 : index
    %77 = vector.load %arg9[%c128_50, %c0_51] : memref<432x512xbf16, #tpu.memory_space<vmem>>, vector<16x512xbf16>
    tpu.vector_store %arg9[%c128_50, %c0_51], %76 {strides = array<i32>} : memref<432x512xbf16, #tpu.memory_space<vmem>>, vector<16x512xbf16>,
    %c0_52 = arith.constant 0 : index
    %c119 = arith.constant 119 : index
    %78 = vector.load %arg8[%c0_52, %c119] : memref<16x768xf32, #tpu.memory_space<vmem>>, vector<16x512xf32>
    %c9 = arith.constant 9 : index
    %c0_53 = arith.constant 0 : index
    %c0_54 = arith.constant 0 : index
    %79 = vector.load %arg6[%c9, %c0_53, %c0_54] : memref<27x1x512xf32, #tpu.memory_space<vmem>>, vector<1x1x512xf32>
    %80 = vector.shape_cast %79 : vector<1x1x512xf32> to vector<1x512xf32>
    %81 = vector.broadcast %80 : vector<1x512xf32> to vector<16x512xf32>
    %82 = arith.mulf %78, %81 : vector<16x512xf32>
    %83 = arith.truncf %82 : vector<16x512xf32> to vector<16x512xbf16>
    %c144 = arith.constant 144 : index
    %c0_55 = arith.constant 0 : index
    %84 = vector.load %arg9[%c144, %c0_55] : memref<432x512xbf16, #tpu.memory_space<vmem>>, vector<16x512xbf16>
    tpu.vector_store %arg9[%c144, %c0_55], %83 {strides = array<i32>} : memref<432x512xbf16, #tpu.memory_space<vmem>>, vector<16x512xbf16>,
    %c0_56 = arith.constant 0 : index
    %c120 = arith.constant 120 : index
    %85 = vector.load %arg8[%c0_56, %c120] : memref<16x768xf32, #tpu.memory_space<vmem>>, vector<16x512xf32>
    %c10 = arith.constant 10 : index
    %c0_57 = arith.constant 0 : index
    %c0_58 = arith.constant 0 : index
    %86 = vector.load %arg6[%c10, %c0_57, %c0_58] : memref<27x1x512xf32, #tpu.memory_space<vmem>>, vector<1x1x512xf32>
    %87 = vector.shape_cast %86 : vector<1x1x512xf32> to vector<1x512xf32>
    %88 = vector.broadcast %87 : vector<1x512xf32> to vector<16x512xf32>
    %89 = arith.mulf %85, %88 : vector<16x512xf32>
    %90 = arith.truncf %89 : vector<16x512xf32> to vector<16x512xbf16>
    %c160 = arith.constant 160 : index
    %c0_59 = arith.constant 0 : index
    %91 = vector.load %arg9[%c160, %c0_59] : memref<432x512xbf16, #tpu.memory_space<vmem>>, vector<16x512xbf16>
    tpu.vector_store %arg9[%c160, %c0_59], %90 {strides = array<i32>} : memref<432x512xbf16, #tpu.memory_space<vmem>>, vector<16x512xbf16>,
    %c0_60 = arith.constant 0 : index
    %c121 = arith.constant 121 : index
    %92 = vector.load %arg8[%c0_60, %c121] : memref<16x768xf32, #tpu.memory_space<vmem>>, vector<16x512xf32>
    %c11 = arith.constant 11 : index
    %c0_61 = arith.constant 0 : index
    %c0_62 = arith.constant 0 : index
    %93 = vector.load %arg6[%c11, %c0_61, %c0_62] : memref<27x1x512xf32, #tpu.memory_space<vmem>>, vector<1x1x512xf32>
    %94 = vector.shape_cast %93 : vector<1x1x512xf32> to vector<1x512xf32>
    %95 = vector.broadcast %94 : vector<1x512xf32> to vector<16x512xf32>
    %96 = arith.mulf %92, %95 : vector<16x512xf32>
    %97 = arith.truncf %96 : vector<16x512xf32> to vector<16x512xbf16>
    %c176 = arith.constant 176 : index
    %c0_63 = arith.constant 0 : index
    %98 = vector.load %arg9[%c176, %c0_63] : memref<432x512xbf16, #tpu.memory_space<vmem>>, vector<16x512xbf16>
    tpu.vector_store %arg9[%c176, %c0_63], %97 {strides = array<i32>} : memref<432x512xbf16, #tpu.memory_space<vmem>>, vector<16x512xbf16>,
    %c0_64 = arith.constant 0 : index
    %c127 = arith.constant 127 : index
    %99 = vector.load %arg8[%c0_64, %c127] : memref<16x768xf32, #tpu.memory_space<vmem>>, vector<16x512xf32>
    %c12 = arith.constant 12 : index
    %c0_65 = arith.constant 0 : index
    %c0_66 = arith.constant 0 : index
    %100 = vector.load %arg6[%c12, %c0_65, %c0_66] : memref<27x1x512xf32, #tpu.memory_space<vmem>>, vector<1x1x512xf32>
    %101 = vector.shape_cast %100 : vector<1x1x512xf32> to vector<1x512xf32>
    %102 = vector.broadcast %101 : vector<1x512xf32> to vector<16x512xf32>
    %103 = arith.mulf %99, %102 : vector<16x512xf32>
    %104 = arith.truncf %103 : vector<16x512xf32> to vector<16x512xbf16>
    %c192 = arith.constant 192 : index
    %c0_67 = arith.constant 0 : index
    %105 = vector.load %arg9[%c192, %c0_67] : memref<432x512xbf16, #tpu.memory_space<vmem>>, vector<16x512xbf16>
    tpu.vector_store %arg9[%c192, %c0_67], %104 {strides = array<i32>} : memref<432x512xbf16, #tpu.memory_space<vmem>>, vector<16x512xbf16>,
    %c0_68 = arith.constant 0 : index
    %c128_69 = arith.constant 128 : index
    %106 = vector.load %arg8[%c0_68, %c128_69] : memref<16x768xf32, #tpu.memory_space<vmem>>, vector<16x512xf32>
    %c13 = arith.constant 13 : index
    %c0_70 = arith.constant 0 : index
    %c0_71 = arith.constant 0 : index
    %107 = vector.load %arg6[%c13, %c0_70, %c0_71] : memref<27x1x512xf32, #tpu.memory_space<vmem>>, vector<1x1x512xf32>
    %108 = vector.shape_cast %107 : vector<1x1x512xf32> to vector<1x512xf32>
    %109 = vector.broadcast %108 : vector<1x512xf32> to vector<16x512xf32>
    %110 = arith.mulf %106, %109 : vector<16x512xf32>
    %111 = arith.truncf %110 : vector<16x512xf32> to vector<16x512xbf16>
    %c208 = arith.constant 208 : index
    %c0_72 = arith.constant 0 : index
    %112 = vector.load %arg9[%c208, %c0_72] : memref<432x512xbf16, #tpu.memory_space<vmem>>, vector<16x512xbf16>
    tpu.vector_store %arg9[%c208, %c0_72], %111 {strides = array<i32>} : memref<432x512xbf16, #tpu.memory_space<vmem>>, vector<16x512xbf16>,
    %c0_73 = arith.constant 0 : index
    %c129 = arith.constant 129 : index
    %113 = vector.load %arg8[%c0_73, %c129] : memref<16x768xf32, #tpu.memory_space<vmem>>, vector<16x512xf32>
    %c14 = arith.constant 14 : index
    %c0_74 = arith.constant 0 : index
    %c0_75 = arith.constant 0 : index
    %114 = vector.load %arg6[%c14, %c0_74, %c0_75] : memref<27x1x512xf32, #tpu.memory_space<vmem>>, vector<1x1x512xf32>
    %115 = vector.shape_cast %114 : vector<1x1x512xf32> to vector<1x512xf32>
    %116 = vector.broadcast %115 : vector<1x512xf32> to vector<16x512xf32>
    %117 = arith.mulf %113, %116 : vector<16x512xf32>
    %118 = arith.truncf %117 : vector<16x512xf32> to vector<16x512xbf16>
    %c224 = arith.constant 224 : index
    %c0_76 = arith.constant 0 : index
    %119 = vector.load %arg9[%c224, %c0_76] : memref<432x512xbf16, #tpu.memory_space<vmem>>, vector<16x512xbf16>
    tpu.vector_store %arg9[%c224, %c0_76], %118 {strides = array<i32>} : memref<432x512xbf16, #tpu.memory_space<vmem>>, vector<16x512xbf16>,
    %c0_77 = arith.constant 0 : index
    %c135 = arith.constant 135 : index
    %120 = vector.load %arg8[%c0_77, %c135] : memref<16x768xf32, #tpu.memory_space<vmem>>, vector<16x512xf32>
    %c15 = arith.constant 15 : index
    %c0_78 = arith.constant 0 : index
    %c0_79 = arith.constant 0 : index
    %121 = vector.load %arg6[%c15, %c0_78, %c0_79] : memref<27x1x512xf32, #tpu.memory_space<vmem>>, vector<1x1x512xf32>
    %122 = vector.shape_cast %121 : vector<1x1x512xf32> to vector<1x512xf32>
    %123 = vector.broadcast %122 : vector<1x512xf32> to vector<16x512xf32>
    %124 = arith.mulf %120, %123 : vector<16x512xf32>
    %125 = arith.truncf %124 : vector<16x512xf32> to vector<16x512xbf16>
    %c240 = arith.constant 240 : index
    %c0_80 = arith.constant 0 : index
    %126 = vector.load %arg9[%c240, %c0_80] : memref<432x512xbf16, #tpu.memory_space<vmem>>, vector<16x512xbf16>
    tpu.vector_store %arg9[%c240, %c0_80], %125 {strides = array<i32>} : memref<432x512xbf16, #tpu.memory_space<vmem>>, vector<16x512xbf16>,
    %c0_81 = arith.constant 0 : index
    %c136 = arith.constant 136 : index
    %127 = vector.load %arg8[%c0_81, %c136] : memref<16x768xf32, #tpu.memory_space<vmem>>, vector<16x512xf32>
    %c16_82 = arith.constant 16 : index
    %c0_83 = arith.constant 0 : index
    %c0_84 = arith.constant 0 : index
    %128 = vector.load %arg6[%c16_82, %c0_83, %c0_84] : memref<27x1x512xf32, #tpu.memory_space<vmem>>, vector<1x1x512xf32>
    %129 = vector.shape_cast %128 : vector<1x1x512xf32> to vector<1x512xf32>
    %130 = vector.broadcast %129 : vector<1x512xf32> to vector<16x512xf32>
    %131 = arith.mulf %127, %130 : vector<16x512xf32>
    %132 = arith.truncf %131 : vector<16x512xf32> to vector<16x512xbf16>
    %c256 = arith.constant 256 : index
    %c0_85 = arith.constant 0 : index
    %133 = vector.load %arg9[%c256, %c0_85] : memref<432x512xbf16, #tpu.memory_space<vmem>>, vector<16x512xbf16>
    tpu.vector_store %arg9[%c256, %c0_85], %132 {strides = array<i32>} : memref<432x512xbf16, #tpu.memory_space<vmem>>, vector<16x512xbf16>,
    %c0_86 = arith.constant 0 : index
    %c137 = arith.constant 137 : index
    %134 = vector.load %arg8[%c0_86, %c137] : memref<16x768xf32, #tpu.memory_space<vmem>>, vector<16x512xf32>
    %c17 = arith.constant 17 : index
    %c0_87 = arith.constant 0 : index
    %c0_88 = arith.constant 0 : index
    %135 = vector.load %arg6[%c17, %c0_87, %c0_88] : memref<27x1x512xf32, #tpu.memory_space<vmem>>, vector<1x1x512xf32>
    %136 = vector.shape_cast %135 : vector<1x1x512xf32> to vector<1x512xf32>
    %137 = vector.broadcast %136 : vector<1x512xf32> to vector<16x512xf32>
    %138 = arith.mulf %134, %137 : vector<16x512xf32>
    %139 = arith.truncf %138 : vector<16x512xf32> to vector<16x512xbf16>
    %c272 = arith.constant 272 : index
    %c0_89 = arith.constant 0 : index
    %140 = vector.load %arg9[%c272, %c0_89] : memref<432x512xbf16, #tpu.memory_space<vmem>>, vector<16x512xbf16>
    tpu.vector_store %arg9[%c272, %c0_89], %139 {strides = array<i32>} : memref<432x512xbf16, #tpu.memory_space<vmem>>, vector<16x512xbf16>,
    %c0_90 = arith.constant 0 : index
    %c183 = arith.constant 183 : index
    %141 = vector.load %arg8[%c0_90, %c183] : memref<16x768xf32, #tpu.memory_space<vmem>>, vector<16x512xf32>
    %c18 = arith.constant 18 : index
    %c0_91 = arith.constant 0 : index
    %c0_92 = arith.constant 0 : index
    %142 = vector.load %arg6[%c18, %c0_91, %c0_92] : memref<27x1x512xf32, #tpu.memory_space<vmem>>, vector<1x1x512xf32>
    %143 = vector.shape_cast %142 : vector<1x1x512xf32> to vector<1x512xf32>
    %144 = vector.broadcast %143 : vector<1x512xf32> to vector<16x512xf32>
    %145 = arith.mulf %141, %144 : vector<16x512xf32>
    %146 = arith.truncf %145 : vector<16x512xf32> to vector<16x512xbf16>
    %c288 = arith.constant 288 : index
    %c0_93 = arith.constant 0 : index
    %147 = vector.load %arg9[%c288, %c0_93] : memref<432x512xbf16, #tpu.memory_space<vmem>>, vector<16x512xbf16>
    tpu.vector_store %arg9[%c288, %c0_93], %146 {strides = array<i32>} : memref<432x512xbf16, #tpu.memory_space<vmem>>, vector<16x512xbf16>,
    %c0_94 = arith.constant 0 : index
    %c184 = arith.constant 184 : index
    %148 = vector.load %arg8[%c0_94, %c184] : memref<16x768xf32, #tpu.memory_space<vmem>>, vector<16x512xf32>
    %c19 = arith.constant 19 : index
    %c0_95 = arith.constant 0 : index
    %c0_96 = arith.constant 0 : index
    %149 = vector.load %arg6[%c19, %c0_95, %c0_96] : memref<27x1x512xf32, #tpu.memory_space<vmem>>, vector<1x1x512xf32>
    %150 = vector.shape_cast %149 : vector<1x1x512xf32> to vector<1x512xf32>
    %151 = vector.broadcast %150 : vector<1x512xf32> to vector<16x512xf32>
    %152 = arith.mulf %148, %151 : vector<16x512xf32>
    %153 = arith.truncf %152 : vector<16x512xf32> to vector<16x512xbf16>
    %c304 = arith.constant 304 : index
    %c0_97 = arith.constant 0 : index
    %154 = vector.load %arg9[%c304, %c0_97] : memref<432x512xbf16, #tpu.memory_space<vmem>>, vector<16x512xbf16>
    tpu.vector_store %arg9[%c304, %c0_97], %153 {strides = array<i32>} : memref<432x512xbf16, #tpu.memory_space<vmem>>, vector<16x512xbf16>,
    %c0_98 = arith.constant 0 : index
    %c185 = arith.constant 185 : index
    %155 = vector.load %arg8[%c0_98, %c185] : memref<16x768xf32, #tpu.memory_space<vmem>>, vector<16x512xf32>
    %c20 = arith.constant 20 : index
    %c0_99 = arith.constant 0 : index
    %c0_100 = arith.constant 0 : index
    %156 = vector.load %arg6[%c20, %c0_99, %c0_100] : memref<27x1x512xf32, #tpu.memory_space<vmem>>, vector<1x1x512xf32>
    %157 = vector.shape_cast %156 : vector<1x1x512xf32> to vector<1x512xf32>
    %158 = vector.broadcast %157 : vector<1x512xf32> to vector<16x512xf32>
    %159 = arith.mulf %155, %158 : vector<16x512xf32>
    %160 = arith.truncf %159 : vector<16x512xf32> to vector<16x512xbf16>
    %c320 = arith.constant 320 : index
    %c0_101 = arith.constant 0 : index
    %161 = vector.load %arg9[%c320, %c0_101] : memref<432x512xbf16, #tpu.memory_space<vmem>>, vector<16x512xbf16>
    tpu.vector_store %arg9[%c320, %c0_101], %160 {strides = array<i32>} : memref<432x512xbf16, #tpu.memory_space<vmem>>, vector<16x512xbf16>,
    %c0_102 = arith.constant 0 : index
    %c191 = arith.constant 191 : index
    %162 = vector.load %arg8[%c0_102, %c191] : memref<16x768xf32, #tpu.memory_space<vmem>>, vector<16x512xf32>
    %c21 = arith.constant 21 : index
    %c0_103 = arith.constant 0 : index
    %c0_104 = arith.constant 0 : index
    %163 = vector.load %arg6[%c21, %c0_103, %c0_104] : memref<27x1x512xf32, #tpu.memory_space<vmem>>, vector<1x1x512xf32>
    %164 = vector.shape_cast %163 : vector<1x1x512xf32> to vector<1x512xf32>
    %165 = vector.broadcast %164 : vector<1x512xf32> to vector<16x512xf32>
    %166 = arith.mulf %162, %165 : vector<16x512xf32>
    %167 = arith.truncf %166 : vector<16x512xf32> to vector<16x512xbf16>
    %c336 = arith.constant 336 : index
    %c0_105 = arith.constant 0 : index
    %168 = vector.load %arg9[%c336, %c0_105] : memref<432x512xbf16, #tpu.memory_space<vmem>>, vector<16x512xbf16>
    tpu.vector_store %arg9[%c336, %c0_105], %167 {strides = array<i32>} : memref<432x512xbf16, #tpu.memory_space<vmem>>, vector<16x512xbf16>,
    %c0_106 = arith.constant 0 : index
    %c192_107 = arith.constant 192 : index
    %169 = vector.load %arg8[%c0_106, %c192_107] : memref<16x768xf32, #tpu.memory_space<vmem>>, vector<16x512xf32>
    %c22 = arith.constant 22 : index
    %c0_108 = arith.constant 0 : index
    %c0_109 = arith.constant 0 : index
    %170 = vector.load %arg6[%c22, %c0_108, %c0_109] : memref<27x1x512xf32, #tpu.memory_space<vmem>>, vector<1x1x512xf32>
    %171 = vector.shape_cast %170 : vector<1x1x512xf32> to vector<1x512xf32>
    %172 = vector.broadcast %171 : vector<1x512xf32> to vector<16x512xf32>
    %173 = arith.mulf %169, %172 : vector<16x512xf32>
    %174 = arith.truncf %173 : vector<16x512xf32> to vector<16x512xbf16>
    %c352 = arith.constant 352 : index
    %c0_110 = arith.constant 0 : index
    %175 = vector.load %arg9[%c352, %c0_110] : memref<432x512xbf16, #tpu.memory_space<vmem>>, vector<16x512xbf16>
    tpu.vector_store %arg9[%c352, %c0_110], %174 {strides = array<i32>} : memref<432x512xbf16, #tpu.memory_space<vmem>>, vector<16x512xbf16>,
    %c0_111 = arith.constant 0 : index
    %c193 = arith.constant 193 : index
    %176 = vector.load %arg8[%c0_111, %c193] : memref<16x768xf32, #tpu.memory_space<vmem>>, vector<16x512xf32>
    %c23 = arith.constant 23 : index
    %c0_112 = arith.constant 0 : index
    %c0_113 = arith.constant 0 : index
    %177 = vector.load %arg6[%c23, %c0_112, %c0_113] : memref<27x1x512xf32, #tpu.memory_space<vmem>>, vector<1x1x512xf32>
    %178 = vector.shape_cast %177 : vector<1x1x512xf32> to vector<1x512xf32>
    %179 = vector.broadcast %178 : vector<1x512xf32> to vector<16x512xf32>
    %180 = arith.mulf %176, %179 : vector<16x512xf32>
    %181 = arith.truncf %180 : vector<16x512xf32> to vector<16x512xbf16>
    %c368 = arith.constant 368 : index
    %c0_114 = arith.constant 0 : index
    %182 = vector.load %arg9[%c368, %c0_114] : memref<432x512xbf16, #tpu.memory_space<vmem>>, vector<16x512xbf16>
    tpu.vector_store %arg9[%c368, %c0_114], %181 {strides = array<i32>} : memref<432x512xbf16, #tpu.memory_space<vmem>>, vector<16x512xbf16>,
    %c0_115 = arith.constant 0 : index
    %c199 = arith.constant 199 : index
    %183 = vector.load %arg8[%c0_115, %c199] : memref<16x768xf32, #tpu.memory_space<vmem>>, vector<16x512xf32>
    %c24 = arith.constant 24 : index
    %c0_116 = arith.constant 0 : index
    %c0_117 = arith.constant 0 : index
    %184 = vector.load %arg6[%c24, %c0_116, %c0_117] : memref<27x1x512xf32, #tpu.memory_space<vmem>>, vector<1x1x512xf32>
    %185 = vector.shape_cast %184 : vector<1x1x512xf32> to vector<1x512xf32>
    %186 = vector.broadcast %185 : vector<1x512xf32> to vector<16x512xf32>
    %187 = arith.mulf %183, %186 : vector<16x512xf32>
    %188 = arith.truncf %187 : vector<16x512xf32> to vector<16x512xbf16>
    %c384 = arith.constant 384 : index
    %c0_118 = arith.constant 0 : index
    %189 = vector.load %arg9[%c384, %c0_118] : memref<432x512xbf16, #tpu.memory_space<vmem>>, vector<16x512xbf16>
    tpu.vector_store %arg9[%c384, %c0_118], %188 {strides = array<i32>} : memref<432x512xbf16, #tpu.memory_space<vmem>>, vector<16x512xbf16>,
    %c0_119 = arith.constant 0 : index
    %c200 = arith.constant 200 : index
    %190 = vector.load %arg8[%c0_119, %c200] : memref<16x768xf32, #tpu.memory_space<vmem>>, vector<16x512xf32>
    %c25 = arith.constant 25 : index
    %c0_120 = arith.constant 0 : index
    %c0_121 = arith.constant 0 : index
    %191 = vector.load %arg6[%c25, %c0_120, %c0_121] : memref<27x1x512xf32, #tpu.memory_space<vmem>>, vector<1x1x512xf32>
    %192 = vector.shape_cast %191 : vector<1x1x512xf32> to vector<1x512xf32>
    %193 = vector.broadcast %192 : vector<1x512xf32> to vector<16x512xf32>
    %194 = arith.mulf %190, %193 : vector<16x512xf32>
    %195 = arith.truncf %194 : vector<16x512xf32> to vector<16x512xbf16>
    %c400 = arith.constant 400 : index
    %c0_122 = arith.constant 0 : index
    %196 = vector.load %arg9[%c400, %c0_122] : memref<432x512xbf16, #tpu.memory_space<vmem>>, vector<16x512xbf16>
    tpu.vector_store %arg9[%c400, %c0_122], %195 {strides = array<i32>} : memref<432x512xbf16, #tpu.memory_space<vmem>>, vector<16x512xbf16>,
    %c0_123 = arith.constant 0 : index
    %c201 = arith.constant 201 : index
    %197 = vector.load %arg8[%c0_123, %c201] : memref<16x768xf32, #tpu.memory_space<vmem>>, vector<16x512xf32>
    %c26 = arith.constant 26 : index
    %c0_124 = arith.constant 0 : index
    %c0_125 = arith.constant 0 : index
    %198 = vector.load %arg6[%c26, %c0_124, %c0_125] : memref<27x1x512xf32, #tpu.memory_space<vmem>>, vector<1x1x512xf32>
    %199 = vector.shape_cast %198 : vector<1x1x512xf32> to vector<1x512xf32>
    %200 = vector.broadcast %199 : vector<1x512xf32> to vector<16x512xf32>
    %201 = arith.mulf %197, %200 : vector<16x512xf32>
    %202 = arith.truncf %201 : vector<16x512xf32> to vector<16x512xbf16>
    %c416 = arith.constant 416 : index
    %c0_126 = arith.constant 0 : index
    %203 = vector.load %arg9[%c416, %c0_126] : memref<432x512xbf16, #tpu.memory_space<vmem>>, vector<16x512xbf16>
    tpu.vector_store %arg9[%c416, %c0_126], %202 {strides = array<i32>} : memref<432x512xbf16, #tpu.memory_space<vmem>>, vector<16x512xbf16>,
    %c0_127 = arith.constant 0 : index
    %c0_128 = arith.constant 0 : index
    %204 = vector.load %arg4[%c0_127, %c0_128] : memref<8x432xbf16, #tpu.memory_space<vmem>>, vector<8x432xbf16>
    %c0_129 = arith.constant 0 : index
    %c0_130 = arith.constant 0 : index
    %205 = vector.load %arg9[%c0_129, %c0_130] : memref<432x512xbf16, #tpu.memory_space<vmem>>, vector<432x512xbf16>
    %cst_131 = arith.constant dense<0.000000e+00> : vector<8x512xf32>
    %206 = tpu.matmul %204, %205, %cst_131 {dimension_numbers = #tpu.dot_dimension_numbers<[1], [0], [0], [1], [0, 0, 1, 1], [], []>} : vector<8x432xbf16>, vector<432x512xbf16>, vector<8x512xf32> -> vector<8x512xf32>
    %c0_132 = arith.constant 0 : index
    %c0_133 = arith.constant 0 : index
    %207 = vector.load %arg5[%c0_132, %c0_133] : memref<8x1xf32, #tpu.memory_space<vmem>>, vector<8x1xf32>
    %208 = vector.broadcast %207 : vector<8x1xf32> to vector<8x512xf32>
    %209 = arith.addf %206, %208 : vector<8x512xf32>
    %c0_134 = arith.constant 0 : index
    %c0_135 = arith.constant 0 : index
    %c0_136 = arith.constant 0 : index
    %210 = vector.load %arg7[%c0_134, %c0_135, %c0_136] : memref<1x8x512xf32, #tpu.memory_space<vmem>>, vector<1x8x512xf32>
    %211 = vector.shape_cast %210 : vector<1x8x512xf32> to vector<8x512xf32>
    %212 = vector.shape_cast %209 : vector<8x512xf32> to vector<1x8x512xf32>
    tpu.vector_store %arg7[%c0_134, %c0_135, %c0_136], %212 {strides = array<i32>} : memref<1x8x512xf32, #tpu.memory_space<vmem>>, vector<1x8x512xf32>,
    return
  }
  func.func @transform_0(%arg0: i32) -> (i32, i32, i32) {
    %c0_i32 = arith.constant 0 : i32
    %c0_i32_0 = arith.constant 0 : i32
    %c0_i32_1 = arith.constant 0 : i32
    return %arg0, %c0_i32, %c0_i32_0 : i32, i32, i32
  }
  func.func @transform_1(%arg0: i32) -> (i32, i32) {
    %c0_i32 = arith.constant 0 : i32
    %c0_i32_0 = arith.constant 0 : i32
    %c0_i32_1 = arith.constant 0 : i32
    return %c0_i32, %c0_i32_0 : i32, i32
  }
  func.func @transform_2(%arg0: i32) -> (i32, i32) {
    %c0_i32 = arith.constant 0 : i32
    %c0_i32_0 = arith.constant 0 : i32
    %c0_i32_1 = arith.constant 0 : i32
    return %c0_i32, %c0_i32_0 : i32, i32
  }
  func.func @transform_3(%arg0: i32) -> (i32, i32) {
    %c0_i32 = arith.constant 0 : i32
    %c0_i32_0 = arith.constant 0 : i32
    %c0_i32_1 = arith.constant 0 : i32
    return %c0_i32, %c0_i32_0 : i32, i32
  }
  func.func @transform_4(%arg0: i32) -> (i32, i32) {
    %c0_i32 = arith.constant 0 : i32
    %c0_i32_0 = arith.constant 0 : i32
    %c0_i32_1 = arith.constant 0 : i32
    return %c0_i32, %c0_i32_0 : i32, i32
  }
  func.func @transform_5(%arg0: i32) -> (i32, i32, i32) {
    %c0_i32 = arith.constant 0 : i32
    %c0_i32_0 = arith.constant 0 : i32
    %c0_i32_1 = arith.constant 0 : i32
    %c0_i32_2 = arith.constant 0 : i32
    return %c0_i32, %c0_i32_0, %c0_i32_1 : i32, i32, i32
  }
  func.func @transform_6(%arg0: i32) -> (i32, i32, i32) {
    %c0_i32 = arith.constant 0 : i32
    %c0_i32_0 = arith.constant 0 : i32
    %c0_i32_1 = arith.constant 0 : i32
    return %arg0, %c0_i32, %c0_i32_0 : i32, i32, i32
  }
}

</mosaic_0001>

<bundles_post_ra>
// kernel: dense_block_forward.2
= control target key start
LH: loop header
LB: loop body
LE: loop exit
PB: predicated region body
PF: predicated region fallthrough
CT: control target
= control target key end

     0   :  { %s3296_s21 = smov 0   ;;  %s4467_s0 = inlined_call_operand.vmem [shape: f32[2,8,512], index: 0, kind: input, shape index: {}]   ;;  %s4468_s1 = inlined_call_operand.vmem [shape: f32[8,1], index: 1, kind: input, shape index: {}]   ;;  %s4469_s2 = inlined_call_operand.vmem [shape: f32[8,1], index: 2, kind: input, shape index: {}]   ;;  %s4470_s3 = inlined_call_operand.vmem [shape: bf16[8,216], index: 3, kind: input, shape index: {}]   ;;  %s4471_s4 = inlined_call_operand.vmem [shape: f32[8,1], index: 4, kind: input, shape index: {}]   ;;  %s4472_s5 = inlined_call_operand.vmem [shape: f32[27,1,512], index: 5, kind: input, shape index: {}]   ;;  %s4473_s6 = inlined_call_operand.vmem [shape: f32[2,8,512], index: 6, kind: output, shape index: {}]  }
   0x1 LB: > { %s2945_s22 = sadd.s32 4294967295, %s3241_s21   ;;  %p2949_p0 = scmp.ge.s32.totalorder %s3241_s21, 1  ;;  %s3241_s21 = sphi %s3296_s21, %s16_s21  }
   0x2   : > { %p212_p1 = scmp.lt.s32.totalorder %s3241_s21, 3 }
   0x4   : > { %p213_p2 = pnand %p2949_p0, %p212_p1 }
   0x5   : > { %v259_v0 = vld [vmem:[%s4468_s1] sm:$0xff] (!%p213_p2)  ;;  %v294_v1 = vlaneseq (!%p213_p2)  ;;  %v3243_v2 = vmov (!%p213_p2), 0   ;;  %s3244_s7 = smov (!%p213_p2), 55   ;;  %s3245_s8 = smov (!%p213_p2), 56   ;;  %v2961_v17 = vld [vmem:[%s4472_s5 + $0x8] sm:$0xf] (!%p213_p2) }
   0x6   : > { %216 = sbr.rel (%p213_p2) target bundleno = 725 (0x2d5), region = 44  ;;  %3232 = vset.pattern.permute.xlu0 (!%p213_p2), %v3243_v2  ;;  %v269_v4 = vld [vmem:[%s4469_s2] sm:$0xff] (!%p213_p2)  ;;  %s3246_s11 = smov (!%p213_p2), 57   ;;  %v2965_v22 = vld [vmem:[%s4472_s5 + $0xc] sm:$0xf] (!%p213_p2)  ;;  %vm318_vm0 = vcmask (!%p213_p2), 449536  }
   0x7   : > { %262 = vperm.xlu0 (!%p213_p2), %3232, %v259_v0   ;;  %v295_v3 = vshrl.u32 (!%p213_p2), %v294_v1, 7  ;;  %v292_v5 = vld [vmem:[%s4472_s5] sm:$0xf] (!%p213_p2)  ;;  %v2957_v11 = vld [vmem:[%s4472_s5 + $0x4] sm:$0xf] (!%p213_p2)  ;;  %s3247_s14 = smov (!%p213_p2), 63  }
   0x8   : > { %v2969_v27 = vld [vmem:[%s4472_s5 + $0x10] sm:$0xf] (!%p213_p2)  ;;  %s3248_s17 = smov (!%p213_p2), 64   ;;  %v2973_v32 = vld [vmem:[%s4472_s5 + $0x14] sm:$0xf] (!%p213_p2)  ;;  %s3249_s20 = smov (!%p213_p2), 65  }
   0x9   : > { %v3313_v6 = vsub.s32 (!%p213_p2), 0, %v295_v3  ;;  %v3315_v7 = vsub.s32 (!%p213_p2), 2, %v295_v3  ;;  %v3317_v8 = vsub.s32 (!%p213_p2), 1, %v295_v3  ;;  %v3326_v13 = vsub.s32 (!%p213_p2), 3, %v295_v3  ;;  %v2977_v37 = vld [vmem:[%s4472_s5 + $0x18] sm:$0xf] (!%p213_p2) }
   0xa   : > { %s3250_s25 = smov (!%p213_p2), 71   ;;  %v2981_v42 = vld [vmem:[%s4472_s5 + $0x1c] sm:$0xf] (!%p213_p2)  ;;  %s3251_s28 = smov (!%p213_p2), 72   ;;  %v2985_v47 = vld [vmem:[%s4472_s5 + $0x20] sm:$0xf] (!%p213_p2) }
   0xb   : > { %272 = vperm.xlu0 (!%p213_p2), %3232, %v269_v4   ;;  %v297_v9 = vrot.slane (!%p213_p2), %v292_v5, %v3313_v6  ;;  %v305_v10 = vrot.slane (!%p213_p2), %v292_v5, %v3315_v7  ;;  %v301_v12 = vrot.slane (!%p213_p2), %v292_v5, %v3317_v8  ;;  %v380_v14 = vrot.slane (!%p213_p2), %v2957_v11, %v3313_v6  ;;  %s3252_s9 = smov (!%p213_p2), 73   ;;  %v2989_v52 = vld [vmem:[%s4472_s5 + $0x24] sm:$0xf] (!%p213_p2)  ;;  %s4474_s13 = smov (!%p213_p2), 119   ;;  %v2993_v57 = vld [vmem:[%s4472_s5 + $0x28] sm:$0xf] (!%p213_p2) }
   0xc   : > { %v309_v15 = vrot.slane (!%p213_p2), %v292_v5, %v3326_v13  ;;  %v388_v16 = vrot.slane (!%p213_p2), %v2957_v11, %v3315_v7  ;;  %v384_v18 = vrot.slane (!%p213_p2), %v2957_v11, %v3317_v8  ;;  %v462_v19 = vrot.slane (!%p213_p2), %v2961_v17, %v3313_v6  ;;  %s3254_s18 = smov (!%p213_p2), 120   ;;  %v2997_v62 = vld [vmem:[%s4472_s5 + $0x2c] sm:$0xf] (!%p213_p2)  ;;  %s3255_s24 = smov (!%p213_p2), 121   ;;  %v3001_v3 = vld [vmem:[%s4472_s5 + $0x30] sm:$0xf] (!%p213_p2) }
   0xd   : > { %310 = vrot.lane.b32.xlu1 %v297_v9, %s3244_s7  ;;  %v392_v20 = vrot.slane %v2957_v11, %v3326_v13  ;;  %v470_v21 = vrot.slane %v2961_v17, %v3315_v7  ;;  %v466_v23 = vrot.slane %v2961_v17, %v3317_v8  ;;  %v544_v24 = vrot.slane %v2965_v22, %v3313_v6  ;;  %s3256_s29 = smov 127   ;;  %v3008_v11 = vld [vmem:[%s4472_s5 + $0x38] sm:$0xf]  ;;  %s3257_s12 = smov 1  }
   0xe   : > { %v474_v25 = vrot.slane %v2961_v17, %v3326_v13  ;;  %v552_v26 = vrot.slane %v2965_v22, %v3315_v7  ;;  %v548_v28 = vrot.slane %v2965_v22, %v3317_v8  ;;  %v626_v29 = vrot.slane %v2969_v27, %v3313_v6  ;;  %v3012_v17 = vld [vmem:[%s4472_s5 + $0x3c] sm:$0xf]  ;;  %s3258_s19 = smov 7   ;;  %s3259_s27 = smov 8  }
   0xf   : > { %314 = vrot.lane.b32.xlu0 %v305_v10, %s3244_s7  ;;  %v556_v30 = vrot.slane %v2965_v22, %v3326_v13  ;;  %v634_v31 = vrot.slane %v2969_v27, %v3315_v7  ;;  %v630_v33 = vrot.slane %v2969_v27, %v3317_v8  ;;  %v708_v34 = vrot.slane %v2973_v32, %v3313_v6  ;;  %v3016_v22 = vld [vmem:[%s4472_s5 + $0x40] sm:$0xf]  ;;  %s3260_s15 = smov 9   ;;  %p242_p3 = scmp.lt.s32.totalorder %s2945_s22, 1 }
  0x10   : > { %v638_v35 = vrot.slane %v2969_v27, %v3326_v13  ;;  %v716_v36 = vrot.slane %v2973_v32, %v3315_v7  ;;  %v712_v38 = vrot.slane %v2973_v32, %v3317_v8  ;;  %v790_v39 = vrot.slane %v2977_v37, %v3313_v6 }
  0x11   : > { %312 = vrot.lane.b32.xlu1 %v301_v12, %s3244_s7  ;;  %v720_v40 = vrot.slane %v2973_v32, %v3326_v13  ;;  %v798_v41 = vrot.slane %v2977_v37, %v3315_v7  ;;  %v794_v43 = vrot.slane %v2977_v37, %v3317_v8  ;;  %v872_v44 = vrot.slane %v2981_v42, %v3313_v6  ;;  %s4487_s22 = smov (!%p242_p3, %s2945_s22), 1 }
  0x12   : > { %v802_v45 = vrot.slane %v2977_v37, %v3326_v13  ;;  %v880_v46 = vrot.slane %v2981_v42, %v3315_v7  ;;  %v876_v48 = vrot.slane %v2981_v42, %v3317_v8  ;;  %v954_v49 = vrot.slane %v2985_v47, %v3313_v6  ;;  %s3124_s10 = sshll.u32 %s4487_s22, 5 }
  0x13   : > { %393 = vrot.lane.b32.xlu0 %v380_v14, %s3245_s8  ;;  %v884_v50 = vrot.slane %v2981_v42, %v3326_v13  ;;  %v962_v51 = vrot.slane %v2985_v47, %v3315_v7  ;;  %v958_v53 = vrot.slane %v2985_v47, %v3317_v8  ;;  %v1036_v54 = vrot.slane %v2989_v52, %v3313_v6 }
  0x14   : > { %v966_v55 = vrot.slane %v2985_v47, %v3326_v13  ;;  %v1044_v56 = vrot.slane %v2989_v52, %v3315_v7  ;;  %v1040_v58 = vrot.slane %v2989_v52, %v3317_v8  ;;  %v1118_v59 = vrot.slane %v2993_v57, %v3313_v6  ;;  %v3028_v47 = vld [vmem:[%s4472_s5 + $0x4c] sm:$0xf] }
  0x15   : > { %316 = vrot.lane.b32.xlu1 %v309_v15, %s3244_s7  ;;  %v1048_v60 = vrot.slane %v2989_v52, %v3326_v13  ;;  %v1126_v61 = vrot.slane %v2993_v57, %v3315_v7  ;;  %v1122_v63 = vrot.slane %v2993_v57, %v3317_v8  ;;  %v1200_v0 = vrot.slane %v2997_v62, %v3313_v6 }
  0x16   : > { %v1130_v1 = vrot.slane %v2993_v57, %v3326_v13  ;;  %v1208_v2 = vrot.slane %v2997_v62, %v3315_v7  ;;  %v1204_v4 = vrot.slane %v2997_v62, %v3317_v8  ;;  %v1282_v5 = vrot.slane %v3001_v3, %v3313_v6 }
  0x17   : > { %397 = vrot.lane.b32.xlu0 %v388_v16, %s3245_s8  ;;  %v1212_v9 = vrot.slane %v2997_v62, %v3326_v13  ;;  %v1290_v10 = vrot.slane %v3001_v3, %v3315_v7  ;;  %v1286_v12 = vrot.slane %v3001_v3, %v3317_v8  ;;  %v1413_v14 = vrot.slane %v3008_v11, %v3313_v6 }
  0x18   : > { %v1294_v15 = vrot.slane %v3001_v3, %v3326_v13  ;;  %v1421_v16 = vrot.slane %v3008_v11, %v3315_v7  ;;  %v1825_v57 = vrot.slane %v3028_v47, %v3317_v8  ;;  %vm401_vm1 = vcmask 457728  }
  0x19   : > { %395 = vrot.lane.b32.xlu1 %v384_v18, %s3245_s8  ;;  %v1417_v18 = vrot.slane %v3008_v11, %v3317_v8  ;;  %vm483_vm2 = vcmask 465920   ;;  %vm565_vm3 = vcmask 515072   ;;  %vm647_vm4 = vcmask 523264  }
  0x1a   : > { %vm4478_vm5 = vcmask 531456   ;;  %vm525_vm6 = vcmask 580608   ;;  %vm443_vm7 = vcmask 588800   ;;  %vm361_vm8 = vcmask 596992  }
  0x1b   : > { %475 = vrot.lane.b32.xlu0 %v462_v19, %s3246_s11  ;;  %v1495_v19 = vrot.slane %v3012_v17, %v3313_v6  ;;  %vm4476_vm9 = vcmask 973824   ;;  %vm4477_vm10 = vcmask 982016   ;;  %vm1221_vm11 = vcmask 990208  }
  0x1c   : > { %vm1303_vm12 = vcmask 1039360   ;;  %vm1345_vm13 = vcmask 7168   ;;  %vm1263_vm14 = vcmask 56320   ;;  %vm1181_vm15 = vcmask 64512  }
  0x1d   : > { %399 = vrot.lane.b32.xlu1 %v392_v20, %s3245_s8  ;;  %v1425_v20 = vrot.slane %v3008_v11, %v3326_v13 }
  0x1f   : > { %479 = vrot.lane.b32.xlu0 %v470_v21, %s3246_s11  ;;  %v1503_v21 = vrot.slane %v3012_v17, %v3315_v7 }
  0x21   : > { %477 = vrot.lane.b32.xlu1 %v466_v23, %s3246_s11  ;;  %v1499_v23 = vrot.slane %v3012_v17, %v3317_v8 }
  0x23   : > { %557 = vrot.lane.b32.xlu0 %v544_v24, %s3247_s14 }
  0x25   : > { %481 = vrot.lane.b32.xlu1 %v474_v25, %s3246_s11  ;;  %v1577_v25 = vrot.slane %v3016_v22, %v3313_v6 }
  0x27   : > { %561 = vrot.lane.b32.xlu0 %v552_v26, %s3247_s14  ;;  %v1507_v26 = vrot.slane %v3012_v17, %v3326_v13 }
  0x29   : > { %559 = vrot.lane.b32.xlu1 %v548_v28, %s3247_s14  ;;  %v1585_v28 = vrot.slane %v3016_v22, %v3315_v7 }
  0x2b   : > { %639 = vrot.lane.b32.xlu0 %v626_v29, %s3248_s17  ;;  %v3020_v29 = vld [vmem:[%s4472_s5 + $0x44] sm:$0xf] }
  0x2c   : > { %v1667_v37 = vrot.slane %v3020_v29, %v3315_v7 }
  0x2d   : > { %563 = vrot.lane.b32.xlu1 %v556_v30, %s3247_s14  ;;  %v1581_v30 = vrot.slane %v3016_v22, %v3317_v8 }
  0x2f   : > { %643 = vrot.lane.b32.xlu0 %v634_v31, %s3248_s17 }
  0x31   : > { %641 = vrot.lane.b32.xlu1 %v630_v33, %s3248_s17  ;;  %v1659_v33 = vrot.slane %v3020_v29, %v3313_v6 }
  0x33   : > { %721 = vrot.lane.b32.xlu0 %v708_v34, %s3249_s20  ;;  %v1589_v34 = vrot.slane %v3016_v22, %v3326_v13 }
  0x35   : > { %645 = vrot.lane.b32.xlu1 %v638_v35, %s3248_s17 }
  0x37   : > { %725 = vrot.lane.b32.xlu0 %v716_v36, %s3249_s20 }
  0x39   : > { %723 = vrot.lane.b32.xlu1 %v712_v38, %s3249_s20  ;;  %v3024_v38 = vld [vmem:[%s4472_s5 + $0x48] sm:$0xf] }
  0x3a   : > { %v1741_v42 = vrot.slane %v3024_v38, %v3313_v6  ;;  %v1753_v52 = vrot.slane %v3024_v38, %v3326_v13 }
  0x3b   : > { %803 = vrot.lane.b32.xlu0 %v790_v39, %s3250_s25  ;;  %v1663_v39 = vrot.slane %v3020_v29, %v3317_v8 }
  0x3d   : > { %727 = vrot.lane.b32.xlu1 %v720_v40, %s3249_s20 }
  0x3f   : > { %807 = vrot.lane.b32.xlu0 %v798_v41, %s3250_s25 }
  0x41   : > { %805 = vrot.lane.b32.xlu1 %v794_v43, %s3250_s25  ;;  %v1671_v43 = vrot.slane %v3020_v29, %v3326_v13 }
  0x43   : > { %885 = vrot.lane.b32.xlu0 %v872_v44, %s3251_s28 }
  0x45   : > { %809 = vrot.lane.b32.xlu1 %v802_v45, %s3250_s25 }
  0x47   : > { %889 = vrot.lane.b32.xlu0 %v880_v46, %s3251_s28  ;;  %v1749_v46 = vrot.slane %v3024_v38, %v3315_v7 }
  0x49   : > { %887 = vrot.lane.b32.xlu1 %v876_v48, %s3251_s28  ;;  %v1745_v48 = vrot.slane %v3024_v38, %v3317_v8  ;;  %v3048_v38 = vld [vmem:[%s4472_s5 + $0x60] sm:$0xf] }
  0x4b   : > { %967 = vrot.lane.b32.xlu0 %v954_v49, %s3252_s9 }
  0x4d   : > { %891 = vrot.lane.b32.xlu1 %v884_v50, %s3251_s28 }
  0x4f   : > { %971 = vrot.lane.b32.xlu0 %v962_v51, %s3252_s9  ;;  %v1821_v51 = vrot.slane %v3028_v47, %v3313_v6 }
  0x51   : > { %969 = vrot.lane.b32.xlu1 %v958_v53, %s3252_s9 }
  0x53   : > { %1049 = vrot.lane.b32.xlu0 %v1036_v54, %s4474_s13 }
  0x55   : > { %973 = vrot.lane.b32.xlu1 %v966_v55, %s3252_s9  ;;  %v1829_v55 = vrot.slane %v3028_v47, %v3315_v7 }
  0x57   : > { %1053 = vrot.lane.b32.xlu0 %v1044_v56, %s4474_s13  ;;  %v3032_v56 = vld [vmem:[%s4472_s5 + $0x50] sm:$0xf] }
  0x59   : > { %1051 = vrot.lane.b32.xlu1 %v1040_v58, %s4474_s13 }
  0x5b   : > { %1131 = vrot.lane.b32.xlu0 %v1118_v59, %s3254_s18 }
  0x5d   : > { %1055 = vrot.lane.b32.xlu1 %v1048_v60, %s4474_s13  ;;  %v1901_v60 = vrot.slane %v3032_v56, %v3313_v6  ;;  %s246_s13 = scalar_lea.vmem %s4467_s0, %s3124_s10 }
  0x5f   : > { %1135 = vrot.lane.b32.xlu0 %v1126_v61, %s3254_s18  ;;  %v1833_v61 = vrot.slane %v3028_v47, %v3326_v13 }
  0x61   : > { %1133 = vrot.lane.b32.xlu1 %v1122_v63, %s3254_s18 }
  0x63   : > { %1213 = vrot.lane.b32.xlu0 %v1200_v0, %s3255_s24  ;;  %v1909_v0 = vrot.slane %v3032_v56, %v3315_v7 }
  0x65   : > { %1137 = vrot.lane.b32.xlu1 %v1130_v1, %s3254_s18  ;;  %v3036_v1 = vld [vmem:[%s4472_s5 + $0x54] sm:$0xf] }
  0x67   : > { %1217 = vrot.lane.b32.xlu0 %v1208_v2, %s3255_s24  ;;  %v1905_v2 = vrot.slane %v3032_v56, %v3317_v8 }
  0x69   : > { %1215 = vrot.lane.b32.xlu1 %v1204_v4, %s3255_s24 }
  0x6b   : > { %1295 = vrot.lane.b32.xlu0 %v1282_v5, %s3256_s29  ;;  %v1981_v5 = vrot.slane %v3036_v1, %v3313_v6 }
  0x6d   : > { %1219 = vrot.lane.b32.xlu1 %v1212_v9, %s3255_s24  ;;  %v1913_v9 = vrot.slane %v3032_v56, %v3326_v13  ;;  %v2225_v56 = vrot.slane %v3048_v38, %v3317_v8 }
  0x6f   : > { %1299 = vrot.lane.b32.xlu0 %v1290_v10, %s3256_s29 }
  0x71   : > { %1297 = vrot.lane.b32.xlu1 %v1286_v12, %s3256_s29  ;;  %v1989_v12 = vrot.slane %v3036_v1, %v3315_v7 }
  0x73   : > { %1426 = vrot.lane.b32.xlu0 %v1413_v14, %s3257_s12  ;;  %v3040_v14 = vld [vmem:[%s4472_s5 + $0x58] sm:$0xf] }
  0x74   : > { %v2069_v22 = vrot.slane %v3040_v14, %v3315_v7 }
  0x75   : > { %1301 = vrot.lane.b32.xlu1 %v1294_v15, %s3256_s29  ;;  %v1985_v15 = vrot.slane %v3036_v1, %v3317_v8 }
  0x77   : > { %1430 = vrot.lane.b32.xlu0 %v1421_v16, %s3257_s12 }
  0x79   : > { %1428 = vrot.lane.b32.xlu1 %v1417_v18, %s3257_s12  ;;  %v2061_v18 = vrot.slane %v3040_v14, %v3313_v6 }
  0x7b   : > { %1508 = vrot.lane.b32.xlu0 %v1495_v19, %s3258_s19  ;;  %v1993_v19 = vrot.slane %v3036_v1, %v3326_v13  ;;  %v2233_v1 = vrot.slane %v3048_v38, %v3326_v13 }
  0x7d   : > { %1432 = vrot.lane.b32.xlu1 %v1425_v20, %s3257_s12 }
  0x7f   : > { %v3482_v24 = vpop.permute.xlu1 %310  ;;  %1512 = vrot.lane.b32.xlu0 %v1503_v21, %s3258_s19 }
  0x81   : > { %1510 = vrot.lane.b32.xlu1 %v1499_v23, %s3258_s19  ;;  %v3044_v23 = vld [vmem:[%s4472_s5 + $0x5c] sm:$0xf] }
  0x82   : > { %v2141_v29 = vrot.slane %v3044_v23, %v3313_v6  ;;  %v2153_v47 = vrot.slane %v3044_v23, %v3326_v13 }
  0x83   : > { %v3488_v27 = vpop.permute.xlu1 %312  ;;  %1590 = vrot.lane.b32.xlu0 %v1577_v25, %s3259_s27  ;;  %v2065_v25 = vrot.slane %v3040_v14, %v3317_v8 }
  0x85   : > { %1514 = vrot.lane.b32.xlu1 %v1507_v26, %s3258_s19 }
  0x86   : > { %v3497_v31 = vpop.permute.xlu0 %262 }
  0x87   : > { %v3499_v32 = vpop.permute.xlu1 %316  ;;  %1594 = vrot.lane.b32.xlu0 %v1585_v28, %s3259_s27 }
  0x89   : > { %1592 = vrot.lane.b32.xlu1 %v1581_v30, %s3259_s27  ;;  %v2073_v30 = vrot.slane %v3040_v14, %v3326_v13  ;;  %v258_v14 = vld [vmem:[%s246_s13 + $0x18] sm:$0xff] }
  0x8a   : > { %v3505_v35 = vpop.permute.xlu0 %272 }
  0x8b   : > { %v3507_v36 = vpop.permute.xlu1 %395  ;;  %1672 = vrot.lane.b32.xlu0 %v1659_v33, %s3260_s15 }
  0x8d   : > { %1596 = vrot.lane.b32.xlu1 %v1589_v34, %s3259_s27 }
  0x8e   : > { %v3516_v40 = vpop.permute.xlu0 %314 }
  0x8f   : > { %v3518_v41 = vpop.permute.xlu1 %399  ;;  %1676 = vrot.lane.b32.xlu0 %v1667_v37, %s3260_s15  ;;  %v2149_v37 = vrot.slane %v3044_v23, %v3315_v7 }
  0x91   : > { %1674 = vrot.lane.b32.xlu1 %v1663_v39, %s3260_s15  ;;  %v2145_v39 = vrot.slane %v3044_v23, %v3317_v8  ;;  %v257_v23 = vld [vmem:[%s246_s13 + $0x10] sm:$0xff] }
  0x92   : > { %v3524_v44 = vpop.permute.xlu0 %393 }
  0x93   : > { %v3526_v45 = vpop.permute.xlu1 %477  ;;  %1754 = vrot.lane.b32.xlu0 %v1741_v42, %s3244_s7 }
  0x95   : > { %1678 = vrot.lane.b32.xlu1 %v1671_v43, %s3260_s15 }
  0x96   : > { %v3535_v49 = vpop.permute.xlu0 %397 }
  0x97   : > { %v3537_v50 = vpop.permute.xlu1 %481  ;;  %1758 = vrot.lane.b32.xlu0 %v1749_v46, %s3244_s7  ;;  %v2221_v46 = vrot.slane %v3048_v38, %v3313_v6 }
  0x99   : > { %1756 = vrot.lane.b32.xlu1 %v1745_v48, %s3244_s7 }
  0x9a   : > { %v3543_v53 = vpop.permute.xlu0 %475 }
  0x9b   : > { %v3545_v54 = vpop.permute.xlu1 %559  ;;  %1834 = vrot.lane.b32.xlu0 %v1821_v51, %s3245_s8 }
  0x9d   : > { %1760 = vrot.lane.b32.xlu1 %v1753_v52, %s3244_s7  ;;  %v2229_v52 = vrot.slane %v3048_v38, %v3315_v7 }
  0x9e   : > { %v3554_v58 = vpop.permute.xlu0 %479 }
  0x9f   : > { %v3556_v59 = vpop.permute.xlu1 %563  ;;  %1838 = vrot.lane.b32.xlu0 %v1829_v55, %s3245_s8  ;;  %v3052_v55 = vld [vmem:[%s4472_s5 + $0x64] sm:$0xf] }
  0xa0   : > { %v2313_v38 = vrot.slane %v3052_v55, %v3326_v13 }
  0xa1   : > { %1836 = vrot.lane.b32.xlu1 %v1825_v57, %s3245_s8 }
  0xa2   : > { %v3562_v62 = vpop.permute.xlu0 %557 }
  0xa3   : > { %v3564_v63 = vpop.permute.xlu1 %641  ;;  %1914 = vrot.lane.b32.xlu0 %v1901_v60, %s3246_s11 }
  0xa5   : > { %1840 = vrot.lane.b32.xlu1 %v1833_v61, %s3245_s8  ;;  %v2301_v61 = vrot.slane %v3052_v55, %v3313_v6 }
  0xa6   : > { %v3573_v3 = vpop.permute.xlu0 %561 }
  0xa7   : > { %v3575_v4 = vpop.permute.xlu1 %645  ;;  %1918 = vrot.lane.b32.xlu0 %v1909_v0, %s3246_s11  ;;  %v255_v0 = vld [vmem:[%s246_s13] sm:$0xff] }
  0xa9   : > { %1916 = vrot.lane.b32.xlu1 %v1905_v2, %s3246_s11 }
  0xaa   : > { %v3581_v10 = vpop.permute.xlu0 %639 }
  0xab   : > { %v3583_v11 = vpop.permute.xlu1 %723  ;;  %1994 = vrot.lane.b32.xlu0 %v1981_v5, %s3247_s14  ;;  %v265_v5 = vmul.f32 %v3497_v31, %v255_v0 }
  0xad   : > { %1920 = vrot.lane.b32.xlu1 %v1913_v9, %s3246_s11 }
  0xae   : > { %v3592_v16 = vpop.permute.xlu0 %643 }
  0xaf   : > { %v3594_v17 = vpop.permute.xlu1 %727  ;;  %1998 = vrot.lane.b32.xlu0 %v1989_v12, %s3247_s14  ;;  %v2309_v12 = vrot.slane %v3052_v55, %v3315_v7 }
  0xb1   : > { %1996 = vrot.lane.b32.xlu1 %v1985_v15, %s3247_s14  ;;  %v3056_v15 = vld [vmem:[%s4472_s5 + $0x68] sm:$0xf] }
  0xb2   : > { %v3600_v20 = vpop.permute.xlu0 %721 }
  0xb3   : > { %v3602_v21 = vpop.permute.xlu1 %805  ;;  %2074 = vrot.lane.b32.xlu0 %v2061_v18, %s3248_s17  ;;  %v275_v18 = vadd.f32 %v3505_v35, %v265_v5 }
  0xb5   : > { %2000 = vrot.lane.b32.xlu1 %v1993_v19, %s3247_s14  ;;  %v2305_v19 = vrot.slane %v3052_v55, %v3317_v8  ;;  %v2389_v55 = vrot.slane %v3056_v15, %v3315_v7 }
  0xb6   : > { %v3611_v26 = vpop.permute.xlu0 %725 }
  0xb7   : > { %v3613_v28 = vpop.permute.xlu1 %809  ;;  %2078 = vrot.lane.b32.xlu0 %v2069_v22, %s3248_s17  ;;  %v256_v22 = vld [vmem:[%s246_s13 + $0x8] sm:$0xff]  ;;  %s4479_s13 = smov 119  }
  0xb9   : > { %2076 = vrot.lane.b32.xlu1 %v2065_v25, %s3248_s17 }
  0xba   : > { %v3621_v33 = vpop.permute.xlu0 %803 }
  0xbb   : > { %v3623_v34 = vpop.permute.xlu1 %887  ;;  %2154 = vrot.lane.b32.xlu0 %v2141_v29, %s3249_s20  ;;  %v268_v29 = vmul.f32 %v3497_v31, %v258_v14 }
  0xbd   : > { %2080 = vrot.lane.b32.xlu1 %v2073_v30, %s3248_s17 }
  0xbe   : > { %v3636_v42 = vpop.permute.xlu0 %807 }
  0xbf   : > { %v3638_v43 = vpop.permute.xlu1 %891  ;;  %2158 = vrot.lane.b32.xlu0 %v2149_v37, %s3249_s20  ;;  %v2381_v37 = vrot.slane %v3056_v15, %v3313_v6 }
  0xc1   : > { %2156 = vrot.lane.b32.xlu1 %v2145_v39, %s3249_s20  ;;  %v266_v39 = vmul.f32 %v3497_v31, %v256_v22 }
  0xc2   : > { %v3645_v48 = vpop.permute.xlu0 %885 }
  0xc3   : > { %v3647_v51 = vpop.permute.xlu1 %969  ;;  %2234 = vrot.lane.b32.xlu0 %v2221_v46, %s3250_s25  ;;  %v267_v46 = vmul.f32 %v3497_v31, %v257_v23  ;;  %v319_v31 = vsel %vm318_vm0, %v3482_v24, %v3488_v27 }
  0xc5   : > { %2160 = vrot.lane.b32.xlu1 %v2153_v47, %s3249_s20  ;;  %v278_v47 = vadd.f32 %v3505_v35, %v268_v29  ;;  %v277_v0 = vadd.f32 %v3505_v35, %v267_v46  ;;  %v320_v29 = vsel %vm318_vm0, %v3488_v27, %v3516_v40  ;;  %v403_v46 = vsel %vm401_vm1, %v3507_v36, %v3535_v49 }
  0xc6   : > { %v3661_v57 = vpop.permute.xlu0 %889  ;;  %v404_v27 = vsel %vm401_vm1, %v3535_v49, %v3518_v41 }
  0xc7   : > { %v3663_v60 = vpop.permute.xlu1 %973  ;;  %2238 = vrot.lane.b32.xlu0 %v2229_v52, %s3250_s25  ;;  %v3693_v52 = vmax.f32 %v275_v18, 0.0  ;;  %v3707_v5 = vmax.f32 %v278_v47, 0.0  ;;  %v3717_v22 = vmax.f32 %v277_v0, 0.0 }
  0xc9   : > { %2236 = vrot.lane.b32.xlu1 %v2225_v56, %s3250_s25  ;;  %v328_v14 = vmul.f32 %v319_v31, %v3693_v52  ;;  %v484_v31 = vsel %vm483_vm2, %v3543_v53, %v3526_v45 }
  0xca   : > { %v3669_v2 = vpop.permute.xlu0 %967 }
  0xcb   : > { %v3672_v9 = vpop.permute.xlu1 %1051  ;;  %2314 = vrot.lane.b32.xlu0 %v2301_v61, %s3251_s28  ;;  %v276_v61 = vadd.f32 %v3505_v35, %v266_v39  ;;  %v327_v35 = vmul.f32 0.0, %v3482_v24  ;;  %v331_v39 = vmul.f32 %v3499_v32, %v3707_v5 }
  0xcd   : > { %2240 = vrot.lane.b32.xlu1 %v2233_v1, %s3250_s25  ;;  %v3126_v24 = vpack.c.bf16 %v328_v14, %v327_v35  ;;  %v3128_v49 = vpack.c.bf16 %v331_v39, %v331_v39  ;;  %v410_v35 = vmul.f32 0.0, %v3524_v44 }
  0xce   : > { %v3682_v25 = vpop.permute.xlu0 %971 }
  0xcf   : > { %v3685_v30 = vpop.permute.xlu1 %1055  ;;  %2318 = vrot.lane.b32.xlu0 %v2309_v12, %s3251_s28  ;;  %v2385_v12 = vrot.slane %v3056_v15, %v3317_v8 }
  0xd1   : > { %2316 = vrot.lane.b32.xlu1 %v2305_v19, %s3251_s28  ;;  %v3715_v19 = vmax.f32 %v276_v61, 0.0 }
  0xd2   : > { %v3696_v56 = vpop.permute.xlu0 %1049 }
  0xd3   : > { %v3700_v1 = vpop.permute.xlu1 %1133  ;;  %2394 = vrot.lane.b32.xlu0 %v2381_v37, %s3252_s9  ;;  %v321_v37 = vsel %vm318_vm0, %v3516_v40, %v3499_v32  ;;  %v329_v40 = vmul.f32 %v320_v29, %v3715_v19  ;;  %v402_v32 = vsel %vm401_vm1, %v3524_v44, %v3507_v36 }
  0xd4   : > { %v330_v61 = vmul.f32 %v321_v37, %v3717_v22  ;;  %v411_v29 = vmul.f32 %v402_v32, %v3693_v52 }
  0xd5   : > { %2320 = vrot.lane.b32.xlu1 %v2313_v38, %s3251_s28  ;;  %v2393_v38 = vrot.slane %v3056_v15, %v3326_v13  ;;  %v412_v15 = vmul.f32 %v403_v46, %v3715_v19  ;;  %v414_v46 = vmul.f32 %v3518_v41, %v3707_v5  ;;  %v567_v41 = vsel %vm565_vm3, %v3545_v54, %v3573_v3 }
  0xd6   : > { %v3712_v18 = vpop.permute.xlu0 %1053  ;;  %v3127_v14 = vpack.c.bf16 %v330_v61, %v329_v40  ;;  %v485_v40 = vsel %vm483_vm2, %v3526_v45, %v3554_v58  ;;  %v496_v61 = vmul.f32 %v3537_v50, %v3707_v5 }
  0xd7   : > { %v3719_v23 = vpop.permute.xlu1 %1137  ;;  %2398 = vrot.lane.b32.xlu0 %v2389_v55, %s3252_s9  ;;  %v413_v55 = vmul.f32 %v404_v27, %v3717_v22  ;;  %v3129_v27 = vpack.c.bf16 %v411_v29, %v410_v35  ;;  %v576_v35 = vmul.f32 %v567_v41, %v3715_v19  ;;  %v648_v29 = vsel %vm647_vm4, %v3581_v10, %v3564_v63 }
  0xd9   : > { %2396 = vrot.lane.b32.xlu1 %v2385_v12, %s3252_s9  ;;  %v3130_v36 = vpack.c.bf16 %v413_v55, %v412_v15  ;;  %v568_v15 = vsel %vm565_vm3, %v3573_v3, %v3556_v59  ;;  %v3131_v55 = vpack.c.bf16 %v414_v46, %v414_v46 }
  0xda   : > { %v3738_v47 = vpop.permute.xlu0 %1131  ;;  %v577_v3 = vmul.f32 %v568_v15, %v3717_v22  ;;  %v649_v15 = vsel %vm647_vm4, %v3564_v63, %v3592_v16 }
  0xdb   : > { %v3742_v0 = vpop.permute.xlu1 %1215  ;;  %350 = vrot.lane.b32.xlu0 %v3126_v24, %s3252_s9  ;;  %v492_v24 = vmul.f32 0.0, %v3543_v53  ;;  %v486_v53 = vsel %vm483_vm2, %v3554_v58, %v3537_v50  ;;  %v494_v58 = vmul.f32 %v485_v40, %v3715_v19  ;;  %v656_v40 = vmul.f32 0.0, %v3581_v10 }
  0xdc   : > { %v650_v10 = vsel %vm647_vm4, %v3592_v16, %v3575_v4  ;;  %v658_v16 = vmul.f32 %v649_v15, %v3715_v19 }
  0xdd   : > { %2400 = vrot.lane.b32.xlu1 %v2393_v38, %s3252_s9  ;;  %v493_v38 = vmul.f32 %v484_v31, %v3693_v52  ;;  %v566_v31 = vsel %vm565_vm3, %v3562_v62, %v3545_v54  ;;  %v3136_v54 = vpack.c.bf16 %v577_v3, %v576_v35  ;;  %v730_v35 = vsel %vm4478_vm5, %v3600_v20, %v3583_v11 }
  0xde   : > { %v3754_v12 = vpop.permute.xlu0 %1135  ;;  %v575_v46 = vmul.f32 %v566_v31, %v3693_v52 }
  0xdf   : > { %v3758_v37 = vpop.permute.xlu1 %1219  ;;  %354 = vrot.lane.b32.xlu0 %v3128_v49, %s3252_s9  ;;  %v3132_v32 = vpack.c.bf16 %v493_v38, %v492_v24  ;;  %v495_v49 = vmul.f32 %v486_v53, %v3717_v22  ;;  %v574_v38 = vmul.f32 0.0, %v3562_v62  ;;  %v657_v53 = vmul.f32 %v648_v29, %v3693_v52 }
  0xe1   : > { %352 = vrot.lane.b32.xlu1 %v3127_v14, %s3252_s9  ;;  %v3134_v14 = vpack.c.bf16 %v496_v61, %v496_v61  ;;  %v3133_v24 = vpack.c.bf16 %v495_v49, %v494_v58  ;;  %v3135_v41 = vpack.c.bf16 %v575_v46, %v574_v38  ;;  %v3138_v58 = vpack.c.bf16 %v657_v53, %v656_v40 }
  0xe2   : > { %v3764_v39 = vpop.permute.xlu0 %1213  ;;  %v732_v49 = vsel %vm4478_vm5, %v3611_v26, %v3594_v17  ;;  %v739_v40 = vmul.f32 %v730_v35, %v3693_v52  ;;  %v894_v35 = vsel %vm443_vm7, %v3645_v48, %v3623_v34 }
  0xe3   : > { %v3768_v44 = vpop.permute.xlu1 %1297  ;;  %435 = vrot.lane.b32.xlu0 %v3130_v36, %s3251_s28 }
  0xe5   : > { %433 = vrot.lane.b32.xlu1 %v3129_v27, %s3251_s28 }
  0xe6   : > { %v3786_v45 = vpop.permute.xlu0 %1217 }
  0xe7   : > { %v3790_v50 = vpop.permute.xlu1 %1301  ;;  %515 = vrot.lane.b32.xlu0 %v3132_v32, %s3250_s25  ;;  %v578_v32 = vmul.f32 %v3556_v59, %v3707_v5  ;;  %v731_v59 = vsel %vm4478_vm5, %v3583_v11, %v3611_v26  ;;  %v741_v26 = vmul.f32 %v732_v49, %v3717_v22 }
  0xe8   : > { %v740_v29 = vmul.f32 %v731_v59, %v3715_v19  ;;  %v824_v59 = vmul.f32 %v3613_v28, %v3707_v5 }
  0xe9   : > { %437 = vrot.lane.b32.xlu1 %v3131_v55, %s3251_s28  ;;  %v660_v55 = vmul.f32 %v3575_v4, %v3707_v5  ;;  %v3137_v31 = vpack.c.bf16 %v578_v32, %v578_v32  ;;  %v820_v32 = vmul.f32 0.0, %v3621_v33 }
  0xea   : > { %v3802_v36 = vpop.permute.xlu0 %1295  ;;  %v3142_v11 = vpack.c.bf16 %v741_v26, %v740_v29  ;;  %v976_v26 = vsel %vm361_vm8, %v3669_v2, %v3647_v51 }
  0xeb   : > { %v3806_v27 = vpop.permute.xlu1 %1428  ;;  %519 = vrot.lane.b32.xlu0 %v3134_v14, %s3250_s25  ;;  %v659_v14 = vmul.f32 %v650_v10, %v3717_v22  ;;  %v3140_v3 = vpack.c.bf16 %v660_v55, %v660_v55  ;;  %v742_v10 = vmul.f32 %v3594_v17, %v3707_v5  ;;  %v895_v17 = vsel %vm443_vm7, %v3623_v34, %v3661_v57 }
  0xec   : > { %v904_v29 = vmul.f32 %v895_v17, %v3715_v19  ;;  %v1060_v17 = vsel %vm4476_vm9, %v3712_v18, %v3685_v30 }
  0xed   : > { %517 = vrot.lane.b32.xlu1 %v3133_v24, %s3250_s25  ;;  %v812_v24 = vsel %vm525_vm6, %v3621_v33, %v3602_v21  ;;  %v3139_v46 = vpack.c.bf16 %v659_v14, %v658_v16  ;;  %v814_v33 = vsel %vm525_vm6, %v3636_v42, %v3613_v28  ;;  %v3143_v16 = vpack.c.bf16 %v742_v10, %v742_v10 }
  0xee   : > { %v3812_v61 = vpop.permute.xlu0 %1299  ;;  %v823_v14 = vmul.f32 %v814_v33, %v3717_v22  ;;  %v977_v33 = vsel %vm361_vm8, %v3647_v51, %v3682_v25 }
  0xef   : > { %v3816_v62 = vpop.permute.xlu1 %1432  ;;  %599 = vrot.lane.b32.xlu0 %v3136_v54, %s3249_s20  ;;  %v738_v54 = vmul.f32 0.0, %v3600_v20 }
  0xf1   : > { %597 = vrot.lane.b32.xlu1 %v3135_v41, %s3249_s20  ;;  %v821_v41 = vmul.f32 %v812_v24, %v3693_v52  ;;  %v3141_v55 = vpack.c.bf16 %v739_v40, %v738_v54  ;;  %v902_v54 = vmul.f32 0.0, %v3645_v48  ;;  %v903_v40 = vmul.f32 %v894_v35, %v3693_v52 }
  0xf2   : > { %v3834_v63 = vpop.permute.xlu0 %1426 }
  0xf3   : > { %v3838_v4 = vpop.permute.xlu1 %1510  ;;  %679 = vrot.lane.b32.xlu0 %v3138_v58, %s3248_s17  ;;  %v813_v58 = vsel %vm525_vm6, %v3602_v21, %v3636_v42  ;;  %v3144_v49 = vpack.c.bf16 %v821_v41, %v820_v32  ;;  %v984_v32 = vmul.f32 0.0, %v3669_v2  ;;  %v985_v41 = vmul.f32 %v976_v26, %v3693_v52 }
  0xf4   : > { %v822_v42 = vmul.f32 %v813_v58, %v3715_v19  ;;  %v3147_v58 = vpack.c.bf16 %v903_v40, %v902_v54  ;;  %v978_v2 = vsel %vm361_vm8, %v3682_v25, %v3663_v60  ;;  %v986_v25 = vmul.f32 %v977_v33, %v3715_v19 }
  0xf5   : > { %601 = vrot.lane.b32.xlu1 %v3137_v31, %s3249_s20  ;;  %v896_v31 = vsel %vm443_vm7, %v3661_v57, %v3638_v43  ;;  %v1066_v26 = vmul.f32 0.0, %v3696_v56  ;;  %v1148_v40 = vmul.f32 0.0, %v3738_v47  ;;  %v1152_v33 = vmul.f32 %v3719_v23, %v3707_v5 }
  0xf6   : > { %v3850_v38 = vpop.permute.xlu0 %1430  ;;  %v905_v57 = vmul.f32 %v896_v31, %v3717_v22 }
  0xf7   : > { %v3854_v53 = vpop.permute.xlu1 %1514  ;;  %683 = vrot.lane.b32.xlu0 %v3140_v3, %s3248_s17  ;;  %v3146_v3 = vpack.c.bf16 %v824_v59, %v824_v59  ;;  %v988_v59 = vmul.f32 %v3663_v60, %v3707_v5 }
  0xf8   : > { %v3148_v34 = vpack.c.bf16 %v905_v57, %v904_v29 }
  0xf9   : > { %681 = vrot.lane.b32.xlu1 %v3139_v46, %s3248_s17  ;;  %v3145_v46 = vpack.c.bf16 %v823_v14, %v822_v42  ;;  %v1058_v42 = vsel %vm4476_vm9, %v3696_v56, %v3672_v9  ;;  %v3152_v14 = vpack.c.bf16 %v988_v59, %v988_v59  ;;  %v1224_v59 = vsel %vm1221_vm11, %v3786_v45, %v3758_v37 }
  0xfa   : > { %v3860_v15 = vpop.permute.xlu0 %1508 }
  0xfb   : > { %v3864_v20 = vpop.permute.xlu1 %1592  ;;  %763 = vrot.lane.b32.xlu0 %v3142_v11, %s3247_s14 }
  0xfd   : > { %761 = vrot.lane.b32.xlu1 %v3141_v55, %s3247_s14  ;;  %v906_v55 = vmul.f32 %v3638_v43, %v3707_v5  ;;  %v1059_v43 = vsel %vm4476_vm9, %v3672_v9, %v3712_v18  ;;  %v1069_v18 = vmul.f32 %v1060_v17, %v3717_v22  ;;  %v1222_v17 = vsel %vm1221_vm11, %v3764_v39, %v3742_v0 }
  0xfe   : > { %v3882_v21 = vpop.permute.xlu0 %1512  ;;  %v1068_v35 = vmul.f32 %v1059_v43, %v3715_v19  ;;  %vm1099_vm9 = vcmask 72704  }
  0xff   : > { %v3886_v28 = vpop.permute.xlu1 %1596  ;;  %843 = vrot.lane.b32.xlu0 %v3144_v49, %s3246_s11  ;;  %v3150_v49 = vpack.c.bf16 %v985_v41, %v984_v32  ;;  %v3149_v31 = vpack.c.bf16 %v906_v55, %v906_v55  ;;  %v1070_v41 = vmul.f32 %v3685_v30, %v3707_v5  ;;  %v1223_v30 = vsel %vm1221_vm11, %v3742_v0, %v3786_v45 }
 0x100   : > { %v3154_v9 = vpack.c.bf16 %v1069_v18, %v1068_v35  ;;  %v1233_v45 = vmul.f32 %v1224_v59, %v3717_v22  ;;  %v1230_v35 = vmul.f32 0.0, %v3764_v39  ;;  %v1231_v18 = vmul.f32 %v1222_v17, %v3693_v52 }
 0x101   : > { %765 = vrot.lane.b32.xlu1 %v3143_v16, %s3247_s14  ;;  %v987_v16 = vmul.f32 %v978_v2, %v3717_v22  ;;  %v1443_v17 = vmul.f32 %v3834_v63, %v3693_v52 }
 0x102   : > { %v3898_v24 = vpop.permute.xlu0 %1590 }
 0x103   : > { %v3902_v11 = vpop.permute.xlu1 %1674  ;;  %847 = vrot.lane.b32.xlu0 %v3146_v3, %s3246_s11  ;;  %v1140_v3 = vsel %vm4477_vm10, %v3738_v47, %v3700_v1  ;;  %v3151_v57 = vpack.c.bf16 %v987_v16, %v986_v25  ;;  %v1142_v47 = vsel %vm4477_vm10, %v3754_v12, %v3719_v23  ;;  %v1232_v25 = vmul.f32 %v1223_v30, %v3715_v19 }
 0x104   : > { %v1151_v43 = vmul.f32 %v1142_v47, %v3717_v22  ;;  %v1304_v16 = vsel %vm1303_vm12, %v3802_v36, %v3768_v44 }
 0x105   : > { %845 = vrot.lane.b32.xlu1 %v3145_v46, %s3246_s11  ;;  %v1067_v46 = vmul.f32 %v1058_v42, %v3693_v52  ;;  %v3160_v0 = vpack.c.bf16 %v1233_v45, %v1232_v25  ;;  %v1525_v45 = vmul.f32 %v3860_v15, %v3693_v52 }
 0x106   : > { %v3908_v10 = vpop.permute.xlu0 %1594 }
 0x107   : > { %v3912_v48 = vpop.permute.xlu1 %1678  ;;  %927 = vrot.lane.b32.xlu0 %v3148_v34, %s3245_s8  ;;  %v1149_v34 = vmul.f32 %v1140_v3, %v3693_v52  ;;  %v3153_v55 = vpack.c.bf16 %v1067_v46, %v1066_v26  ;;  %v1313_v26 = vmul.f32 %v1304_v16, %v3693_v52 }
 0x109   : > { %925 = vrot.lane.b32.xlu1 %v3147_v58, %s3245_s8  ;;  %v1141_v58 = vsel %vm4477_vm10, %v3700_v1, %v3754_v12  ;;  %v3156_v2 = vpack.c.bf16 %v1149_v34, %v1148_v40  ;;  %v3159_v40 = vpack.c.bf16 %v1231_v18, %v1230_v35  ;;  %v1305_v34 = vsel %vm1303_vm12, %v3768_v44, %v3812_v61 }
 0x10a   : > { %v3930_v51 = vpop.permute.xlu0 %1672  ;;  %v1150_v12 = vmul.f32 %v1141_v58, %v3715_v19  ;;  %v1437_v58 = vsel %vm1345_vm13, %v3850_v38, %v3816_v62  ;;  %v1447_v35 = vmul.f32 0.0, %v3816_v62  ;;  %v1600_v62 = vsel %vm1181_vm15, %v3864_v20, %v3908_v10 }
 0x10b   : > { %v3934_v60 = vpop.permute.xlu1 %1756  ;;  %1007 = vrot.lane.b32.xlu0 %v3150_v49, %s3244_s7  ;;  %v3155_v49 = vpack.c.bf16 %v1070_v41, %v1070_v41  ;;  %v1316_v41 = vmul.f32 %v3790_v50, %v3707_v5  ;;  %vm359_vm10 = vcmask 1043456  }
 0x10d   : > { %929 = vrot.lane.b32.xlu1 %v3149_v31, %s3245_s8  ;;  %v3158_v31 = vpack.c.bf16 %v1152_v33, %v1152_v33  ;;  %v3164_v30 = vpack.c.bf16 %v1316_v41, %v1316_v41 }
 0x10e   : > { %v3946_v29 = vpop.permute.xlu0 %1676 }
 0x10f   : > { %v3950_v54 = vpop.permute.xlu1 %1760  ;;  %1011 = vrot.lane.b32.xlu0 %v3152_v14, %s3244_s7  ;;  %v3157_v14 = vpack.c.bf16 %v1151_v43, %v1150_v12 }
 0x111   : > { %1009 = vrot.lane.b32.xlu1 %v3151_v57, %s3244_s7  ;;  %v1312_v57 = vmul.f32 0.0, %v3802_v36  ;;  %v1306_v36 = vsel %vm1303_vm12, %v3812_v61, %v3790_v50  ;;  %v1314_v61 = vmul.f32 %v1305_v34, %v3715_v19 }
 0x112   : > { %v3956_v32 = vpop.permute.xlu0 %1754  ;;  %v1315_v33 = vmul.f32 %v1306_v36, %v3717_v22  ;;  %v1599_v36 = vsel %vm1181_vm15, %v3898_v24, %v3864_v20 }
 0x113   : > { %v3960_v56 = vpop.permute.xlu1 %1836  ;;  %1091 = vrot.lane.b32.xlu0 %v3154_v9, %s3260_s15  ;;  %v1234_v9 = vmul.f32 %v3758_v37, %v3707_v5  ;;  %v1436_v37 = vsel %vm1345_vm13, %v3806_v27, %v3850_v38  ;;  %v1446_v38 = vmul.f32 %v1437_v58, %v3707_v5 }
 0x114   : > { %v1445_v59 = vmul.f32 %v1436_v37, %v3717_v22  ;;  %v3163_v43 = vpack.c.bf16 %v1315_v33, %v1314_v61  ;;  %v1681_v37 = vsel %vm1099_vm9, %v3930_v51, %v3902_v11  ;;  %v1607_v61 = vmul.f32 %v3898_v24, %v3693_v52 }
 0x115   : > { %1089 = vrot.lane.b32.xlu1 %v3153_v55, %s3260_s15  ;;  %v3162_v55 = vpack.c.bf16 %v1313_v26, %v1312_v57  ;;  %v3161_v47 = vpack.c.bf16 %v1234_v9, %v1234_v9  ;;  %v1529_v57 = vmul.f32 0.0, %v3854_v53  ;;  %v1601_v9 = vsel %vm1181_vm15, %v3908_v10, %v3886_v28 }
 0x116   : > { %v3978_v1 = vpop.permute.xlu0 %1758  ;;  %v3168_v25 = vpack.c.bf16 %v1446_v38, %v1445_v59  ;;  %v1610_v10 = vmul.f32 %v1601_v9, %v3707_v5  ;;  %v1608_v33 = vmul.f32 %v1599_v36, %v3715_v19  ;;  %v1690_v59 = vmul.f32 %v1681_v37, %v3715_v19 }
 0x117   : > { %v3982_v23 = vpop.permute.xlu1 %1840  ;;  %1171 = vrot.lane.b32.xlu0 %v3156_v2, %s3259_s27  ;;  %v1435_v2 = vsel %vm1345_vm13, %v3834_v63, %v3806_v27  ;;  %v3172_v41 = vpack.c.bf16 %v1529_v57, %v1529_v57  ;;  %v1770_v9 = vmul.f32 %v3956_v32, %v3693_v52 }
 0x119   : > { %1093 = vrot.lane.b32.xlu1 %v3155_v49, %s3260_s15  ;;  %v1517_v49 = vsel %vm1263_vm14, %v3860_v15, %v3838_v4  ;;  %v1519_v15 = vsel %vm1263_vm14, %v3882_v21, %v3854_v53 }
 0x11a   : > { %v3994_v42 = vpop.permute.xlu0 %1834  ;;  %v1526_v16 = vmul.f32 %v1517_v49, %v3715_v19  ;;  %v1611_v49 = vmul.f32 0.0, %v3886_v28  ;;  %v1763_v28 = vsel %vm318_vm0, %v3934_v60, %v3978_v1 }
 0x11b   : > { %v3998_v3 = vpop.permute.xlu1 %1916  ;;  %1175 = vrot.lane.b32.xlu0 %v3158_v31, %s3259_s27  ;;  %v1444_v31 = vmul.f32 %v1435_v2, %v3715_v19  ;;  %v1842_v57 = vsel %vm401_vm1, %v3994_v42, %v3960_v56 }
 0x11c   : > { %v3170_v26 = vpack.c.bf16 %v1526_v16, %v1525_v45  ;;  %v1764_v45 = vsel %vm318_vm0, %v3978_v1, %v3950_v54  ;;  %v1851_v36 = vmul.f32 %v1842_v57, %v3715_v19 }
 0x11d   : > { %1173 = vrot.lane.b32.xlu1 %v3157_v14, %s3259_s27  ;;  %v3167_v18 = vpack.c.bf16 %v1444_v31, %v1443_v17  ;;  %v1682_v17 = vsel %vm1099_vm9, %v3902_v11, %v3946_v29  ;;  %v1693_v31 = vmul.f32 0.0, %v3912_v48  ;;  %v3175_v11 = vpack.c.bf16 %v1611_v49, %v1611_v49 }
 0x11e   : > { %v4004_v46 = vpop.permute.xlu0 %1838  ;;  %v1773_v1 = vmul.f32 %v1764_v45, %v3707_v5 }
 0x11f   : > { %v4008_v39 = vpop.permute.xlu1 %1920  ;;  %1255 = vrot.lane.b32.xlu0 %v3160_v0, %s3258_s19  ;;  %v1518_v0 = vsel %vm1263_vm14, %v3838_v4, %v3882_v21  ;;  %v3169_v4 = vpack.c.bf16 %v1447_v35, %v1447_v35  ;;  %v1528_v21 = vmul.f32 %v1519_v15, %v3707_v5  ;;  %v1691_v35 = vmul.f32 %v1682_v17, %v3717_v22 }
 0x120   : > { %v1527_v34 = vmul.f32 %v1518_v0, %v3717_v22  ;;  %v3178_v0 = vpack.c.bf16 %v1693_v31, %v1693_v31  ;;  %v1772_v15 = vmul.f32 %v1763_v28, %v3717_v22  ;;  %v1843_v37 = vsel %vm401_vm1, %v3960_v56, %v4004_v46 }
 0x121   : > { %1253 = vrot.lane.b32.xlu1 %v3159_v40, %s3258_s19 }
 0x122   : > { %v4026_v44 = vpop.permute.xlu0 %1914 }
 0x123   : > { %v4030_v50 = vpop.permute.xlu1 %1996  ;;  %1335 = vrot.lane.b32.xlu0 %v3162_v55, %s3257_s12  ;;  %v1609_v55 = vmul.f32 %v1600_v62, %v3717_v22 }
 0x125   : > { %1257 = vrot.lane.b32.xlu1 %v3161_v47, %s3258_s19  ;;  %v3171_v47 = vpack.c.bf16 %v1528_v21, %v1527_v34  ;;  %v3174_v2 = vpack.c.bf16 %v1610_v10, %v1609_v55  ;;  %v3180_v34 = vpack.c.bf16 %v1773_v1, %v1772_v15  ;;  %v1850_v21 = vmul.f32 %v3994_v42, %v3693_v52 }
 0x126   : > { %v4042_v12 = vpop.permute.xlu0 %1918  ;;  %v1774_v55 = vmul.f32 0.0, %v3950_v54  ;;  %v1844_v42 = vsel %vm401_vm1, %v4004_v46, %v3982_v23 }
 0x127   : > { %v4047_v27 = vpop.permute.xlu1 %2000  ;;  %1339 = vrot.lane.b32.xlu0 %v3164_v30, %s3257_s12  ;;  %v1689_v30 = vmul.f32 %v3930_v51, %v3693_v52  ;;  %v1683_v51 = vsel %vm1099_vm9, %v3946_v29, %v3912_v48  ;;  %v1762_v48 = vsel %vm318_vm0, %v3956_v32, %v3934_v60  ;;  %v1923_v54 = vsel %vm483_vm2, %v3998_v3, %v4042_v12 }
 0x128   : > { %v1692_v29 = vmul.f32 %v1683_v51, %v3707_v5  ;;  %v3181_v56 = vpack.c.bf16 %v1774_v55, %v1774_v55  ;;  %v1853_v46 = vmul.f32 %v1844_v42, %v3707_v5  ;;  %v2014_v1 = vmul.f32 0.0, %v4047_v27 }
 0x129   : > { %1337 = vrot.lane.b32.xlu1 %v3163_v43, %s3257_s12  ;;  %v3173_v43 = vpack.c.bf16 %v1608_v33, %v1607_v61  ;;  %v3182_v61 = vpack.c.bf16 %v1851_v36, %v1850_v21  ;;  %v1924_v33 = vsel %vm483_vm2, %v4042_v12, %v4008_v39 }
 0x12a   : > { %v4054_v14 = vpop.permute.xlu0 %1994  ;;  %v3177_v62 = vpack.c.bf16 %v1692_v29, %v1691_v35  ;;  %v1933_v12 = vmul.f32 %v1924_v33, %v3707_v5  ;;  %v3190_v21 = vpack.c.bf16 %v2014_v1, %v2014_v1 }
 0x12b   : > { %v4057_v63 = vpop.permute.xlu1 %2076  ;;  %1468 = vrot.lane.b32.xlu0 %v3168_v25, %s3256_s29  ;;  %v3176_v25 = vpack.c.bf16 %v1690_v59, %v1689_v30  ;;  %v1852_v30 = vmul.f32 %v1843_v37, %v3717_v22  ;;  %v2002_v17 = vsel %vm565_vm3, %v4054_v14, %v4030_v50 }
 0x12c   : > { %v2011_v35 = vmul.f32 %v2002_v17, %v3715_v19 }
 0x12d   : > { %1466 = vrot.lane.b32.xlu1 %v3167_v18, %s3256_s29  ;;  %v3183_v31 = vpack.c.bf16 %v1853_v46, %v1852_v30 }
 0x12e   : > { %v4074_v40 = vpop.permute.xlu0 %1998 }
 0x12f   : > { %v4078_v53 = vpop.permute.xlu1 %2080  ;;  %1548 = vrot.lane.b32.xlu0 %v3170_v26, %s3255_s24  ;;  %v2003_v15 = vsel %vm565_vm3, %v4030_v50, %v4074_v40 }
 0x130   : > { %v2094_v30 = vmul.f32 0.0, %v4078_v53 }
 0x131   : > { %1470 = vrot.lane.b32.xlu1 %v3169_v4, %s3256_s29  ;;  %v1771_v4 = vmul.f32 %v1762_v48, %v3715_v19  ;;  %v1934_v48 = vmul.f32 0.0, %v4008_v39 }
 0x132   : > { %v4090_v58 = vpop.permute.xlu0 %2074 }
 0x133   : > { %v4095_v20 = vpop.permute.xlu1 %2156  ;;  %1552 = vrot.lane.b32.xlu0 %v3172_v41, %s3255_s24  ;;  %v3179_v10 = vpack.c.bf16 %v1771_v4, %v1770_v9  ;;  %v3187_v50 = vpack.c.bf16 %v1934_v48, %v1934_v48  ;;  %v2012_v4 = vmul.f32 %v2003_v15, %v3717_v22  ;;  %v2090_v42 = vmul.f32 %v4090_v58, %v3693_v52 }
 0x135   : > { %1550 = vrot.lane.b32.xlu1 %v3171_v47, %s3255_s24  ;;  %v1854_v47 = vmul.f32 0.0, %v3982_v23  ;;  %v1922_v23 = vsel %vm483_vm2, %v4026_v44, %v3998_v3 }
 0x136   : > { %v4102_v38 = vpop.permute.xlu0 %2078  ;;  %v1931_v28 = vmul.f32 %v1922_v23, %v3715_v19 }
 0x137   : > { %v4105_v24 = vpop.permute.xlu1 %2160  ;;  %1632 = vrot.lane.b32.xlu0 %v3174_v2, %s3254_s18  ;;  %v3184_v49 = vpack.c.bf16 %v1854_v47, %v1854_v47  ;;  %v2083_v39 = vsel %vm647_vm4, %v4057_v63, %v4102_v38 }
 0x138   : > { %v2092_v36 = vmul.f32 %v2083_v39, %v3717_v22 }
 0x139   : > { %1630 = vrot.lane.b32.xlu1 %v3173_v43, %s3254_s18  ;;  %v1932_v43 = vmul.f32 %v1923_v54, %v3717_v22 }
 0x13a   : > { %v4122_v16 = vpop.permute.xlu0 %2154 }
 0x13b   : > { %v4126_v18 = vpop.permute.xlu1 %2236  ;;  %1712 = vrot.lane.b32.xlu0 %v3176_v25, %s4479_s13  ;;  %v1930_v25 = vmul.f32 %v4026_v44, %v3693_v52  ;;  %v3186_v45 = vpack.c.bf16 %v1933_v12, %v1932_v43  ;;  %v2162_v55 = vsel %vm4478_vm5, %v4122_v16, %v4095_v20  ;;  %v2170_v54 = vmul.f32 %v4122_v16, %v3693_v52 }
 0x13c   : > { %v2171_v33 = vmul.f32 %v2162_v55, %v3715_v19  ;;  %v2174_v16 = vmul.f32 0.0, %v4105_v24 }
 0x13d   : > { %1634 = vrot.lane.b32.xlu1 %v3175_v11, %s3254_s18  ;;  %v2010_v11 = vmul.f32 %v4054_v14, %v3693_v52  ;;  %v2004_v14 = vsel %vm565_vm3, %v4074_v40, %v4047_v27  ;;  %v2082_v27 = vsel %vm647_vm4, %v4090_v58, %v4057_v63 }
 0x13e   : > { %v4138_v26 = vpop.permute.xlu0 %2158  ;;  %v2013_v40 = vmul.f32 %v2004_v14, %v3707_v5  ;;  %v2091_v47 = vmul.f32 %v2082_v27, %v3715_v19  ;;  %v3194_v43 = vpack.c.bf16 %v2171_v33, %v2170_v54  ;;  %v3196_v48 = vpack.c.bf16 %v2174_v16, %v2174_v16 }
 0x13f   : > { %v4143_v60 = vpop.permute.xlu1 %2240  ;;  %1716 = vrot.lane.b32.xlu0 %v3178_v0, %s4479_s13  ;;  %v3185_v0 = vpack.c.bf16 %v1931_v28, %v1930_v25  ;;  %v3188_v57 = vpack.c.bf16 %v2011_v35, %v2010_v11  ;;  %v2163_v58 = vsel %vm4478_vm5, %v4095_v20, %v4138_v26  ;;  %v2164_v23 = vsel %vm4478_vm5, %v4138_v26, %v4105_v24 }
 0x140   : > { %v3189_v37 = vpack.c.bf16 %v2013_v40, %v2012_v4  ;;  %v3191_v46 = vpack.c.bf16 %v2091_v47, %v2090_v42  ;;  %v2172_v26 = vmul.f32 %v2163_v58, %v3717_v22  ;;  %v2173_v17 = vmul.f32 %v2164_v23, %v3707_v5 }
 0x141   : > { %1714 = vrot.lane.b32.xlu1 %v3177_v62, %s4479_s13  ;;  %v2084_v62 = vsel %vm647_vm4, %v4102_v38, %v4078_v53  ;;  %v2254_v40 = vmul.f32 0.0, %v4143_v60 }
 0x142   : > { %v4150_v41 = vpop.permute.xlu0 %2234  ;;  %v2093_v38 = vmul.f32 %v2084_v62, %v3707_v5  ;;  %v3195_v15 = vpack.c.bf16 %v2173_v17, %v2172_v26 }
 0x143   : > { %v4153_v32 = vpop.permute.xlu1 %2316  ;;  %1795 = vrot.lane.b32.xlu0 %v3180_v34, %s3252_s9  ;;  %v2242_v12 = vsel %vm525_vm6, %v4150_v41, %v4126_v18 }
 0x145   : > { %1793 = vrot.lane.b32.xlu1 %v3179_v10, %s3252_s9 }
 0x146   : > { %v4170_v2 = vpop.permute.xlu0 %2238 }
 0x147   : > { %v4174_v59 = vpop.permute.xlu1 %2320  ;;  %1873 = vrot.lane.b32.xlu0 %v3182_v61, %s3251_s28  ;;  %v3192_v61 = vpack.c.bf16 %v2093_v38, %v2092_v36  ;;  %v2243_v53 = vsel %vm525_vm6, %v4126_v18, %v4170_v2  ;;  %v2244_v20 = vsel %vm525_vm6, %v4170_v2, %v4143_v60  ;;  %v2250_v18 = vmul.f32 %v4150_v41, %v3693_v52 }
 0x148   : > { %v2251_v2 = vmul.f32 %v2242_v12, %v3715_v19  ;;  %v2252_v11 = vmul.f32 %v2243_v53, %v3717_v22  ;;  %v2253_v35 = vmul.f32 %v2244_v20, %v3707_v5 }
 0x149   : > { %1797 = vrot.lane.b32.xlu1 %v3181_v56, %s3252_s9  ;;  %s251_s9 = scalar_lea.vmem %s4473_s6, %s3124_s10 }
 0x14a   : > { %v4186_v51 = vpop.permute.xlu0 %2314  ;;  %v3197_v27 = vpack.c.bf16 %v2251_v2, %v2250_v18 }
 0x14b   : > { %v4191_v3 = vpop.permute.xlu1 %2396  ;;  %1877 = vrot.lane.b32.xlu0 %v3184_v49, %s3251_s28  ;;  %v2322_v14 = vsel %vm443_vm7, %v4186_v51, %v4153_v32  ;;  %v2330_v36 = vmul.f32 %v4186_v51, %v3693_v52 }
 0x14c   : > { %v2331_v38 = vmul.f32 %v2322_v14, %v3715_v19 }
 0x14d   : > { %1875 = vrot.lane.b32.xlu1 %v3183_v31, %s3251_s28  ;;  %v3193_v31 = vpack.c.bf16 %v2094_v30, %v2094_v30 }
 0x14e   : > { %v4198_v29 = vpop.permute.xlu0 %2318 }
 0x14f   : > { %v4201_v44 = vpop.permute.xlu1 %2400  ;;  %1955 = vrot.lane.b32.xlu0 %v3186_v45, %s3250_s25  ;;  %v2323_v55 = vsel %vm443_vm7, %v4153_v32, %v4198_v29  ;;  %v2324_v32 = vsel %vm443_vm7, %v4198_v29, %v4174_v59 }
 0x150   : > { %v2414_v14 = vmul.f32 0.0, %v4201_v44 }
 0x151   : > { %1953 = vrot.lane.b32.xlu1 %v3185_v0, %s3250_s25 }
 0x152   : > { %v4218_v9 = vpop.permute.xlu0 %2394 }
 0x153   : > { %v4222_v34 = vpop.permute.xlu1 %352  ;;  %2033 = vrot.lane.b32.xlu0 %v3188_v57, %s3249_s20  ;;  %v2402_v12 = vsel %vm361_vm8, %v4218_v9, %v4191_v3 }
 0x154   : > { %v357_v0 = vrot.slane %v4222_v34, 4 }
 0x155   : > { %1957 = vrot.lane.b32.xlu1 %v3187_v50, %s3250_s25 }
 0x156   : > { %v4234_v10 = vpop.permute.xlu0 %2398 }
 0x157   : > { %v434_v63 = vpop.permute.xlu1 %433  ;;  %2037 = vrot.lane.b32.xlu0 %v3190_v21, %s3249_s20  ;;  %v3198_v21 = vpack.c.bf16 %v2253_v35, %v2252_v11  ;;  %v2403_v29 = vsel %vm361_vm8, %v4191_v3, %v4234_v10  ;;  %v2404_v16 = vsel %vm361_vm8, %v4234_v10, %v4201_v44  ;;  %v2410_v3 = vmul.f32 %v4218_v9, %v3693_v52 }
 0x158   : > { %v439_v1 = vrot.slane %v434_v63, 4  ;;  %v2413_v10 = vmul.f32 %v2404_v16, %v3707_v5 }
 0x159   : > { %2035 = vrot.lane.b32.xlu1 %v3189_v37, %s3249_s20 }
 0x15a   : > { %v351_v56 = vpop.permute.xlu0 %350 }
 0x15b   : > { %v438_v49 = vpop.permute.xlu1 %437  ;;  %2115 = vrot.lane.b32.xlu0 %v3192_v61, %s3248_s17  ;;  %v356_v25 = vrot.slane %v351_v56, 4 }
 0x15c   : > { %v441_v39 = vrot.slane %v438_v49, 4  ;;  %v3200_v49 = vpack.c.bf16 %v2331_v38, %v2330_v36 }
 0x15d   : > { %2113 = vrot.lane.b32.xlu1 %v3191_v46, %s3248_s17  ;;  %v360_v50 = vsel %vm359_vm10, %v356_v25, %v357_v0 }
 0x15e   : > { %v355_v24 = vpop.permute.xlu0 %354  ;;  %v362_v60 = vsel %vm361_vm8, %v351_v56, %v360_v50  ;;  %v2334_v56 = vmul.f32 0.0, %v4174_v59  ;;  %v3199_v59 = vpack.c.bf16 %v2254_v40, %v2254_v40 }
 0x15f   : > { %v358_v28 = vrot.slane %v355_v24, 4  ;;  %v4265_v45 = vpop.permute.xlu1 %517  ;;  %2193 = vrot.lane.b32.xlu0 %v3194_v43, %s3247_s14  ;;  %v2412_v24 = vmul.f32 %v2403_v29, %v3717_v22 }
 0x160   : > { %v3202_v17 = vpack.c.bf16 %v2334_v56, %v2334_v56 }
 0x161   : > { %2117 = vrot.lane.b32.xlu1 %v3193_v31, %s3248_s17  ;;  %v363_v4 = vsel %vm359_vm10, %v357_v0, %v358_v28  ;;  %v522_v31 = vrot.slane %v4265_v45, 4  ;;  %v2411_v28 = vmul.f32 %v2402_v12, %v3715_v19 }
 0x162   : > { %v436_v57 = vpop.permute.xlu0 %435  ;;  %v364_v51 = vsel %vm361_vm8, %v4222_v34, %v363_v4  ;;  %v2333_v34 = vmul.f32 %v2324_v32, %v3707_v5 }
 0x163   : > { %v440_v41 = vrot.slane %v436_v57, 4  ;;  %v4278_v62 = vpop.permute.xlu1 %597  ;;  %2197 = vrot.lane.b32.xlu0 %v3196_v48, %s3247_s14 }
 0x164   : > { %v603_v18 = vrot.slane %v4278_v62, 4 }
 0x165   : > { %2195 = vrot.lane.b32.xlu1 %v3195_v15, %s3247_s14  ;;  %v442_v37 = vsel %vm359_vm10, %v439_v1, %v440_v41  ;;  %v445_v42 = vsel %vm359_vm10, %v440_v41, %v441_v39  ;;  %v3204_v1 = vpack.c.bf16 %v2413_v10, %v2412_v24 }
 0x166   : > { %v516_v47 = vpop.permute.xlu0 %515  ;;  %v444_v61 = vsel %vm443_vm7, %v434_v63, %v442_v37  ;;  %v446_v54 = vsel %vm443_vm7, %v436_v57, %v445_v42  ;;  %v2332_v63 = vmul.f32 %v2323_v55, %v3717_v22  ;;  %v2505_v37 = vld [vmem:[%s4471_s4] sm:$0xff]  ;;  %v3205_v42 = vpack.c.bf16 %v2414_v14, %v2414_v14 }
 0x167   : > { %v602_v33 = vpop.permute.xlu1 %601  ;;  %2275 = vrot.lane.b32.xlu0 %v3198_v21, %s3246_s11  ;;  %v3063_v30 = vcombine.high %v362_v60, %v444_v61  ;;  %v3065_v46 = vcombine.high %v364_v51, %v446_v54  ;;  %v3062_v58 = vcombine.low %v362_v60, %v444_v61  ;;  %v3064_v23 = vcombine.low %v364_v51, %v446_v54 }
 0x168   : > { %v521_v53 = vrot.slane %v516_v47, 4  ;;  %v3201_v25 = vpack.c.bf16 %v2333_v34, %v2332_v63  ;;  %v605_v35 = vrot.slane %v602_v33, 4  ;;  %v4349_v33 = vld [vmem:[%s4470_s3] sm:$0xff] }
 0x169   : > { %2273 = vrot.lane.b32.xlu1 %v3197_v27, %s3246_s11  ;;  %2804 = vmatprep.subr.bf16.mxu0 %v3063_v30  ;;  %v3203_v27 = vpack.c.bf16 %v2411_v28, %v2410_v3  ;;  %v3061_v56 = vcombine.high %v4349_v33, %v4349_v33 }
 0x16a   : > { %2845 = vmatprep.subr.bf16.mxu1 %v3065_v46  ;;  %2805 = vmatpush1.bf16.msra.mxu0 %v3062_v58  ;;  %v520_v43 = vpop.permute.xlu0 %519  ;;  %v524_v11 = vsel %vm359_vm10, %v521_v53, %v522_v31 }
 0x16b   : > { %2846 = vmatpush1.bf16.msra.mxu1 %v3064_v23  ;;  %v523_v20 = vrot.slane %v520_v43, 4  ;;  %v4315_v26 = vpop.permute.xlu1 %681  ;;  %2353 = vrot.lane.b32.xlu0 %v3200_v49, %s3245_s8  ;;  %v526_v39 = vsel %vm525_vm6, %v516_v47, %v524_v11 }
 0x16c   : > { %v686_v61 = vrot.slane %v4315_v26, 4 }
 0x16d   : > { %2277 = vrot.lane.b32.xlu1 %v3199_v59, %s3246_s11  ;;  %v527_v48 = vsel %vm359_vm10, %v522_v31, %v523_v20 }
 0x16e   : > { %v600_v2 = vpop.permute.xlu0 %599  ;;  %v528_v41 = vsel %vm525_vm6, %v4265_v45, %v527_v48 }
 0x16f   : > { %v604_v0 = vrot.slane %v600_v2, 4  ;;  %v762_v15 = vpop.permute.xlu1 %761  ;;  %2357 = vrot.lane.b32.xlu0 %v3202_v17, %s3245_s8 }
 0x170   : > { %v767_v51 = vrot.slane %v762_v15, 4 }
 0x171   : > { %v606_v57 = vsel %vm359_vm10, %v603_v18, %v604_v0  ;;  %v609_v9 = vsel %vm359_vm10, %v604_v0, %v605_v35  ;;  %2355 = vrot.lane.b32.xlu1 %v3201_v25, %s3245_s8 }
 0x172   : > { %v610_v50 = vsel %vm4478_vm5, %v600_v2, %v609_v9  ;;  %v680_v4 = vpop.permute.xlu0 %679  ;;  %v608_v40 = vsel %vm4478_vm5, %v4278_v62, %v606_v57  ;;  %vm2787_vm5 = vcmask 719872  }
 0x173   : > { %v3068_v44 = vcombine.low %v528_v41, %v610_v50  ;;  %v3069_v21 = vcombine.high %v528_v41, %v610_v50  ;;  %v766_v36 = vpop.permute.xlu1 %765  ;;  %2435 = vrot.lane.b32.xlu0 %v3204_v1, %s3244_s7  ;;  %v3067_v38 = vcombine.high %v526_v39, %v608_v40  ;;  %v3066_v55 = vcombine.low %v526_v39, %v608_v40 }
 0x174   : > { %v685_v62 = vrot.slane %v680_v4, 4  ;;  %v769_v54 = vrot.slane %v766_v36, 4  ;;  %3119 = vmatprep.mubr.msk.bf16.mxu0 %vm2787_vm5, %v3061_v56  ;;  %3121 = vmatprep.mubr.msk.bf16.mxu1 %vm2787_vm5, %v3061_v56  ;;  %vm4480_vm5 = vcmask 982016  }
 0x175   : > { %2433 = vrot.lane.b32.xlu1 %v3203_v27, %s3244_s7  ;;  %2806 = vmatprep.subr.bf16.mxu0 %v3067_v38 }
 0x176   : > { %2847 = vmatprep.subr.bf16.mxu1 %v3069_v21  ;;  %2807 = vmatpush1.bf16.msra.mxu0 %v3066_v55  ;;  %v684_v45 = vpop.permute.xlu0 %683  ;;  %v688_v30 = vsel %vm359_vm10, %v685_v62, %v686_v61 }
 0x177   : > { %2848 = vmatpush1.bf16.msra.mxu1 %v3068_v44  ;;  %v687_v47 = vrot.slane %v684_v45, 4  ;;  %v846_v60 = vpop.permute.xlu1 %845  ;;  %2508 = vperm.xlu0 %3232, %v2505_v37   ;;  %v690_v34 = vsel %vm647_vm4, %v680_v4, %v688_v30 }
 0x178   : > { %v850_v28 = vrot.slane %v846_v60, 4 }
 0x179   : > { %2437 = vrot.lane.b32.xlu1 %v3205_v42, %s3244_s7  ;;  %v691_v46 = vsel %vm359_vm10, %v686_v61, %v687_v47 }
 0x17a   : > { %v764_v32 = vpop.permute.xlu0 %763  ;;  %v692_v29 = vsel %vm647_vm4, %v4315_v26, %v691_v46 }
 0x17b   : > { %v768_v58 = vrot.slane %v764_v32, 4  ;;  %v926_v23 = vpop.permute.xlu1 %925 }
 0x17c   : > { %v931_v26 = vrot.slane %v926_v23, 4 }
 0x17d   : > { %v770_v49 = vsel %vm359_vm10, %v767_v51, %v768_v58  ;;  %v773_v63 = vsel %vm359_vm10, %v768_v58, %v769_v54 }
 0x17e   : > { %v774_v16 = vsel %vm565_vm3, %v764_v32, %v773_v63  ;;  %v844_v43 = vpop.permute.xlu0 %843  ;;  %v772_v59 = vsel %vm565_vm3, %v762_v15, %v770_v49 }
 0x17f   : > { %v3072_v12 = vcombine.low %v692_v29, %v774_v16  ;;  %v3073_v53 = vcombine.high %v692_v29, %v774_v16  ;;  %v930_v20 = vpop.permute.xlu1 %929  ;;  %v3071_v17 = vcombine.high %v690_v34, %v772_v59  ;;  %v3070_v24 = vcombine.low %v690_v34, %v772_v59 }
 0x180   : > { %v849_v31 = vrot.slane %v844_v43, 4  ;;  %v933_v11 = vrot.slane %v930_v20, 4 }
 0x181   : > { %2808 = vmatprep.subr.bf16.mxu0 %v3071_v17  ;;  %2849 = vmatprep.subr.bf16.mxu1 %v3073_v53 }
 0x182   : > { %2809 = vmatpush1.bf16.msra.mxu0 %v3070_v24  ;;  %2850 = vmatpush1.bf16.msra.mxu1 %v3072_v12  ;;  %v848_v10 = vpop.permute.xlu0 %847  ;;  %v852_v2 = vsel %vm359_vm10, %v849_v31, %v850_v28 }
 0x183   : > { %v851_v25 = vrot.slane %v848_v10, 4  ;;  %v1010_v3 = vpop.permute.xlu1 %1009  ;;  %v854_v1 = vsel %vm483_vm2, %v844_v43, %v852_v2  ;;  %v3005_v43 = vld [vmem:[%s4472_s5 + $0x34] sm:$0xf] }
 0x184   : > { %v1014_v37 = vrot.slane %v1010_v3, 4  ;;  %v1363_v24 = vrot.slane %v3005_v43, %v3313_v6  ;;  %v1367_v10 = vrot.slane %v3005_v43, %v3317_v8 }
 0x185   : > { %v855_v35 = vsel %vm359_vm10, %v850_v28, %v851_v25 }
 0x186   : > { %v928_v18 = vpop.permute.xlu0 %927  ;;  %v856_v57 = vsel %vm483_vm2, %v846_v60, %v855_v35  ;;  %v1371_v35 = vrot.slane %v3005_v43, %v3315_v7 }
 0x187   : > { %v932_v48 = vrot.slane %v928_v18, 4  ;;  %v1090_v0 = vpop.permute.xlu1 %1089 }
 0x188   : > { %v1095_v45 = vrot.slane %v1090_v0, 4 }
 0x189   : > { %v934_v15 = vsel %vm359_vm10, %v931_v26, %v932_v48  ;;  %v937_v14 = vsel %vm359_vm10, %v932_v48, %v933_v11  ;;  %v1380_v11 = vmul.f32 %v1363_v24, %v3693_v52  ;;  %v1375_v48 = vrot.slane %v3005_v43, %v3326_v13 }
 0x18a   : > { %v938_v9 = vsel %vm401_vm1, %v928_v18, %v937_v14  ;;  %v1008_v39 = vpop.permute.xlu0 %1007  ;;  %v936_v41 = vsel %vm401_vm1, %v926_v23, %v934_v15  ;;  %v1381_v15 = vmul.f32 %v1367_v10, %v3715_v19 }
 0x18b   : > { %v3076_v50 = vcombine.low %v856_v57, %v938_v9  ;;  %v3077_v4 = vcombine.high %v856_v57, %v938_v9  ;;  %v1094_v40 = vpop.permute.xlu1 %1093  ;;  %v3075_v27 = vcombine.high %v854_v1, %v936_v41  ;;  %v3074_v44 = vcombine.low %v854_v1, %v936_v41 }
 0x18c   : > { %v1013_v36 = vrot.slane %v1008_v39, 4  ;;  %v1097_v47 = vrot.slane %v1094_v40, 4  ;;  %v1382_v40 = vmul.f32 %v1371_v35, %v3717_v22  ;;  %v1383_v19 = vmul.f32 %v1375_v48, %v3707_v5 }
 0x18d   : > { %2810 = vmatprep.subr.bf16.mxu0 %v3075_v27  ;;  %2851 = vmatprep.subr.bf16.mxu1 %v3077_v4  ;;  %v3165_v27 = vpack.c.bf16 %v1381_v15, %v1380_v11 }
 0x18e   : > { %2811 = vmatpush1.bf16.msra.mxu0 %v3074_v44  ;;  %2852 = vmatpush1.bf16.msra.mxu1 %v3076_v50  ;;  %v1012_v21 = vpop.permute.xlu0 %1011  ;;  %v1016_v62 = vsel %vm359_vm10, %v1013_v36, %v1014_v37  ;;  %v3166_v22 = vpack.c.bf16 %v1383_v19, %v1382_v40 }
 0x18f   : > { %v1015_v38 = vrot.slane %v1012_v21, 4  ;;  %v1174_v55 = vpop.permute.xlu1 %1173  ;;  %v1018_v30 = vsel %vm318_vm0, %v1008_v39, %v1016_v62 }
 0x190   : > { %v1178_v17 = vrot.slane %v1174_v55, 4 }
 0x191   : > { %v1019_v60 = vsel %vm359_vm10, %v1014_v37, %v1015_v38 }
 0x192   : > { %v1092_v42 = vpop.permute.xlu0 %1091  ;;  %v1020_v46 = vsel %vm318_vm0, %v1010_v3, %v1019_v60 }
 0x193   : > { %v1096_v61 = vrot.slane %v1092_v42, 4  ;;  %v1254_v51 = vpop.permute.xlu1 %1253 }
 0x194   : > { %v1259_v3 = vrot.slane %v1254_v51, 4 }
 0x195   : > { %v1098_v54 = vsel %vm359_vm10, %v1095_v45, %v1096_v61  ;;  %v1101_v32 = vsel %vm359_vm10, %v1096_v61, %v1097_v47 }
 0x196   : > { %v1102_v58 = vsel %vm1099_vm9, %v1092_v42, %v1101_v32  ;;  %v1172_v23 = vpop.permute.xlu0 %1171  ;;  %v1100_v56 = vsel %vm1099_vm9, %v1090_v0, %v1098_v54  ;;  %vm4481_vm9 = vcmask 973824  }
 0x197   : > { %v3080_v49 = vcombine.low %v1020_v46, %v1102_v58  ;;  %v3081_v63 = vcombine.high %v1020_v46, %v1102_v58  ;;  %v1258_v34 = vpop.permute.xlu1 %1257  ;;  %v3079_v29 = vcombine.high %v1018_v30, %v1100_v56  ;;  %v3078_v16 = vcombine.low %v1018_v30, %v1100_v56 }
 0x198   : > { %v1177_v59 = vrot.slane %v1172_v23, 4  ;;  %v1261_v28 = vrot.slane %v1258_v34, 4 }
 0x199   : > { %2812 = vmatprep.subr.bf16.mxu0 %v3079_v29  ;;  %2853 = vmatprep.subr.bf16.mxu1 %v3081_v63 }
 0x19a   : > { %2813 = vmatpush1.bf16.msra.mxu0 %v3078_v16  ;;  %2854 = vmatpush1.bf16.msra.mxu1 %v3080_v49  ;;  %v1176_v12 = vpop.permute.xlu0 %1175  ;;  %v1180_v31 = vsel %vm359_vm10, %v1177_v59, %v1178_v17 }
 0x19b   : > { %v1179_v53 = vrot.slane %v1176_v12, 4  ;;  %v1338_v20 = vpop.permute.xlu1 %1337  ;;  %v1182_v0 = vsel %vm1181_vm15, %v1172_v23, %v1180_v31 }
 0x19c   : > { %v1342_v14 = vrot.slane %v1338_v20, 4 }
 0x19d   : > { %v1183_v26 = vsel %vm359_vm10, %v1178_v17, %v1179_v53 }
 0x19e   : > { %v1256_v25 = vpop.permute.xlu0 %1255  ;;  %v1184_v1 = vsel %vm1181_vm15, %v1174_v55, %v1183_v26 }
 0x19f   : > { %v1260_v18 = vrot.slane %v1256_v25, 4  ;;  %v1467_v2 = vpop.permute.xlu1 %1466 }
 0x1a0   : > { %v1472_v54 = vrot.slane %v1467_v2, 4 }
 0x1a1   : > { %v1262_v6 = vsel %vm359_vm10, %v1259_v3, %v1260_v18  ;;  %v1265_v8 = vsel %vm359_vm10, %v1260_v18, %v1261_v28 }
 0x1a2   : > { %v1266_v57 = vsel %vm1263_vm14, %v1256_v25, %v1265_v8  ;;  %v1336_v9 = vpop.permute.xlu0 %1335  ;;  %v1264_v52 = vsel %vm1263_vm14, %v1254_v51, %v1262_v6 }
 0x1a3   : > { %v3084_v39 = vcombine.low %v1184_v1, %v1266_v57  ;;  %v3085_v7 = vcombine.high %v1184_v1, %v1266_v57  ;;  %v1341_v41 = vrot.slane %v1336_v9, 4  ;;  %v1471_v13 = vpop.permute.xlu1 %1470  ;;  %v3083_v50 = vcombine.high %v1182_v0, %v1264_v52 }
 0x1a4   : > { %v3082_v4 = vcombine.low %v1182_v0, %v1264_v52  ;;  %v1474_v56 = vrot.slane %v1471_v13, 4 }
 0x1a5   : > { %v1344_v44 = vsel %vm359_vm10, %v1341_v41, %v1342_v14  ;;  %2814 = vmatprep.subr.bf16.mxu0 %v3083_v50  ;;  %2855 = vmatprep.subr.bf16.mxu1 %v3085_v7 }
 0x1a6   : > { %v1346_v21 = vsel %vm1345_vm13, %v1336_v9, %v1344_v44  ;;  %2815 = vmatpush1.bf16.msra.mxu0 %v3082_v4  ;;  %2856 = vmatpush1.bf16.msra.mxu1 %v3084_v39  ;;  %v1340_v36 = vpop.permute.xlu0 %1339 }
 0x1a7   : > { %v3086_v38 = vcombine.low %v1346_v21, %v3165_v27  ;;  %v3087_v55 = vcombine.high %v1346_v21, %v3165_v27  ;;  %v1343_v37 = vrot.slane %v1340_v36, 4  ;;  %v1551_v45 = vpop.permute.xlu1 %1550 }
 0x1a8   : > { %v1555_v30 = vrot.slane %v1551_v45, 4 }
 0x1a9   : > { %v1347_v42 = vsel %vm359_vm10, %v1342_v14, %v1343_v37  ;;  %2816 = vmatprep.subr.bf16.mxu0 %v3087_v55 }
 0x1aa   : > { %2817 = vmatpush1.bf16.msra.mxu0 %v3086_v38  ;;  %v1469_v62 = vpop.permute.xlu0 %1468  ;;  %v1348_v47 = vsel %vm1345_vm13, %v1338_v20, %v1347_v42 }
 0x1ab   : > { %v1473_v60 = vrot.slane %v1469_v62, 4  ;;  %v1631_v61 = vpop.permute.xlu1 %1630  ;;  %v3089_v5 = vcombine.high %v1348_v47, %v3166_v22  ;;  %v3088_v51 = vcombine.low %v1348_v47, %v3166_v22 }
 0x1ac   : > { %v1636_v26 = vrot.slane %v1631_v61, 4 }
 0x1ad   : > { %2857 = vmatprep.subr.bf16.mxu1 %v3089_v5  ;;  %v1475_v46 = vsel %vm359_vm10, %v1472_v54, %v1473_v60  ;;  %v1478_v16 = vsel %vm359_vm10, %v1473_v60, %v1474_v56 }
 0x1ae   : > { %2858 = vmatpush1.bf16.msra.mxu1 %v3088_v51  ;;  %v1549_v32 = vpop.permute.xlu0 %1548  ;;  %v1477_v63 = vsel %vm1303_vm12, %v1467_v2, %v1475_v46  ;;  %v1479_v17 = vsel %vm1303_vm12, %v1469_v62, %v1478_v16  ;;  %vm4483_vm12 = vmmov %vm4481_vm9 }
 0x1af   : > { %v1554_v58 = vrot.slane %v1549_v32, 4  ;;  %v1635_v23 = vpop.permute.xlu1 %1634 }
 0x1b0   : > { %v1638_v0 = vrot.slane %v1635_v23, 4 }
 0x1b1   : > { %v1557_v49 = vsel %vm359_vm10, %v1554_v58, %v1555_v30 }
 0x1b2   : > { %v1559_v34 = vsel %vm1221_vm11, %v1549_v32, %v1557_v49  ;;  %v1553_v29 = vpop.permute.xlu0 %1552 }
 0x1b3   : > { %v3090_v43 = vcombine.low %v1477_v63, %v1559_v34  ;;  %v3091_v59 = vcombine.high %v1477_v63, %v1559_v34  ;;  %v1556_v12 = vrot.slane %v1553_v29, 4  ;;  %v1715_v53 = vpop.permute.xlu1 %1714 }
 0x1b4   : > { %v1719_v2 = vrot.slane %v1715_v53, 4 }
 0x1b5   : > { %v1560_v20 = vsel %vm359_vm10, %v1555_v30, %v1556_v12  ;;  %2818 = vmatprep.subr.bf16.mxu0 %v3091_v59 }
 0x1b6   : > { %2819 = vmatpush1.bf16.msra.mxu0 %v3090_v43  ;;  %v1633_v24 = vpop.permute.xlu0 %1632  ;;  %v1561_v10 = vsel %vm1221_vm11, %v1551_v45, %v1560_v20  ;;  %vm4482_vm11 = vmmov %vm4480_vm5 }
 0x1b7   : > { %v1637_v31 = vrot.slane %v1633_v24, 4  ;;  %v1794_v25 = vpop.permute.xlu1 %1793  ;;  %v3093_v3 = vcombine.high %v1479_v17, %v1561_v10  ;;  %v3092_v28 = vcombine.low %v1479_v17, %v1561_v10 }
 0x1b8   : > { %v1799_v19 = vrot.slane %v1794_v25, 4 }
 0x1b9   : > { %2859 = vmatprep.subr.bf16.mxu1 %v3093_v3  ;;  %v1639_v11 = vsel %vm359_vm10, %v1636_v26, %v1637_v31  ;;  %v1642_v1 = vsel %vm359_vm10, %v1637_v31, %v1638_v0 }
 0x1ba   : > { %2860 = vmatpush1.bf16.msra.mxu1 %v3092_v28  ;;  %v1713_v18 = vpop.permute.xlu0 %1712  ;;  %v1641_v8 = vsel %vm4480_vm5, %v1631_v61, %v1639_v11  ;;  %v1643_v41 = vsel %vm4482_vm11, %v1633_v24, %v1642_v1 }
 0x1bb   : > { %v1718_v35 = vrot.slane %v1713_v18, 4  ;;  %v1798_v48 = vpop.permute.xlu1 %1797 }
 0x1bc   : > { %v1801_v45 = vrot.slane %v1798_v48, 4 }
 0x1bd   : > { %v1721_v6 = vsel %vm359_vm10, %v1718_v35, %v1719_v2 }
 0x1be   : > { %v1723_v15 = vsel %vm4481_vm9, %v1713_v18, %v1721_v6  ;;  %v1717_v14 = vpop.permute.xlu0 %1716 }
 0x1bf   : > { %v3094_v57 = vcombine.low %v1641_v8, %v1723_v15  ;;  %v3095_v9 = vcombine.high %v1641_v8, %v1723_v15  ;;  %v1720_v52 = vrot.slane %v1717_v14, 4  ;;  %v1876_v39 = vpop.permute.xlu1 %1875 }
 0x1c0   : > { %v1880_v36 = vrot.slane %v1876_v39, 4 }
 0x1c1   : > { %v1724_v7 = vsel %vm359_vm10, %v1719_v2, %v1720_v52  ;;  %2820 = vmatprep.subr.bf16.mxu0 %v3095_v9 }
 0x1c2   : > { %2821 = vmatpush1.bf16.msra.mxu0 %v3094_v57  ;;  %v1796_v13 = vpop.permute.xlu0 %1795  ;;  %v1725_v50 = vsel %vm4483_vm12, %v1715_v53, %v1724_v7 }
 0x1c3   : > { %v1800_v4 = vrot.slane %v1796_v13, 4  ;;  %v1954_v40 = vpop.permute.xlu1 %1953  ;;  %v3097_v27 = vcombine.high %v1643_v41, %v1725_v50  ;;  %v3096_v44 = vcombine.low %v1643_v41, %v1725_v50 }
 0x1c4   : > { %v1959_v34 = vrot.slane %v1954_v40, 4 }
 0x1c5   : > { %2861 = vmatprep.subr.bf16.mxu1 %v3097_v27  ;;  %v1802_v38 = vsel %vm359_vm10, %v1799_v19, %v1800_v4  ;;  %v1804_v60 = vsel %vm359_vm10, %v1800_v4, %v1801_v45 }
 0x1c6   : > { %2862 = vmatpush1.bf16.msra.mxu1 %v3096_v44  ;;  %v1874_v21 = vpop.permute.xlu0 %1873  ;;  %v1803_v22 = vsel %vm361_vm8, %v1794_v25, %v1802_v38  ;;  %v1805_v30 = vsel %vm361_vm8, %v1796_v13, %v1804_v60  ;;  %vm4484_vm8 = vcmask 531456  }
 0x1c7   : > { %v1879_v55 = vrot.slane %v1874_v21, 4  ;;  %v1958_v37 = vpop.permute.xlu1 %1957 }
 0x1c8   : > { %v1961_v53 = vrot.slane %v1958_v37, 4 }
 0x1c9   : > { %v1882_v42 = vsel %vm359_vm10, %v1879_v55, %v1880_v36 }
 0x1ca   : > { %v1883_v62 = vsel %vm443_vm7, %v1874_v21, %v1882_v42  ;;  %v1878_v47 = vpop.permute.xlu0 %1877 }
 0x1cb   : > { %v3098_v61 = vcombine.low %v1803_v22, %v1883_v62  ;;  %v3099_v5 = vcombine.high %v1803_v22, %v1883_v62  ;;  %v1881_v51 = vrot.slane %v1878_v47, 4  ;;  %v2036_v54 = vpop.permute.xlu1 %2035 }
 0x1cc   : > { %v2040_v16 = vrot.slane %v2036_v54, 4 }
 0x1cd   : > { %v1884_v32 = vsel %vm359_vm10, %v1880_v36, %v1881_v51  ;;  %2822 = vmatprep.subr.bf16.mxu0 %v3099_v5 }
 0x1ce   : > { %2823 = vmatpush1.bf16.msra.mxu0 %v3098_v61  ;;  %v1956_v46 = vpop.permute.xlu0 %1955  ;;  %v1885_v58 = vsel %vm443_vm7, %v1876_v39, %v1884_v32  ;;  %vm4485_vm7 = vmmov %vm4484_vm8 }
 0x1cf   : > { %v1960_v23 = vrot.slane %v1956_v46, 4  ;;  %v2114_v56 = vpop.permute.xlu1 %2113  ;;  %v3101_v49 = vcombine.high %v1805_v30, %v1885_v58  ;;  %v3100_v63 = vcombine.low %v1805_v30, %v1885_v58 }
 0x1d0   : > { %v2119_v15 = vrot.slane %v2114_v56, 4 }
 0x1d1   : > { %2863 = vmatprep.subr.bf16.mxu1 %v3101_v49  ;;  %v1962_v43 = vsel %vm359_vm10, %v1959_v34, %v1960_v23  ;;  %v1964_v31 = vsel %vm359_vm10, %v1960_v23, %v1961_v53 }
 0x1d2   : > { %2864 = vmatpush1.bf16.msra.mxu1 %v3100_v63  ;;  %v2034_v29 = vpop.permute.xlu0 %2033  ;;  %v1963_v17 = vsel %vm525_vm6, %v1954_v40, %v1962_v43  ;;  %v1965_v2 = vsel %vm525_vm6, %v1956_v46, %v1964_v31 }
 0x1d3   : > { %v2039_v59 = vrot.slane %v2034_v29, 4  ;;  %v2118_v12 = vpop.permute.xlu1 %2117 }
 0x1d4   : > { %v2121_v39 = vrot.slane %v2118_v12, 4 }
 0x1d5   : > { %v2042_v20 = vsel %vm359_vm10, %v2039_v59, %v2040_v16 }
 0x1d6   : > { %v2043_v24 = vsel %vm4484_vm8, %v2034_v29, %v2042_v20  ;;  %v2038_v10 = vpop.permute.xlu0 %2037 }
 0x1d7   : > { %v3102_v25 = vcombine.low %v1963_v17, %v2043_v24  ;;  %v3103_v3 = vcombine.high %v1963_v17, %v2043_v24  ;;  %v2041_v28 = vrot.slane %v2038_v10, 4  ;;  %v2196_v26 = vpop.permute.xlu1 %2195 }
 0x1d8   : > { %v2200_v1 = vrot.slane %v2196_v26, 4 }
 0x1d9   : > { %v2044_v18 = vsel %vm359_vm10, %v2040_v16, %v2041_v28  ;;  %2824 = vmatprep.subr.bf16.mxu0 %v3103_v3 }
 0x1da   : > { %2825 = vmatpush1.bf16.msra.mxu0 %v3102_v25  ;;  %v2116_v11 = vpop.permute.xlu0 %2115  ;;  %v2045_v35 = vsel %vm4485_vm7, %v2036_v54, %v2044_v18 }
 0x1db   : > { %v2120_v48 = vrot.slane %v2116_v11, 4  ;;  %v2274_v0 = vpop.permute.xlu1 %2273  ;;  %v3105_v6 = vcombine.high %v1965_v2, %v2045_v35  ;;  %v3104_v8 = vcombine.low %v1965_v2, %v2045_v35  ;;  %v3060_v35 = vcombine.low %v4349_v33, %v4349_v33 }
 0x1dc   : > { %v2279_v22 = vrot.slane %v2274_v0, 4 }
 0x1dd   : > { %2865 = vmatprep.subr.bf16.mxu1 %v3105_v6  ;;  %v2122_v57 = vsel %vm359_vm10, %v2119_v15, %v2120_v48  ;;  %v2124_v4 = vsel %vm359_vm10, %v2120_v48, %v2121_v39 }
 0x1de   : > { %2866 = vmatpush1.bf16.msra.mxu1 %v3104_v8  ;;  %v2194_v14 = vpop.permute.xlu0 %2193  ;;  %v2123_v41 = vsel %vm647_vm4, %v2114_v56, %v2122_v57  ;;  %v2125_v36 = vsel %vm647_vm4, %v2116_v11, %v2124_v4 }
 0x1df   : > { %v2199_v9 = vrot.slane %v2194_v14, 4  ;;  %v2278_v52 = vpop.permute.xlu1 %2277 }
 0x1e0   : > { %v2281_v51 = vrot.slane %v2278_v52, 4 }
 0x1e1   : > { %v2202_v7 = vsel %vm359_vm10, %v2199_v9, %v2200_v1 }
 0x1e2   : > { %v2203_v13 = vsel %vm565_vm3, %v2194_v14, %v2202_v7  ;;  %v2198_v50 = vpop.permute.xlu0 %2197 }
 0x1e3   : > { %v3106_v40 = vcombine.low %v2123_v41, %v2203_v13  ;;  %v3107_v27 = vcombine.high %v2123_v41, %v2203_v13  ;;  %v2201_v44 = vrot.slane %v2198_v50, 4  ;;  %v2356_v19 = vpop.permute.xlu1 %2355 }
 0x1e4   : > { %v2360_v60 = vrot.slane %v2356_v19, 4 }
 0x1e5   : > { %v2204_v21 = vsel %vm359_vm10, %v2200_v1, %v2201_v44  ;;  %2826 = vmatprep.subr.bf16.mxu0 %v3107_v27 }
 0x1e6   : > { %2827 = vmatpush1.bf16.msra.mxu0 %v3106_v40  ;;  %v2276_v38 = vpop.permute.xlu0 %2275  ;;  %v2205_v55 = vsel %vm565_vm3, %v2196_v26, %v2204_v21 }
 0x1e7   : > { %v2280_v37 = vrot.slane %v2276_v38, 4  ;;  %v3109_v45 = vcombine.high %v2125_v36, %v2205_v55  ;;  %v3108_v42 = vcombine.low %v2125_v36, %v2205_v55  ;;  %v2434_v62 = vpop.permute.xlu1 %2433 }
 0x1e8   : > { %v2439_v16 = vrot.slane %v2434_v62, 4 }
 0x1e9   : > { %2867 = vmatprep.subr.bf16.mxu1 %v3109_v45  ;;  %v2282_v61 = vsel %vm359_vm10, %v2279_v22, %v2280_v37  ;;  %v2284_v58 = vsel %vm359_vm10, %v2280_v37, %v2281_v51 }
 0x1ea   : > { %2868 = vmatpush1.bf16.msra.mxu1 %v3108_v42  ;;  %v2354_v47 = vpop.permute.xlu0 %2353  ;;  %v2283_v32 = vsel %vm483_vm2, %v2274_v0, %v2282_v61  ;;  %v2285_v29 = vsel %vm483_vm2, %v2276_v38, %v2284_v58 }
 0x1eb   : > { %v2359_v5 = vrot.slane %v2354_v47, 4  ;;  %v2438_v63 = vpop.permute.xlu1 %2437 }
 0x1ec   : > { %v2441_v12 = vrot.slane %v2438_v63, 4 }
 0x1ed   : > { %v2362_v54 = vsel %vm359_vm10, %v2359_v5, %v2360_v60 }
 0x1ee   : > { %v2363_v30 = vsel %vm401_vm1, %v2354_v47, %v2362_v54  ;;  %v2358_v46 = vpop.permute.xlu0 %2357 }
 0x1ef   : > { %v3110_v23 = vcombine.low %v2283_v32, %v2363_v30  ;;  %v3111_v56 = vcombine.high %v2283_v32, %v2363_v30  ;;  %v2361_v49 = vrot.slane %v2358_v46, 4 }
 0x1f1   : > { %v2364_v34 = vsel %vm359_vm10, %v2360_v60, %v2361_v49  ;;  %2828 = vmatprep.subr.bf16.mxu0 %v3111_v56 }
 0x1f2   : > { %2829 = vmatpush1.bf16.msra.mxu0 %v3110_v23  ;;  %v2436_v43 = vpop.permute.xlu0 %2435  ;;  %v2365_v59 = vsel %vm401_vm1, %v2356_v19, %v2364_v34 }
 0x1f3   : > { %v2440_v53 = vrot.slane %v2436_v43, 4  ;;  %v3113_v20 = vcombine.high %v2285_v29, %v2365_v59  ;;  %v3112_v17 = vcombine.low %v2285_v29, %v2365_v59 }
 0x1f5   : > { %v2442_v24 = vsel %vm359_vm10, %v2439_v16, %v2440_v53  ;;  %v2444_v10 = vsel %vm359_vm10, %v2440_v53, %v2441_v12  ;;  %2869 = vmatprep.subr.bf16.mxu1 %v3113_v20 }
 0x1f6   : > { %v2445_v31 = vsel %vm318_vm0, %v2436_v43, %v2444_v10  ;;  %2870 = vmatpush1.bf16.msra.mxu1 %v3112_v17  ;;  %v2443_v25 = vsel %vm318_vm0, %v2434_v62, %v2442_v24  ;;  %v2509_v48 = vpop.permute.xlu0 %2508 }
 0x1f7   : > { %v3116_v3 = vcombine.low %v2445_v31, %v2445_v31  ;;  %v3117_v28 = vcombine.high %v2445_v31, %v2445_v31  ;;  %v3115_v26 = vcombine.high %v2443_v25, %v2443_v25  ;;  %v3114_v18 = vcombine.low %v2443_v25, %v2443_v25 }
 0x1f9   : > { %3118 = vmatprep.subr.msk.bf16.mxu0 %vm359_vm10, %v3115_v26  ;;  %3120 = vmatprep.subr.msk.bf16.mxu1 %vm359_vm10, %v3117_v28  ;;  %v2793_v2 = vsel %vm359_vm10, %v3114_v18, 0  ;;  %v2799_v11 = vsel %vm359_vm10, %v3116_v3, 0 }
 0x1fa   : > { %2831 = vmatpush1.bf16.msra.mxu0 %v2793_v2  ;;  %2872 = vmatpush1.bf16.msra.mxu1 %v2799_v11 }
 0x1fd   : > { %2837 = vmatmul.mubr.bf16.vlgmr.msra.gmra.mrb[0].mxu0 %v3060_v35  ;;  %2878 = vmatmul.mubr.bf16.vlgmr.msra.gmra.mrb[0].mxu1 %v3060_v35 }
 0x2d0   : > { %v2838_v0 = vpop.f32.mrb[0].mxu0  ;;  %v2879_v6 = vpop.f32.mrb[0].mxu1 }
 0x2d1   : > { %v2839_v8 = vadd.f32 %v2838_v0, %v2509_v48  ;;  %v2880_v15 = vadd.f32 %v2879_v6, %v2509_v48  ;;  %v2840_v14 = vpop.f32.mrb[1].mxu0  ;;  %v2881_v1 = vpop.f32.mrb[1].mxu1 }
 0x2d2   : > { %v2841_v57 = vadd.f32 %v2840_v14, %v2509_v48  ;;  %v2882_v9 = vadd.f32 %v2881_v1, %v2509_v48  ;;  %v2842_v52 = vpop.f32.mrb[2].mxu0  ;;  %v2883_v33 = vpop.f32.mrb[2].mxu1 }
 0x2d3   : > { %2886 = vst [vmem:[%s251_s9] sm:$0xff] %v2839_v8  ;;  %2888 = vst [vmem:[%s251_s9 + $0x10] sm:$0xff] %v2880_v15  ;;  %v2843_v39 = vpop.f32.mrb[3].mxu0  ;;  %v2884_v7 = vpop.f32.mrb[3].mxu1 }
 0x2d4   : > { %2887 = vst [vmem:[%s251_s9 + $0x8] sm:$0xff] %v2841_v57  ;;  %2889 = vst [vmem:[%s251_s9 + $0x18] sm:$0xff] %v2882_v9 }
 0x2d5 PF: > { %s16_s21 = sadd.s32 1, %s3241_s21  }
 0x2d6   : > { %p13_p4 = scmp.ge.s32.totalorder %s16_s21, 4  }
 0x2d8   :  { %15 = sbr.rel (!%p13_p4) target bundleno = 1 (0x1), region = 100 }

// kernel: dense_block_forward.3
= control target key start
LH: loop header
LB: loop body
LE: loop exit
PB: predicated region body
PF: predicated region fallthrough
CT: control target
= control target key end

     0   :  { %s3169_s21 = smov 0   ;;  %s4478_s0 = inlined_call_operand.vmem [shape: f32[2,16,512], index: 0, kind: input, shape index: {}]   ;;  %s4479_s1 = inlined_call_operand.vmem [shape: f32[16,1], index: 1, kind: input, shape index: {}]   ;;  %s4480_s2 = inlined_call_operand.vmem [shape: f32[16,1], index: 2, kind: input, shape index: {}]   ;;  %s4481_s3 = inlined_call_operand.vmem [shape: bf16[8,432], index: 3, kind: input, shape index: {}]   ;;  %s4482_s4 = inlined_call_operand.vmem [shape: f32[8,1], index: 4, kind: input, shape index: {}]   ;;  %s4483_s5 = inlined_call_operand.vmem [shape: f32[27,1,512], index: 5, kind: input, shape index: {}]   ;;  %s4484_s6 = inlined_call_operand.vmem [shape: f32[2,8,512], index: 6, kind: output, shape index: {}]  }
   0x1 LB: > { %s3019_s22 = sadd.s32 4294967295, %s3114_s21   ;;  %p3023_p0 = scmp.ge.s32.totalorder %s3114_s21, 1  ;;  %s3114_s21 = sphi %s3169_s21, %s16_s21  }
   0x2   : > { %p212_p1 = scmp.lt.s32.totalorder %s3114_s21, 3 }
   0x4   : > { %p213_p2 = pnand %p3023_p0, %p212_p1 }
   0x5   : > { %v285_v0 = vld [vmem:[%s4480_s2] sm:$0xff] (!%p213_p2)  ;;  %v333_v2 = vlaneseq (!%p213_p2)  ;;  %v3116_v3 = vmov (!%p213_p2), 0   ;;  %v286_v5 = vld [vmem:[%s4480_s2 + $0x8] sm:$0xff] (!%p213_p2)  ;;  %s3117_s9 = smov (!%p213_p2), 55   ;;  %s3118_s12 = smov (!%p213_p2), 56   ;;  %vm357_vm0 = vcmask (!%p213_p2), 449536  }
   0x6   : > { %216 = sbr.rel (%p213_p2) target bundleno = 838 (0x346), region = 44  ;;  %v265_v1 = vld [vmem:[%s4479_s1] sm:$0xff] (!%p213_p2)  ;;  %3103 = vset.pattern.permute.xlu1 (!%p213_p2), %v3116_v3  ;;  %3102 = vset.pattern.permute.xlu0 (!%p213_p2), %v3116_v3  ;;  %v266_v6 = vld [vmem:[%s4479_s1 + $0x8] sm:$0xff] (!%p213_p2)  ;;  %s3119_s15 = smov (!%p213_p2), 57   ;;  %v3031_v31 = vld [vmem:[%s4483_s5 + $0x10] sm:$0xf] (!%p213_p2) }
   0x7   : > { %289 = vperm.xlu1 (!%p213_p2), %3103, %v285_v0   ;;  %269 = vperm.xlu0 (!%p213_p2), %3102, %v265_v1   ;;  %v334_v4 = vshrl.u32 (!%p213_p2), %v333_v2, 7  ;;  %v331_v7 = vld [vmem:[%s4483_s5] sm:$0xf] (!%p213_p2)  ;;  %v3028_v16 = vld [vmem:[%s4483_s5 + $0x4] sm:$0xf] (!%p213_p2)  ;;  %s3120_s18 = smov (!%p213_p2), 63  }
   0x8   : > { %v3029_v21 = vld [vmem:[%s4483_s5 + $0x8] sm:$0xf] (!%p213_p2)  ;;  %v3030_v26 = vld [vmem:[%s4483_s5 + $0xc] sm:$0xf] (!%p213_p2)  ;;  %s3121_s23 = smov (!%p213_p2), 64   ;;  %s3122_s26 = smov (!%p213_p2), 65  }
   0x9   : > { %v3192_v8 = vsub.s32 (!%p213_p2), 1, %v334_v4  ;;  %v3194_v9 = vsub.s32 (!%p213_p2), 0, %v334_v4  ;;  %v3198_v12 = vsub.s32 (!%p213_p2), 3, %v334_v4  ;;  %v3200_v13 = vsub.s32 (!%p213_p2), 2, %v334_v4  ;;  %v3032_v36 = vld [vmem:[%s4483_s5 + $0x14] sm:$0xf] (!%p213_p2) }
   0xa   : > { %v3033_v41 = vld [vmem:[%s4483_s5 + $0x18] sm:$0xf] (!%p213_p2)  ;;  %s3123_s29 = smov (!%p213_p2), 71   ;;  %v3034_v46 = vld [vmem:[%s4483_s5 + $0x1c] sm:$0xf] (!%p213_p2)  ;;  %s3124_s8 = smov (!%p213_p2), 72  }
   0xb   : > { %294 = vperm.xlu1 (!%p213_p2), %3103, %v286_v5   ;;  %274 = vperm.xlu0 (!%p213_p2), %3102, %v266_v6   ;;  %v340_v10 = vrot.slane (!%p213_p2), %v331_v7, %v3192_v8  ;;  %v336_v11 = vrot.slane (!%p213_p2), %v331_v7, %v3194_v9  ;;  %v348_v14 = vrot.slane (!%p213_p2), %v331_v7, %v3198_v12  ;;  %v3035_v51 = vld [vmem:[%s4483_s5 + $0x20] sm:$0xf] (!%p213_p2)  ;;  %s3125_s13 = smov (!%p213_p2), 73   ;;  %v3036_v56 = vld [vmem:[%s4483_s5 + $0x24] sm:$0xf] (!%p213_p2)  ;;  %s3126_s17 = smov (!%p213_p2), 119  }
   0xc   : > { %v344_v15 = vrot.slane (!%p213_p2), %v331_v7, %v3200_v13  ;;  %v425_v17 = vrot.slane (!%p213_p2), %v3028_v16, %v3194_v9  ;;  %v429_v18 = vrot.slane (!%p213_p2), %v3028_v16, %v3192_v8  ;;  %v433_v19 = vrot.slane (!%p213_p2), %v3028_v16, %v3200_v13  ;;  %v3037_v61 = vld [vmem:[%s4483_s5 + $0x28] sm:$0xf] (!%p213_p2)  ;;  %s3127_s24 = smov (!%p213_p2), 120   ;;  %v3038_v2 = vld [vmem:[%s4483_s5 + $0x2c] sm:$0xf] (!%p213_p2)  ;;  %s3128_s28 = smov (!%p213_p2), 121  }
   0xd   : > { %v437_v20 = vrot.slane %v3028_v16, %v3198_v12  ;;  %v518_v22 = vrot.slane %v3029_v21, %v3192_v8  ;;  %v514_v23 = vrot.slane %v3029_v21, %v3194_v9  ;;  %v526_v24 = vrot.slane %v3029_v21, %v3198_v12  ;;  %v3039_v7 = vld [vmem:[%s4483_s5 + $0x30] sm:$0xf]  ;;  %s3129_s10 = smov 127   ;;  %v3041_v16 = vld [vmem:[%s4483_s5 + $0x38] sm:$0xf]  ;;  %s3130_s16 = smov 1  }
   0xe   : > { %v522_v25 = vrot.slane %v3029_v21, %v3200_v13  ;;  %v607_v27 = vrot.slane %v3030_v26, %v3192_v8  ;;  %v603_v28 = vrot.slane %v3030_v26, %v3194_v9  ;;  %v615_v29 = vrot.slane %v3030_v26, %v3198_v12  ;;  %v3352_v21 = vld [vmem:[%s4483_s5 + $0x3c] sm:$0xf]  ;;  %p242_p3 = scmp.lt.s32.totalorder %s3019_s22, 1  ;;  %s3131_s25 = smov 7  }
   0xf   : > { %351 = vrot.lane.b32.xlu1 %v340_v10, %s3117_s9  ;;  %349 = vrot.lane.b32.xlu0 %v336_v11, %s3117_s9  ;;  %v611_v30 = vrot.slane %v3030_v26, %v3200_v13  ;;  %v696_v32 = vrot.slane %v3031_v31, %v3192_v8  ;;  %v692_v33 = vrot.slane %v3031_v31, %v3194_v9  ;;  %vm446_vm1 = vcmask 457728   ;;  %s3132_s20 = smov 8   ;;  %s3133_s7 = smov 9  }
  0x10   : > { %v704_v34 = vrot.slane %v3031_v31, %v3198_v12  ;;  %v700_v35 = vrot.slane %v3031_v31, %v3200_v13  ;;  %v785_v37 = vrot.slane %v3032_v36, %v3192_v8  ;;  %v781_v38 = vrot.slane %v3032_v36, %v3194_v9  ;;  %s4491_s22 = smov (!%p242_p3, %s3019_s22), 1 }
  0x11   : > { %v793_v39 = vrot.slane %v3032_v36, %v3198_v12  ;;  %v789_v40 = vrot.slane %v3032_v36, %v3200_v13  ;;  %v874_v42 = vrot.slane %v3033_v41, %v3192_v8  ;;  %v870_v43 = vrot.slane %v3033_v41, %v3194_v9  ;;  %s3062_s27 = sshll.u32 %s4491_s22, 6 }
  0x12   : > { %v882_v44 = vrot.slane %v3033_v41, %v3198_v12  ;;  %v878_v45 = vrot.slane %v3033_v41, %v3200_v13  ;;  %v963_v47 = vrot.slane %v3034_v46, %v3192_v8  ;;  %v959_v48 = vrot.slane %v3034_v46, %v3194_v9  ;;  %s246_s11 = scalar_lea.vmem %s4478_s0, %s3062_s27 }
  0x13   : > { %355 = vrot.lane.b32.xlu1 %v348_v14, %s3117_s9  ;;  %353 = vrot.lane.b32.xlu0 %v344_v15, %s3117_s9  ;;  %v971_v49 = vrot.slane %v3034_v46, %v3198_v12  ;;  %v967_v50 = vrot.slane %v3034_v46, %v3200_v13  ;;  %v1052_v52 = vrot.slane %v3035_v51, %v3192_v8  ;;  %v258_v26 = vld [vmem:[%s246_s11 + $0x8] sm:$0xff]  ;;  %vm535_vm2 = vcmask 465920  }
  0x14   : > { %v1048_v53 = vrot.slane %v3035_v51, %v3194_v9  ;;  %v1060_v54 = vrot.slane %v3035_v51, %v3198_v12  ;;  %v1056_v55 = vrot.slane %v3035_v51, %v3200_v13  ;;  %v1141_v57 = vrot.slane %v3036_v56, %v3192_v8 }
  0x15   : > { %v1137_v58 = vrot.slane %v3036_v56, %v3194_v9  ;;  %v1149_v59 = vrot.slane %v3036_v56, %v3198_v12  ;;  %v1145_v60 = vrot.slane %v3036_v56, %v3200_v13  ;;  %v1230_v62 = vrot.slane %v3037_v61, %v3192_v8 }
  0x16   : > { %v1226_v63 = vrot.slane %v3037_v61, %v3194_v9  ;;  %v1238_v0 = vrot.slane %v3037_v61, %v3198_v12  ;;  %v1234_v1 = vrot.slane %v3037_v61, %v3200_v13  ;;  %v1319_v3 = vrot.slane %v3038_v2, %v3192_v8 }
  0x17   : > { %438 = vrot.lane.b32.xlu1 %v425_v17, %s3118_s12  ;;  %440 = vrot.lane.b32.xlu0 %v429_v18, %s3118_s12  ;;  %v1315_v4 = vrot.slane %v3038_v2, %v3194_v9  ;;  %v1327_v5 = vrot.slane %v3038_v2, %v3198_v12  ;;  %v1323_v6 = vrot.slane %v3038_v2, %v3200_v13  ;;  %vm624_vm3 = vcmask 515072  }
  0x18   : > { %v1408_v10 = vrot.slane %v3039_v7, %v3192_v8  ;;  %v1404_v11 = vrot.slane %v3039_v7, %v3194_v9  ;;  %v1416_v14 = vrot.slane %v3039_v7, %v3198_v12  ;;  %v1412_v15 = vrot.slane %v3039_v7, %v3200_v13 }
  0x19   : > { %v1544_v17 = vrot.slane %v3041_v16, %v3192_v8  ;;  %v1540_v18 = vrot.slane %v3041_v16, %v3194_v9  ;;  %vm713_vm4 = vcmask 523264   ;;  %vm663_vm5 = vcmask 531456  }
  0x1a   : > { %vm574_vm6 = vcmask 580608   ;;  %vm485_vm7 = vcmask 588800   ;;  %vm396_vm8 = vcmask 596992   ;;  %vm4485_vm9 = vcmask 973824  }
  0x1b   : > { %442 = vrot.lane.b32.xlu1 %v433_v19, %s3118_s12  ;;  %444 = vrot.lane.b32.xlu0 %v437_v20, %s3118_s12  ;;  %v1552_v19 = vrot.slane %v3041_v16, %v3198_v12  ;;  %v1548_v20 = vrot.slane %v3041_v16, %v3200_v13  ;;  %vm1247_vm10 = vcmask 982016   ;;  %vm1336_vm11 = vcmask 990208  }
  0x1c   : > { %vm1425_vm12 = vcmask 1039360   ;;  %vm1464_vm13 = vcmask 7168   ;;  %vm1375_vm14 = vcmask 56320   ;;  %vm1286_vm15 = vcmask 64512  }
  0x1f   : > { %529 = vrot.lane.b32.xlu1 %v518_v22, %s3119_s15  ;;  %527 = vrot.lane.b32.xlu0 %v514_v23, %s3119_s15  ;;  %v1633_v22 = vrot.slane %v3352_v21, %v3192_v8  ;;  %v1629_v23 = vrot.slane %v3352_v21, %v3194_v9 }
  0x23   : > { %533 = vrot.lane.b32.xlu1 %v526_v24, %s3119_s15  ;;  %531 = vrot.lane.b32.xlu0 %v522_v25, %s3119_s15 }
  0x27   : > { %618 = vrot.lane.b32.xlu1 %v607_v27, %s3120_s18  ;;  %616 = vrot.lane.b32.xlu0 %v603_v28, %s3120_s18  ;;  %v260_v27 = vld [vmem:[%s246_s11 + $0x18] sm:$0xff]  ;;  %v262_v28 = vld [vmem:[%s246_s11 + $0x28] sm:$0xff] }
  0x2b   : > { %622 = vrot.lane.b32.xlu1 %v615_v29, %s3120_s18  ;;  %620 = vrot.lane.b32.xlu0 %v611_v30, %s3120_s18  ;;  %v264_v29 = vld [vmem:[%s246_s11 + $0x38] sm:$0xff] }
  0x2f   : > { %707 = vrot.lane.b32.xlu1 %v696_v32, %s3121_s23  ;;  %705 = vrot.lane.b32.xlu0 %v692_v33, %s3121_s23  ;;  %v261_v33 = vld [vmem:[%s246_s11 + $0x20] sm:$0xff] }
  0x33   : > { %711 = vrot.lane.b32.xlu1 %v704_v34, %s3121_s23  ;;  %709 = vrot.lane.b32.xlu0 %v700_v35, %s3121_s23  ;;  %v257_v34 = vld [vmem:[%s246_s11] sm:$0xff] }
  0x37   : > { %796 = vrot.lane.b32.xlu1 %v785_v37, %s3122_s26  ;;  %794 = vrot.lane.b32.xlu0 %v781_v38, %s3122_s26 }
  0x3b   : > { %800 = vrot.lane.b32.xlu1 %v793_v39, %s3122_s26  ;;  %798 = vrot.lane.b32.xlu0 %v789_v40, %s3122_s26  ;;  %v259_v39 = vld [vmem:[%s246_s11 + $0x10] sm:$0xff] }
  0x3f   : > { %885 = vrot.lane.b32.xlu1 %v874_v42, %s3123_s29  ;;  %883 = vrot.lane.b32.xlu0 %v870_v43, %s3123_s29 }
  0x43   : > { %889 = vrot.lane.b32.xlu1 %v882_v44, %s3123_s29  ;;  %887 = vrot.lane.b32.xlu0 %v878_v45, %s3123_s29 }
  0x47   : > { %974 = vrot.lane.b32.xlu1 %v963_v47, %s3124_s8  ;;  %972 = vrot.lane.b32.xlu0 %v959_v48, %s3124_s8  ;;  %v263_v47 = vld [vmem:[%s246_s11 + $0x30] sm:$0xff] }
  0x4b   : > { %978 = vrot.lane.b32.xlu1 %v971_v49, %s3124_s8  ;;  %976 = vrot.lane.b32.xlu0 %v967_v50, %s3124_s8 }
  0x4f   : > { %1063 = vrot.lane.b32.xlu1 %v1052_v52, %s3125_s13  ;;  %1061 = vrot.lane.b32.xlu0 %v1048_v53, %s3125_s13 }
  0x53   : > { %1067 = vrot.lane.b32.xlu1 %v1060_v54, %s3125_s13  ;;  %1065 = vrot.lane.b32.xlu0 %v1056_v55, %s3125_s13 }
  0x57   : > { %1152 = vrot.lane.b32.xlu1 %v1141_v57, %s3126_s17  ;;  %1150 = vrot.lane.b32.xlu0 %v1137_v58, %s3126_s17 }
  0x5b   : > { %1156 = vrot.lane.b32.xlu1 %v1149_v59, %s3126_s17  ;;  %1154 = vrot.lane.b32.xlu0 %v1145_v60, %s3126_s17 }
  0x5f   : > { %1241 = vrot.lane.b32.xlu1 %v1230_v62, %s3127_s24  ;;  %1239 = vrot.lane.b32.xlu0 %v1226_v63, %s3127_s24 }
  0x63   : > { %1245 = vrot.lane.b32.xlu1 %v1238_v0, %s3127_s24  ;;  %1243 = vrot.lane.b32.xlu0 %v1234_v1, %s3127_s24 }
  0x67   : > { %1330 = vrot.lane.b32.xlu1 %v1319_v3, %s3128_s28  ;;  %1328 = vrot.lane.b32.xlu0 %v1315_v4, %s3128_s28 }
  0x6b   : > { %1334 = vrot.lane.b32.xlu1 %v1327_v5, %s3128_s28  ;;  %1332 = vrot.lane.b32.xlu0 %v1323_v6, %s3128_s28 }
  0x6f   : > { %1419 = vrot.lane.b32.xlu1 %v1408_v10, %s3129_s10  ;;  %1417 = vrot.lane.b32.xlu0 %v1404_v11, %s3129_s10 }
  0x73   : > { %1423 = vrot.lane.b32.xlu1 %v1416_v14, %s3129_s10  ;;  %1421 = vrot.lane.b32.xlu0 %v1412_v15, %s3129_s10 }
  0x77   : > { %1555 = vrot.lane.b32.xlu1 %v1544_v17, %s3130_s16  ;;  %1553 = vrot.lane.b32.xlu0 %v1540_v18, %s3130_s16 }
  0x7b   : > { %1559 = vrot.lane.b32.xlu1 %v1552_v19, %s3130_s16  ;;  %1557 = vrot.lane.b32.xlu0 %v1548_v20, %s3130_s16 }
  0x7f   : > { %1644 = vrot.lane.b32.xlu1 %v1633_v22, %s3131_s25  ;;  %1642 = vrot.lane.b32.xlu0 %v1629_v23, %s3131_s25 }
  0x86   : > { %v290_v24 = vpop.permute.xlu1 %289  ;;  %v270_v25 = vpop.permute.xlu0 %269 }
  0x87   : > { %v278_v30 = vmul.f32 %v270_v25, %v258_v26  ;;  %v280_v35 = vmul.f32 %v270_v25, %v260_v27  ;;  %v277_v44 = vmul.f32 %v270_v25, %v257_v34  ;;  %v279_v49 = vmul.f32 %v270_v25, %v259_v39 }
  0x89   : > { %v298_v40 = vadd.f32 %v290_v24, %v278_v30  ;;  %v300_v46 = vadd.f32 %v290_v24, %v280_v35  ;;  %v297_v56 = vadd.f32 %v290_v24, %v277_v44  ;;  %v299_v63 = vadd.f32 %v290_v24, %v279_v49 }
  0x8a   : > { %v295_v31 = vpop.permute.xlu1 %294  ;;  %v275_v32 = vpop.permute.xlu0 %274 }
  0x8b   : > { %v282_v36 = vmul.f32 %v275_v32, %v262_v28  ;;  %v284_v37 = vmul.f32 %v275_v32, %v264_v29  ;;  %v281_v38 = vmul.f32 %v275_v32, %v261_v33  ;;  %v3372_v52 = vmax.f32 %v298_v40, 0.0 }
  0x8c   : > { %v283_v57 = vmul.f32 %v275_v32, %v263_v47  ;;  %v3378_v59 = vmax.f32 %v300_v46, 0.0  ;;  %v3389_v7 = vmax.f32 %v297_v56, 0.0  ;;  %v3398_v25 = vmax.f32 %v299_v63, 0.0  ;;  %v3043_v47 = vld [vmem:[%s4483_s5 + $0x40] sm:$0xf] }
  0x8d   : > { %v302_v41 = vadd.f32 %v295_v31, %v282_v36  ;;  %v304_v48 = vadd.f32 %v295_v31, %v284_v37  ;;  %v301_v50 = vadd.f32 %v295_v31, %v281_v38  ;;  %v1641_v56 = vrot.slane %v3352_v21, %v3198_v12 }
  0x8e   : > { %v352_v42 = vpop.permute.xlu1 %351  ;;  %v350_v43 = vpop.permute.xlu0 %349  ;;  %v303_v10 = vadd.f32 %v295_v31, %v283_v57  ;;  %v1726_v57 = vrot.slane %v3043_v47, %v3200_v13  ;;  %v1722_v63 = vrot.slane %v3043_v47, %v3192_v8 }
  0x8f   : > { %v366_v45 = vmul.f32 0.0, %v350_v43  ;;  %v3374_v53 = vmax.f32 %v302_v41, 0.0  ;;  %v3380_v60 = vmax.f32 %v304_v48, 0.0  ;;  %v3384_v0 = vmax.f32 %v301_v50, 0.0 }
  0x90   : > { %v358_v1 = vsel %vm357_vm0, %v350_v43, %v352_v42  ;;  %v3400_v26 = vmax.f32 %v303_v10, 0.0  ;;  %v1637_v43 = vrot.slane %v3352_v21, %v3200_v13  ;;  %v1718_v50 = vrot.slane %v3043_v47, %v3194_v9 }
  0x91   : > { %v376_v51 = vpack.c.bf16 %v366_v45, %v366_v45  ;;  %v367_v15 = vmul.f32 %v358_v1, %v3389_v7  ;;  %v372_v16 = vmul.f32 %v358_v1, %v3384_v0 }
  0x92   : > { %v356_v54 = vpop.permute.xlu1 %355  ;;  %v354_v55 = vpop.permute.xlu0 %353 }
  0x93   : > { %v359_v58 = vsel %vm357_vm0, %v352_v42, %v354_v55  ;;  %386 = vrot.lane.b32.xlu0 %v376_v51, %s3125_s13  ;;  %v370_v2 = vmul.f32 %v356_v54, %v3378_v59  ;;  %v375_v3 = vmul.f32 %v356_v54, %v3380_v60  ;;  %v360_v18 = vsel %vm357_vm0, %v354_v55, %v356_v54 }
  0x94   : > { %v368_v61 = vmul.f32 %v359_v58, %v3372_v52  ;;  %v373_v62 = vmul.f32 %v359_v58, %v3374_v53  ;;  %v369_v28 = vmul.f32 %v360_v18, %v3398_v25  ;;  %v374_v29 = vmul.f32 %v360_v18, %v3400_v26  ;;  %v3044_v58 = vld [vmem:[%s4483_s5 + $0x44] sm:$0xf] }
  0x95   : > { %v380_v24 = vpack.c.bf16 %v375_v3, %v370_v2  ;;  %v377_v30 = vpack.c.bf16 %v372_v16, %v367_v15  ;;  %v1807_v21 = vrot.slane %v3044_v58, %v3194_v9  ;;  %v1811_v16 = vrot.slane %v3044_v58, %v3192_v8 }
  0x96   : > { %v439_v4 = vpop.permute.xlu1 %438  ;;  %v441_v5 = vpop.permute.xlu0 %440  ;;  %v378_v6 = vpack.c.bf16 %v373_v62, %v368_v61  ;;  %v379_v39 = vpack.c.bf16 %v374_v29, %v369_v28 }
  0x97   : > { %v455_v11 = vmul.f32 0.0, %v439_v4  ;;  %v447_v14 = vsel %vm446_vm1, %v439_v4, %v441_v5  ;;  %v1730_v4 = vrot.slane %v3043_v47, %v3198_v12 }
  0x98   : > { %390 = vrot.lane.b32.xlu0 %v378_v6, %s3125_s13  ;;  %v456_v19 = vmul.f32 %v447_v14, %v3389_v7  ;;  %v461_v20 = vmul.f32 %v447_v14, %v3384_v0 }
  0x99   : > { %v465_v17 = vpack.c.bf16 %v455_v11, %v455_v11 }
  0x9a   : > { %v443_v22 = vpop.permute.xlu1 %442  ;;  %v445_v23 = vpop.permute.xlu0 %444  ;;  %v466_v34 = vpack.c.bf16 %v461_v20, %v456_v19 }
  0x9b   : > { %v449_v27 = vsel %vm446_vm1, %v443_v22, %v445_v23  ;;  %475 = vrot.lane.b32.xlu1 %v465_v17, %s3124_s8  ;;  %v448_v31 = vsel %vm446_vm1, %v441_v5, %v443_v22  ;;  %v459_v44 = vmul.f32 %v445_v23, %v3378_v59  ;;  %v464_v45 = vmul.f32 %v445_v23, %v3380_v60 }
  0x9c   : > { %394 = vrot.lane.b32.xlu0 %v380_v24, %s3125_s13  ;;  %v458_v35 = vmul.f32 %v449_v27, %v3398_v25  ;;  %v463_v36 = vmul.f32 %v449_v27, %v3400_v26  ;;  %v457_v37 = vmul.f32 %v448_v31, %v3372_v52  ;;  %v462_v38 = vmul.f32 %v448_v31, %v3374_v53 }
  0x9d   : > { %v469_v51 = vpack.c.bf16 %v464_v45, %v459_v44  ;;  %v1815_v5 = vrot.slane %v3044_v58, %v3200_v13  ;;  %v1819_v24 = vrot.slane %v3044_v58, %v3198_v12 }
  0x9e   : > { %v530_v32 = vpop.permute.xlu1 %529  ;;  %v3408_v33 = vpop.permute.xlu0 %527  ;;  %v468_v42 = vpack.c.bf16 %v463_v36, %v458_v35  ;;  %v467_v46 = vpack.c.bf16 %v462_v38, %v457_v37 }
  0x9f   : > { %388 = vrot.lane.b32.xlu1 %v377_v30, %s3125_s13  ;;  %v536_v3 = vsel %vm535_vm2, %v3408_v33, %v530_v32  ;;  %v544_v29 = vmul.f32 0.0, %v3408_v33  ;;  %v3045_v33 = vld [vmem:[%s4483_s5 + $0x48] sm:$0xf] }
  0xa0   : > { %477 = vrot.lane.b32.xlu0 %v466_v34, %s3124_s8  ;;  %v545_v6 = vmul.f32 %v536_v3, %v3389_v7  ;;  %v550_v10 = vmul.f32 %v536_v3, %v3384_v0  ;;  %v1896_v45 = vrot.slane %v3045_v33, %v3194_v9  ;;  %v1904_v58 = vrot.slane %v3045_v33, %v3200_v13 }
  0xa2   : > { %v3416_v40 = vpop.permute.xlu1 %533  ;;  %v532_v41 = vpop.permute.xlu0 %531  ;;  %v555_v23 = vpack.c.bf16 %v550_v10, %v545_v6 }
  0xa3   : > { %392 = vrot.lane.b32.xlu1 %v379_v39, %s3125_s13  ;;  %v538_v15 = vsel %vm535_vm2, %v532_v41, %v3416_v40  ;;  %v537_v17 = vsel %vm535_vm2, %v530_v32, %v532_v41  ;;  %v548_v34 = vmul.f32 %v3416_v40, %v3378_v59  ;;  %v553_v35 = vmul.f32 %v3416_v40, %v3380_v60 }
  0xa4   : > { %481 = vrot.lane.b32.xlu0 %v468_v42, %s3124_s8  ;;  %v547_v18 = vmul.f32 %v538_v15, %v3398_v25  ;;  %v552_v19 = vmul.f32 %v538_v15, %v3400_v26  ;;  %v546_v27 = vmul.f32 %v537_v17, %v3372_v52  ;;  %v551_v28 = vmul.f32 %v537_v17, %v3374_v53 }
  0xa5   : > { %v554_v39 = vpack.c.bf16 %v544_v29, %v544_v29  ;;  %v1900_v41 = vrot.slane %v3045_v33, %v3192_v8  ;;  %v558_v42 = vpack.c.bf16 %v553_v35, %v548_v34 }
  0xa6   : > { %v3427_v48 = vpop.permute.xlu1 %618  ;;  %v3429_v49 = vpop.permute.xlu0 %616  ;;  %v557_v32 = vpack.c.bf16 %v552_v19, %v547_v18  ;;  %v556_v36 = vpack.c.bf16 %v551_v28, %v546_v27  ;;  %v3046_v18 = vld [vmem:[%s4483_s5 + $0x4c] sm:$0xf] }
  0xa7   : > { %479 = vrot.lane.b32.xlu1 %v467_v46, %s3124_s8  ;;  %v1908_v46 = vrot.slane %v3045_v33, %v3198_v12  ;;  %v625_v47 = vsel %vm624_vm3, %v3429_v49, %v3427_v48  ;;  %v1991_v34 = vrot.slane %v3046_v18, %v3200_v13 }
  0xa8   : > { %1646 = vrot.lane.b32.xlu0 %v1637_v43, %s3131_s25 }
  0xaa   : > { %v3434_v54 = vpop.permute.xlu1 %622  ;;  %v3436_v55 = vpop.permute.xlu0 %620 }
  0xab   : > { %483 = vrot.lane.b32.xlu1 %v469_v51, %s3124_s8  ;;  %v626_v44 = vsel %vm624_vm3, %v3427_v48, %v3436_v55  ;;  %v637_v48 = vmul.f32 %v3434_v54, %v3378_v59  ;;  %v642_v3 = vmul.f32 %v3434_v54, %v3380_v60 }
  0xac   : > { %1731 = vrot.lane.b32.xlu0 %v1718_v50, %s3132_s20  ;;  %v635_v50 = vmul.f32 %v626_v44, %v3372_v52  ;;  %v640_v51 = vmul.f32 %v626_v44, %v3374_v53 }
  0xae   : > { %v3446_v61 = vpop.permute.xlu1 %707  ;;  %v3448_v62 = vpop.permute.xlu0 %705  ;;  %v645_v10 = vpack.c.bf16 %v640_v51, %v635_v50 }
  0xaf   : > { %1648 = vrot.lane.b32.xlu1 %v1641_v56, %s3131_s25 }
  0xb0   : > { %1735 = vrot.lane.b32.xlu0 %v1726_v57, %s3132_s20 }
  0xb2   : > { %v3454_v1 = vpop.permute.xlu1 %711  ;;  %v3456_v2 = vpop.permute.xlu0 %709 }
  0xb3   : > { %1733 = vrot.lane.b32.xlu1 %v1722_v63, %s3132_s20  ;;  %v634_v63 = vmul.f32 %v625_v47, %v3389_v7 }
  0xb4   : > { %1820 = vrot.lane.b32.xlu0 %v1807_v21, %s3133_s7  ;;  %v639_v21 = vmul.f32 %v625_v47, %v3384_v0 }
  0xb6   : > { %v3466_v11 = vpop.permute.xlu1 %796  ;;  %v3468_v14 = vpop.permute.xlu0 %794  ;;  %v644_v17 = vpack.c.bf16 %v639_v21, %v634_v63 }
  0xb7   : > { %1737 = vrot.lane.b32.xlu1 %v1730_v4, %s3132_s20  ;;  %v627_v4 = vsel %vm624_vm3, %v3436_v55, %v3434_v54  ;;  %v647_v55 = vpack.c.bf16 %v642_v3, %v637_v48 }
  0xb8   : > { %1824 = vrot.lane.b32.xlu0 %v1815_v5, %s3133_s7  ;;  %v636_v15 = vmul.f32 %v627_v4, %v3398_v25 }
  0xba   : > { %v3478_v20 = vpop.permute.xlu1 %800  ;;  %v3480_v22 = vpop.permute.xlu0 %798 }
  0xbb   : > { %1822 = vrot.lane.b32.xlu1 %v1811_v16, %s3133_s7  ;;  %v641_v16 = vmul.f32 %v627_v4, %v3400_v26  ;;  %v726_v4 = vmul.f32 %v3454_v1, %v3378_v59 }
  0xbc   : > { %566 = vrot.lane.b32.xlu0 %v555_v23, %s3123_s29  ;;  %v1983_v23 = vrot.slane %v3046_v18, %v3194_v9 }
  0xbd   : > { %v646_v27 = vpack.c.bf16 %v641_v16, %v636_v15 }
  0xbe   : > { %v3488_v30 = vpop.permute.xlu1 %885  ;;  %v3490_v31 = vpop.permute.xlu0 %883 }
  0xbf   : > { %1826 = vrot.lane.b32.xlu1 %v1819_v24, %s3133_s7  ;;  %v633_v24 = vmul.f32 0.0, %v3429_v49 }
  0xc0   : > { %570 = vrot.lane.b32.xlu0 %v557_v32, %s3123_s29  ;;  %v714_v32 = vsel %vm713_vm4, %v3448_v62, %v3446_v61 }
  0xc1   : > { %v643_v35 = vpack.c.bf16 %v633_v24, %v633_v24  ;;  %v728_v49 = vmul.f32 %v714_v32, %v3384_v0 }
  0xc2   : > { %v3501_v37 = vpop.permute.xlu1 %889  ;;  %v3503_v38 = vpop.permute.xlu0 %887 }
  0xc3   : > { %568 = vrot.lane.b32.xlu1 %v556_v36, %s3123_s29  ;;  %v723_v36 = vmul.f32 %v714_v32, %v3389_v7 }
  0xc4   : > { %564 = vrot.lane.b32.xlu0 %v554_v39, %s3123_s29 }
  0xc5   : > { %v733_v44 = vpack.c.bf16 %v728_v49, %v723_v36 }
  0xc6   : > { %v3508_v43 = vpop.permute.xlu1 %974  ;;  %v3510_v40 = vpop.permute.xlu0 %972 }
  0xc7   : > { %572 = vrot.lane.b32.xlu1 %v558_v42, %s3123_s29  ;;  %v1987_v42 = vrot.slane %v3046_v18, %v3192_v8 }
  0xc8   : > { %1911 = vrot.lane.b32.xlu0 %v1900_v41, %s3117_s9  ;;  %v716_v41 = vsel %vm713_vm4, %v3456_v2, %v3454_v1 }
  0xc9   : > { %v730_v47 = vmul.f32 %v716_v41, %v3400_v26 }
  0xca   : > { %v3524_v56 = vpop.permute.xlu1 %978  ;;  %v3526_v57 = vpop.permute.xlu0 %976 }
  0xcb   : > { %1909 = vrot.lane.b32.xlu1 %v1896_v45, %s3117_s9  ;;  %v715_v45 = vsel %vm713_vm4, %v3446_v61, %v3456_v2  ;;  %v722_v61 = vmul.f32 0.0, %v3448_v62  ;;  %v3047_v62 = vld [vmem:[%s4483_s5 + $0x50] sm:$0xf] }
  0xcc   : > { %1915 = vrot.lane.b32.xlu0 %v1908_v46, %s3117_s9  ;;  %v725_v46 = vmul.f32 %v716_v41, %v3398_v25  ;;  %v724_v63 = vmul.f32 %v715_v45, %v3372_v52  ;;  %v729_v21 = vmul.f32 %v715_v45, %v3374_v53  ;;  %v2070_v32 = vrot.slane %v3047_v62, %v3194_v9 }
  0xcd   : > { %v732_v16 = vpack.c.bf16 %v722_v61, %v722_v61 }
  0xce   : > { %v3540_v5 = vpop.permute.xlu1 %1063  ;;  %v3542_v6 = vpop.permute.xlu0 %1061  ;;  %v735_v2 = vpack.c.bf16 %v730_v47, %v725_v46  ;;  %v734_v15 = vpack.c.bf16 %v729_v21, %v724_v63  ;;  %v820_v47 = vmul.f32 %v3478_v20, %v3380_v60 }
  0xcf   : > { %1913 = vrot.lane.b32.xlu1 %v1904_v58, %s3117_s9  ;;  %v1995_v58 = vrot.slane %v3046_v18, %v3198_v12 }
  0xd0   : > { %657 = vrot.lane.b32.xlu0 %v645_v10, %s3122_s26  ;;  %v731_v10 = vmul.f32 %v3454_v1, %v3380_v60  ;;  %v804_v1 = vsel %vm663_vm5, %v3466_v11, %v3480_v22 }
  0xd1   : > { %v813_v36 = vmul.f32 %v804_v1, %v3372_v52  ;;  %v818_v49 = vmul.f32 %v804_v1, %v3374_v53 }
  0xd2   : > { %v3551_v19 = vpop.permute.xlu1 %1067  ;;  %v3553_v54 = vpop.permute.xlu0 %1065 }
  0xd3   : > { %655 = vrot.lane.b32.xlu1 %v644_v17, %s3122_s26  ;;  %v823_v63 = vpack.c.bf16 %v818_v49, %v813_v36  ;;  %v894_v49 = vsel %vm574_vm6, %v3503_v38, %v3501_v37 }
  0xd4   : > { %661 = vrot.lane.b32.xlu0 %v647_v55, %s3122_s26  ;;  %v2074_v55 = vrot.slane %v3047_v62, %v3192_v8 }
  0xd6   : > { %v3559_v28 = vpop.permute.xlu1 %1152  ;;  %v3561_v29 = vpop.permute.xlu0 %1150 }
  0xd7   : > { %659 = vrot.lane.b32.xlu1 %v646_v27, %s3122_s26 }
  0xd8   : > { %1996 = vrot.lane.b32.xlu0 %v1983_v23, %s3118_s12  ;;  %v736_v23 = vpack.c.bf16 %v731_v10, %v726_v4  ;;  %v3048_v10 = vld [vmem:[%s4483_s5 + $0x54] sm:$0xf] }
  0xda   : > { %v3571_v33 = vpop.permute.xlu1 %1156  ;;  %v3573_v39 = vpop.permute.xlu0 %1154 }
  0xdb   : > { %653 = vrot.lane.b32.xlu1 %v643_v35, %s3122_s26  ;;  %v803_v35 = vsel %vm663_vm5, %v3468_v14, %v3466_v11  ;;  %v815_v11 = vmul.f32 %v3478_v20, %v3378_v59 }
  0xdc   : > { %2000 = vrot.lane.b32.xlu0 %v1991_v34, %s3118_s12  ;;  %v2082_v34 = vrot.slane %v3047_v62, %v3198_v12  ;;  %v817_v45 = vmul.f32 %v803_v35, %v3384_v0 }
  0xde   : > { %v3586_v50 = vpop.permute.xlu1 %1241  ;;  %v3588_v51 = vpop.permute.xlu0 %1239 }
  0xdf   : > { %1998 = vrot.lane.b32.xlu1 %v1987_v42, %s3118_s12  ;;  %v2078_v42 = vrot.slane %v3047_v62, %v3200_v13  ;;  %v825_v62 = vpack.c.bf16 %v820_v47, %v815_v11  ;;  %v893_v11 = vsel %vm574_vm6, %v3488_v30, %v3503_v38  ;;  %v903_v47 = vmul.f32 %v894_v49, %v3398_v25 }
  0xe0   : > { %744 = vrot.lane.b32.xlu0 %v733_v44, %s3121_s23  ;;  %v812_v44 = vmul.f32 %v803_v35, %v3389_v7  ;;  %v904_v38 = vmul.f32 %v3501_v37, %v3378_v59 }
  0xe2   : > { %v3596_v48 = vpop.permute.xlu1 %1245  ;;  %v3598_v3 = vpop.permute.xlu0 %1243  ;;  %v822_v61 = vpack.c.bf16 %v817_v45, %v812_v44 }
  0xe3   : > { %2002 = vrot.lane.b32.xlu1 %v1995_v58, %s3118_s12  ;;  %v805_v58 = vsel %vm663_vm5, %v3480_v22, %v3478_v20  ;;  %v2157_v22 = vrot.slane %v3048_v10, %v3194_v9 }
  0xe4   : > { %748 = vrot.lane.b32.xlu0 %v735_v2, %s3121_s23  ;;  %v814_v2 = vmul.f32 %v805_v58, %v3398_v25  ;;  %v819_v4 = vmul.f32 %v805_v58, %v3400_v26  ;;  %v908_v58 = vmul.f32 %v894_v49, %v3400_v26 }
  0xe6   : > { %v3609_v17 = vpop.permute.xlu1 %1330  ;;  %v3611_v18 = vpop.permute.xlu0 %1328 }
  0xe7   : > { %746 = vrot.lane.b32.xlu1 %v734_v15, %s3121_s23 }
  0xe8   : > { %742 = vrot.lane.b32.xlu0 %v732_v16, %s3121_s23  ;;  %v811_v16 = vmul.f32 0.0, %v3468_v14 }
  0xea   : > { %v3616_v24 = vpop.permute.xlu0 %1332  ;;  %v3621_v27 = vpop.permute.xlu1 %1334 }
  0xeb   : > { %750 = vrot.lane.b32.xlu1 %v736_v23, %s3121_s23  ;;  %v892_v23 = vsel %vm574_vm6, %v3490_v31, %v3488_v30  ;;  %v913_v30 = vpack.c.bf16 %v908_v58, %v903_v47 }
  0xec   : > { %2085 = vrot.lane.b32.xlu0 %v2074_v55, %s3119_s15  ;;  %v824_v55 = vpack.c.bf16 %v819_v4, %v814_v2  ;;  %v901_v36 = vmul.f32 %v892_v23, %v3389_v7  ;;  %v906_v14 = vmul.f32 %v892_v23, %v3384_v0  ;;  %v902_v2 = vmul.f32 %v893_v11, %v3372_v52  ;;  %v3049_v23 = vld [vmem:[%s4483_s5 + $0x58] sm:$0xf] }
  0xed   : > { %v907_v4 = vmul.f32 %v893_v11, %v3374_v53  ;;  %v981_v11 = vsel %vm485_vm7, %v3510_v40, %v3508_v43 }
  0xee   : > { %v3632_v41 = vpop.permute.xlu0 %1417  ;;  %v3639_v46 = vpop.permute.xlu1 %1419  ;;  %v911_v45 = vpack.c.bf16 %v906_v14, %v901_v36 }
  0xef   : > { %2083 = vrot.lane.b32.xlu1 %v2070_v32, %s3119_s15  ;;  %v2165_v32 = vrot.slane %v3048_v10, %v3200_v13 }
  0xf0   : > { %2089 = vrot.lane.b32.xlu0 %v2082_v34, %s3119_s15  ;;  %v821_v34 = vpack.c.bf16 %v811_v16, %v811_v16  ;;  %v912_v16 = vpack.c.bf16 %v907_v4, %v902_v2 }
  0xf2   : > { %v3648_v21 = vpop.permute.xlu0 %1421  ;;  %v3659_v20 = vpop.permute.xlu1 %1423 }
  0xf3   : > { %2087 = vrot.lane.b32.xlu1 %v2078_v42, %s3119_s15  ;;  %v2161_v42 = vrot.slane %v3048_v10, %v3192_v8 }
  0xf4   : > { %835 = vrot.lane.b32.xlu0 %v823_v63, %s3120_s18 }
  0xf6   : > { %v3657_v15 = vpop.permute.xlu0 %1553  ;;  %v3673_v35 = vpop.permute.xlu1 %1555 }
  0xf7   : > { %833 = vrot.lane.b32.xlu1 %v822_v61, %s3120_s18  ;;  %v2169_v61 = vrot.slane %v3048_v10, %v3198_v12  ;;  %v909_v10 = vmul.f32 %v3501_v37, %v3380_v60  ;;  %v982_v37 = vsel %vm485_vm7, %v3508_v43, %v3526_v57  ;;  %v990_v43 = vmul.f32 %v981_v11, %v3389_v7 }
  0xf8   : > { %839 = vrot.lane.b32.xlu0 %v825_v62, %s3120_s18  ;;  %v991_v58 = vmul.f32 %v982_v37, %v3372_v52 }
  0xf9   : > { %v914_v14 = vpack.c.bf16 %v909_v10, %v904_v38  ;;  %v995_v38 = vmul.f32 %v981_v11, %v3384_v0  ;;  %v993_v10 = vmul.f32 %v3524_v56, %v3378_v59 }
  0xfa   : > { %v3668_v1 = vpop.permute.xlu0 %1557  ;;  %v3690_v63 = vpop.permute.xlu1 %1559 }
  0xfb   : > { %837 = vrot.lane.b32.xlu1 %v824_v55, %s3120_s18 }
  0xfc   : > { %2170 = vrot.lane.b32.xlu0 %v2157_v22, %s3120_s18  ;;  %v900_v22 = vmul.f32 0.0, %v3490_v31 }
  0xfe   : > { %v3683_v44 = vpop.permute.xlu0 %1642  ;;  %v3704_v55 = vpop.permute.xlu1 %1644 }
  0xff   : > { %831 = vrot.lane.b32.xlu1 %v821_v34, %s3120_s18  ;;  %v2248_v34 = vrot.slane %v3049_v23, %v3192_v8 }
 0x100   : > { %2174 = vrot.lane.b32.xlu0 %v2165_v32, %s3120_s18  ;;  %v910_v32 = vpack.c.bf16 %v900_v22, %v900_v22 }
 0x103   : > { %2172 = vrot.lane.b32.xlu1 %v2161_v42, %s3120_s18  ;;  %v2244_v42 = vrot.slane %v3049_v23, %v3194_v9 }
 0x104   : > { %922 = vrot.lane.b32.xlu0 %v911_v45, %s3119_s15  ;;  %v2256_v45 = vrot.slane %v3049_v23, %v3198_v12 }
 0x105   : > { %v387_v62 = vpop.permute.xlu0 %386 }
 0x107   : > { %2176 = vrot.lane.b32.xlu1 %v2169_v61, %s3120_s18  ;;  %v996_v61 = vmul.f32 %v982_v37, %v3374_v53 }
 0x108   : > { %926 = vrot.lane.b32.xlu0 %v913_v30, %s3119_s15  ;;  %v2252_v30 = vrot.slane %v3049_v23, %v3200_v13 }
 0x10a   : > { %v391_v31 = vpop.permute.xlu0 %390 }
 0x10b   : > { %924 = vrot.lane.b32.xlu1 %v912_v16, %s3119_s15  ;;  %v998_v16 = vmul.f32 %v3524_v56, %v3380_v60 }
 0x10c   : > { %920 = vrot.lane.b32.xlu0 %v910_v32, %s3119_s15 }
 0x10d   : > { %v476_v36 = vpop.permute.xlu1 %475 }
 0x10e   : > { %v395_v49 = vpop.permute.xlu0 %394 }
 0x10f   : > { %928 = vrot.lane.b32.xlu1 %v914_v14, %s3119_s15 }
 0x110   : > { %2259 = vrot.lane.b32.xlu0 %v2248_v34, %s3121_s23  ;;  %v1001_v34 = vpack.c.bf16 %v996_v61, %v991_v58 }
 0x111   : > { %v389_v47 = vpop.permute.xlu1 %388 }
 0x112   : > { %v478_v2 = vpop.permute.xlu0 %477  ;;  %v398_v4 = vsel %vm396_vm8, %v389_v47, %v391_v31  ;;  %v397_v22 = vsel %vm396_vm8, %v387_v62, %v389_v47  ;;  %v983_v62 = vsel %vm485_vm7, %v3526_v57, %v3524_v56  ;;  %v3050_v56 = vld [vmem:[%s4483_s5 + $0x5c] sm:$0xf] }
 0x113   : > { %2257 = vrot.lane.b32.xlu1 %v2244_v42, %s3121_s23  ;;  %2796 = vmatprep.subr.bf16.mxu0 %v398_v4  ;;  %v1000_v42 = vpack.c.bf16 %v995_v38, %v990_v43  ;;  %v997_v11 = vmul.f32 %v983_v62, %v3400_v26  ;;  %v486_v58 = vsel %vm485_vm7, %v476_v36, %v478_v2  ;;  %v989_v4 = vmul.f32 0.0, %v3510_v40 }
 0x114   : > { %2263 = vrot.lane.b32.xlu0 %v2256_v45, %s3121_s23  ;;  %2797 = vmatpush1.bf16.msra.mxu0 %v397_v22  ;;  %v992_v45 = vmul.f32 %v983_v62, %v3398_v25  ;;  %v2331_v61 = vrot.slane %v3050_v56, %v3194_v9  ;;  %v2339_v40 = vrot.slane %v3050_v56, %v3200_v13 }
 0x115   : > { %v393_v32 = vpop.permute.xlu1 %392 }
 0x116   : > { %v482_v23 = vpop.permute.xlu0 %481  ;;  %v400_v14 = vsel %vm396_vm8, %v393_v32, %v395_v49  ;;  %v399_v37 = vsel %vm396_vm8, %v391_v31, %v393_v32  ;;  %v1003_v49 = vpack.c.bf16 %v998_v16, %v993_v10  ;;  %v1002_v22 = vpack.c.bf16 %v997_v11, %v992_v45 }
 0x117   : > { %2261 = vrot.lane.b32.xlu1 %v2252_v30, %s3121_s23  ;;  %2878 = vmatprep.subr.bf16.mxu1 %v400_v14  ;;  %v1070_v10 = vsel %vm396_vm8, %v3542_v6, %v3540_v5  ;;  %v1072_v14 = vsel %vm396_vm8, %v3553_v54, %v3551_v19  ;;  %v1071_v45 = vsel %vm396_vm8, %v3540_v5, %v3553_v54  ;;  %v1078_v5 = vmul.f32 0.0, %v3542_v6  ;;  %v3051_v6 = vld [vmem:[%s4483_s5 + $0x60] sm:$0xf] }
 0x118   : > { %1013 = vrot.lane.b32.xlu0 %v1001_v34, %s3118_s12  ;;  %2879 = vmatpush1.bf16.msra.mxu1 %v399_v37  ;;  %v1079_v32 = vmul.f32 %v1070_v10, %v3389_v7  ;;  %v1084_v62 = vmul.f32 %v1070_v10, %v3384_v0  ;;  %v1081_v11 = vmul.f32 %v1072_v14, %v3398_v25 }
 0x119   : > { %v480_v47 = vpop.permute.xlu1 %479 }
 0x11a   : > { %v3747_v57 = vpop.permute.xlu0 %1646  ;;  %v487_v31 = vsel %vm485_vm7, %v478_v2, %v480_v47  ;;  %v488_v36 = vsel %vm485_vm7, %v480_v47, %v482_v23  ;;  %v999_v2 = vpack.c.bf16 %v989_v4, %v989_v4  ;;  %v1086_v47 = vmul.f32 %v1072_v14, %v3400_v26 }
 0x11b   : > { %1011 = vrot.lane.b32.xlu1 %v1000_v42, %s3118_s12  ;;  %2798 = vmatprep.subr.bf16.mxu0 %v487_v31  ;;  %v1089_v42 = vpack.c.bf16 %v1084_v62, %v1079_v32  ;;  %v1160_v14 = vsel %vm4485_vm9, %v3559_v28, %v3573_v39 }
 0x11c   : > { %1017 = vrot.lane.b32.xlu0 %v1003_v49, %s3118_s12  ;;  %2799 = vmatpush1.bf16.msra.mxu0 %v486_v58  ;;  %v2343_v49 = vrot.slane %v3050_v56, %v3198_v12  ;;  %v1080_v58 = vmul.f32 %v1071_v45, %v3372_v52  ;;  %v1091_v54 = vpack.c.bf16 %v1086_v47, %v1081_v11 }
 0x11d   : > { %v484_v30 = vpop.permute.xlu1 %483  ;;  %v1159_v11 = vsel %vm4485_vm9, %v3561_v29, %v3559_v28  ;;  %v1169_v47 = vmul.f32 %v1160_v14, %v3372_v52 }
 0x11e   : > { %v3755_v43 = vpop.permute.xlu0 %1731  ;;  %v489_v38 = vsel %vm485_vm7, %v482_v23, %v484_v30  ;;  %v2335_v23 = vrot.slane %v3050_v56, %v3192_v8  ;;  %v1082_v56 = vmul.f32 %v3551_v19, %v3378_v59  ;;  %v1087_v30 = vmul.f32 %v3551_v19, %v3380_v60 }
 0x11f   : > { %1015 = vrot.lane.b32.xlu1 %v1002_v22, %s3118_s12  ;;  %2880 = vmatprep.subr.bf16.mxu1 %v489_v38  ;;  %v1173_v28 = vmul.f32 %v1159_v11, %v3384_v0 }
 0x120   : > { %2344 = vrot.lane.b32.xlu0 %v2331_v61, %s3122_s26  ;;  %2881 = vmatpush1.bf16.msra.mxu1 %v488_v36  ;;  %v1085_v61 = vmul.f32 %v1071_v45, %v3374_v53  ;;  %v1088_v36 = vpack.c.bf16 %v1078_v5, %v1078_v5  ;;  %v1092_v62 = vpack.c.bf16 %v1087_v30, %v1082_v56 }
 0x121   : > { %v3765_v16 = vpop.permute.xlu1 %1648  ;;  %v1168_v56 = vmul.f32 %v1159_v11, %v3389_v7  ;;  %v1171_v30 = vmul.f32 %v3571_v33, %v3378_v59 }
 0x122   : > { %v3769_v34 = vpop.permute.xlu0 %1735  ;;  %v1090_v38 = vpack.c.bf16 %v1085_v61, %v1080_v58 }
 0x123   : > { %1009 = vrot.lane.b32.xlu1 %v999_v2, %s3118_s12  ;;  %v2422_v2 = vrot.slane %v3051_v6, %v3192_v8 }
 0x124   : > { %2348 = vrot.lane.b32.xlu0 %v2339_v40, %s3122_s26 }
 0x125   : > { %v3777_v37 = vpop.permute.xlu1 %1733 }
 0x126   : > { %v3784_v31 = vpop.permute.xlu0 %1820 }
 0x127   : > { %2346 = vrot.lane.b32.xlu1 %v2335_v23, %s3122_s26  ;;  %v2418_v23 = vrot.slane %v3051_v6, %v3194_v9 }
 0x128   : > { %1100 = vrot.lane.b32.xlu0 %v1089_v42, %s3117_s9  ;;  %v2430_v42 = vrot.slane %v3051_v6, %v3198_v12 }
 0x129   : > { %v3791_v4 = vpop.permute.xlu1 %1737 }
 0x12a   : > { %v3794_v22 = vpop.permute.xlu0 %1824 }
 0x12b   : > { %2350 = vrot.lane.b32.xlu1 %v2343_v49, %s3122_s26  ;;  %v1174_v49 = vmul.f32 %v1160_v14, %v3374_v53 }
 0x12c   : > { %1104 = vrot.lane.b32.xlu0 %v1091_v54, %s3117_s9  ;;  %v2426_v54 = vrot.slane %v3051_v6, %v3200_v13 }
 0x12d   : > { %v3802_v10 = vpop.permute.xlu1 %1822 }
 0x12e   : > { %v567_v40 = vpop.permute.xlu0 %566 }
 0x12f   : > { %1102 = vrot.lane.b32.xlu1 %v1090_v38, %s3117_s9 }
 0x130   : > { %1098 = vrot.lane.b32.xlu0 %v1088_v36, %s3117_s9  ;;  %v1176_v36 = vmul.f32 %v3571_v33, %v3380_v60 }
 0x131   : > { %v3810_v32 = vpop.permute.xlu1 %1826 }
 0x132   : > { %v571_v19 = vpop.permute.xlu0 %570 }
 0x133   : > { %1106 = vrot.lane.b32.xlu1 %v1092_v62, %s3117_s9 }
 0x134   : > { %2433 = vrot.lane.b32.xlu0 %v2422_v2, %s3123_s29  ;;  %v1179_v2 = vpack.c.bf16 %v1174_v49, %v1169_v47  ;;  %v1181_v47 = vpack.c.bf16 %v1176_v36, %v1171_v30 }
 0x135   : > { %v569_v45 = vpop.permute.xlu1 %568 }
 0x136   : > { %v565_v58 = vpop.permute.xlu0 %564  ;;  %v576_v61 = vsel %vm574_vm6, %v567_v40, %v569_v45  ;;  %v577_v14 = vsel %vm574_vm6, %v569_v45, %v571_v19  ;;  %v1167_v45 = vmul.f32 0.0, %v3561_v29 }
 0x137   : > { %2431 = vrot.lane.b32.xlu1 %v2418_v23, %s3123_s29  ;;  %2800 = vmatprep.subr.bf16.mxu0 %v576_v61  ;;  %v575_v5 = vsel %vm574_vm6, %v565_v58, %v567_v40  ;;  %v1161_v40 = vsel %vm4485_vm9, %v3573_v39, %v3571_v33  ;;  %v1178_v23 = vpack.c.bf16 %v1173_v28, %v1168_v56  ;;  %v3052_v33 = vld [vmem:[%s4483_s5 + $0x64] sm:$0xf]  ;;  %vm1197_vm9 = vcmask 72704  }
 0x138   : > { %2437 = vrot.lane.b32.xlu0 %v2430_v42, %s3123_s29  ;;  %2801 = vmatpush1.bf16.msra.mxu0 %v575_v5  ;;  %v1170_v42 = vmul.f32 %v1161_v40, %v3398_v25  ;;  %v1175_v11 = vmul.f32 %v1161_v40, %v3400_v26  ;;  %v1248_v5 = vsel %vm1247_vm10, %v3588_v51, %v3586_v50 }
 0x139   : > { %v573_v38 = vpop.permute.xlu1 %572  ;;  %v2513_v56 = vrot.slane %v3052_v33, %v3200_v13  ;;  %v1177_v28 = vpack.c.bf16 %v1167_v45, %v1167_v45  ;;  %v1257_v30 = vmul.f32 %v1248_v5, %v3389_v7 }
 0x13a   : > { %v3838_v6 = vpop.permute.xlu0 %1911  ;;  %v578_v62 = vsel %vm574_vm6, %v571_v19, %v573_v38  ;;  %v2505_v19 = vrot.slane %v3052_v33, %v3194_v9  ;;  %v1180_v49 = vpack.c.bf16 %v1175_v11, %v1170_v42  ;;  %v1262_v38 = vmul.f32 %v1248_v5, %v3384_v0 }
 0x13b   : > { %2435 = vrot.lane.b32.xlu1 %v2426_v54, %s3123_s29  ;;  %2882 = vmatprep.subr.bf16.mxu1 %v578_v62  ;;  %v2509_v62 = vrot.slane %v3052_v33, %v3192_v8  ;;  %v2517_v5 = vrot.slane %v3052_v33, %v3198_v12  ;;  %v1260_v33 = vmul.f32 %v3596_v48, %v3378_v59 }
 0x13c   : > { %1191 = vrot.lane.b32.xlu0 %v1179_v2, %s3133_s7  ;;  %2883 = vmatpush1.bf16.msra.mxu1 %v577_v14  ;;  %v1250_v2 = vsel %vm1247_vm10, %v3598_v3, %v3596_v48  ;;  %v1267_v14 = vpack.c.bf16 %v1262_v38, %v1257_v30 }
 0x13d   : > { %v3846_v58 = vpop.permute.xlu1 %1909  ;;  %v1259_v11 = vmul.f32 %v1250_v2, %v3398_v25 }
 0x13e   : > { %v3851_v39 = vpop.permute.xlu0 %1915 }
 0x13f   : > { %1189 = vrot.lane.b32.xlu1 %v1178_v23, %s3133_s7  ;;  %v1249_v23 = vsel %vm1247_vm10, %v3586_v50, %v3598_v3 }
 0x140   : > { %1195 = vrot.lane.b32.xlu0 %v1181_v47, %s3133_s7  ;;  %v1264_v47 = vmul.f32 %v1250_v2, %v3400_v26  ;;  %v1258_v50 = vmul.f32 %v1249_v23, %v3372_v52  ;;  %v1263_v3 = vmul.f32 %v1249_v23, %v3374_v53 }
 0x141   : > { %v3857_v61 = vpop.permute.xlu1 %1913 }
 0x142   : > { %v658_v54 = vpop.permute.xlu0 %657  ;;  %v1269_v30 = vpack.c.bf16 %v1264_v47, %v1259_v11  ;;  %v1338_v11 = vsel %vm1336_vm11, %v3609_v17, %v3616_v24 }
 0x143   : > { %1193 = vrot.lane.b32.xlu1 %v1180_v49, %s3133_s7 }
 0x144   : > { %2518 = vrot.lane.b32.xlu0 %v2505_v19, %s3124_s8 }
 0x145   : > { %v656_v29 = vpop.permute.xlu1 %655 }
 0x146   : > { %v662_v36 = vpop.permute.xlu0 %661  ;;  %v665_v40 = vsel %vm663_vm5, %v656_v29, %v658_v54 }
 0x147   : > { %1187 = vrot.lane.b32.xlu1 %v1177_v28, %s3133_s7  ;;  %2802 = vmatprep.subr.bf16.mxu0 %v665_v40  ;;  %v1256_v28 = vmul.f32 0.0, %v3588_v51  ;;  %v1268_v40 = vpack.c.bf16 %v1263_v3, %v1258_v50  ;;  %v3053_v51 = vld [vmem:[%s4483_s5 + $0x68] sm:$0xf]  ;;  %v1347_v50 = vmul.f32 %v1338_v11, %v3372_v52  ;;  %v1352_v3 = vmul.f32 %v1338_v11, %v3374_v53 }
 0x148   : > { %2522 = vrot.lane.b32.xlu0 %v2513_v56, %s3124_s8  ;;  %v2592_v47 = vrot.slane %v3053_v51, %v3194_v9  ;;  %v1426_v11 = vsel %vm1425_vm12, %v3632_v41, %v3639_v46 }
 0x149   : > { %v660_v42 = vpop.permute.xlu1 %659 }
 0x14a   : > { %v3879_v19 = vpop.permute.xlu0 %1996  ;;  %v667_v45 = vsel %vm663_vm5, %v660_v42, %v662_v36  ;;  %v666_v49 = vsel %vm663_vm5, %v658_v54, %v660_v42  ;;  %v1265_v36 = vmul.f32 %v3596_v48, %v3380_v60 }
 0x14b   : > { %2520 = vrot.lane.b32.xlu1 %v2509_v62, %s3124_s8  ;;  %2884 = vmatprep.subr.bf16.mxu1 %v667_v45  ;;  %v1266_v62 = vpack.c.bf16 %v1256_v28, %v1256_v28  ;;  %v2604_v45 = vrot.slane %v3053_v51, %v3198_v12 }
 0x14c   : > { %1278 = vrot.lane.b32.xlu0 %v1267_v14, %s3132_s20  ;;  %2885 = vmatpush1.bf16.msra.mxu1 %v666_v49  ;;  %v2596_v14 = vrot.slane %v3053_v51, %v3192_v8  ;;  %v1270_v42 = vpack.c.bf16 %v1265_v36, %v1260_v33  ;;  %v1349_v36 = vmul.f32 %v3621_v27, %v3378_v59 }
 0x14d   : > { %v654_v56 = vpop.permute.xlu1 %653 }
 0x14e   : > { %v3889_v38 = vpop.permute.xlu0 %2000  ;;  %v664_v54 = vsel %vm663_vm5, %v654_v56, %v656_v29 }
 0x14f   : > { %2524 = vrot.lane.b32.xlu1 %v2517_v5, %s3124_s8  ;;  %2803 = vmatpush1.bf16.msra.mxu0 %v664_v54  ;;  %v1337_v5 = vsel %vm1336_vm11, %v3611_v18, %v3609_v17  ;;  %v2600_v54 = vrot.slane %v3053_v51, %v3200_v13  ;;  %v1357_v51 = vpack.c.bf16 %v1352_v3, %v1347_v50 }
 0x150   : > { %1282 = vrot.lane.b32.xlu0 %v1269_v30, %s3132_s20  ;;  %v1346_v17 = vmul.f32 %v1337_v5, %v3389_v7  ;;  %v1351_v33 = vmul.f32 %v1337_v5, %v3384_v0  ;;  %v1435_v50 = vmul.f32 %v1426_v11, %v3389_v7  ;;  %v1440_v3 = vmul.f32 %v1426_v11, %v3384_v0 }
 0x151   : > { %v3898_v2 = vpop.permute.xlu1 %1998 }
 0x152   : > { %v745_v29 = vpop.permute.xlu0 %744 }
 0x153   : > { %1280 = vrot.lane.b32.xlu1 %v1268_v40, %s3132_s20 }
 0x154   : > { %1276 = vrot.lane.b32.xlu0 %v1266_v62, %s3132_s20  ;;  %v1354_v62 = vmul.f32 %v3621_v27, %v3380_v60 }
 0x155   : > { %v3906_v23 = vpop.permute.xlu1 %2002 }
 0x156   : > { %v749_v48 = vpop.permute.xlu0 %748 }
 0x157   : > { %1284 = vrot.lane.b32.xlu1 %v1270_v42, %s3132_s20 }
 0x158   : > { %2607 = vrot.lane.b32.xlu0 %v2596_v14, %s3125_s13 }
 0x159   : > { %v747_v49 = vpop.permute.xlu1 %746 }
 0x15a   : > { %v743_v56 = vpop.permute.xlu0 %742  ;;  %v754_v28 = vsel %vm713_vm4, %v745_v29, %v747_v49 }
 0x15b   : > { %2605 = vrot.lane.b32.xlu1 %v2592_v47, %s3125_s13  ;;  %2804 = vmatprep.subr.bf16.mxu0 %v754_v28  ;;  %v753_v30 = vsel %vm713_vm4, %v743_v56, %v745_v29  ;;  %v1339_v29 = vsel %vm1336_vm11, %v3616_v24, %v3621_v27  ;;  %v755_v47 = vsel %vm713_vm4, %v747_v49, %v749_v48  ;;  %v1345_v49 = vmul.f32 0.0, %v3611_v18 }
 0x15c   : > { %2611 = vrot.lane.b32.xlu0 %v2604_v45, %s3125_s13  ;;  %2805 = vmatpush1.bf16.msra.mxu0 %v753_v30  ;;  %v1356_v45 = vpack.c.bf16 %v1351_v33, %v1346_v17  ;;  %v1348_v24 = vmul.f32 %v1339_v29, %v3398_v25  ;;  %v1353_v27 = vmul.f32 %v1339_v29, %v3400_v26  ;;  %v1434_v29 = vmul.f32 0.0, %v3632_v41 }
 0x15d   : > { %v751_v40 = vpop.permute.xlu1 %750  ;;  %v1359_v28 = vpack.c.bf16 %v1354_v62, %v1349_v36  ;;  %v1445_v17 = vpack.c.bf16 %v1440_v3, %v1435_v50  ;;  %v1427_v33 = vsel %vm1425_vm12, %v3639_v46, %v3648_v21  ;;  %v1355_v18 = vpack.c.bf16 %v1345_v49, %v1345_v49 }
 0x15e   : > { %v3934_v14 = vpop.permute.xlu0 %2085  ;;  %v756_v42 = vsel %vm713_vm4, %v749_v48, %v751_v40  ;;  %v1428_v48 = vsel %vm1425_vm12, %v3648_v21, %v3659_v20  ;;  %v1358_v30 = vpack.c.bf16 %v1353_v27, %v1348_v24  ;;  %v1444_v41 = vpack.c.bf16 %v1434_v29, %v1434_v29 }
 0x15f   : > { %2609 = vrot.lane.b32.xlu1 %v2600_v54, %s3125_s13  ;;  %2886 = vmatprep.subr.bf16.mxu1 %v756_v42  ;;  %v1437_v36 = vmul.f32 %v1428_v48, %v3398_v25  ;;  %v1442_v40 = vmul.f32 %v1428_v48, %v3400_v26  ;;  %v1441_v42 = vmul.f32 %v1427_v33, %v3374_v53  ;;  %v1574_v29 = vmul.f32 0.0, %v3690_v63 }
 0x160   : > { %1369 = vrot.lane.b32.xlu0 %v1357_v51, %s3131_s25  ;;  %2887 = vmatpush1.bf16.msra.mxu1 %v755_v47  ;;  %v1436_v51 = vmul.f32 %v1427_v33, %v3372_v52  ;;  %v1438_v24 = vmul.f32 %v3659_v20, %v3378_v59  ;;  %v1443_v27 = vmul.f32 %v3659_v20, %v3380_v60 }
 0x161   : > { %v3945_v5 = vpop.permute.xlu1 %2083  ;;  %v1447_v47 = vpack.c.bf16 %v1442_v40, %v1437_v36  ;;  %v1562_v3 = vsel %vm1464_vm13, %v3657_v15, %v3673_v35 }
 0x162   : > { %v3949_v56 = vpop.permute.xlu0 %2089  ;;  %v1446_v50 = vpack.c.bf16 %v1441_v42, %v1436_v51  ;;  %v1571_v20 = vmul.f32 %v1562_v3, %v3372_v52  ;;  %v1448_v40 = vpack.c.bf16 %v1443_v27, %v1438_v24  ;;  %v1653_v27 = vsel %vm1375_vm14, %v3747_v57, %v3765_v16 }
 0x163   : > { %1367 = vrot.lane.b32.xlu1 %v1356_v45, %s3131_s25  ;;  %v1563_v45 = vsel %vm1464_vm13, %v3673_v35, %v3668_v1  ;;  %v1576_v35 = vmul.f32 %v1562_v3, %v3374_v53  ;;  %v1575_v3 = vmul.f32 %v3657_v15, %v3384_v0 }
 0x164   : > { %1373 = vrot.lane.b32.xlu0 %v1359_v28, %s3131_s25  ;;  %v1572_v48 = vmul.f32 %v1563_v45, %v3398_v25  ;;  %v1577_v49 = vmul.f32 %v1563_v45, %v3400_v26 }
 0x165   : > { %v3957_v54 = vpop.permute.xlu1 %2087 }
 0x166   : > { %v836_v62 = vpop.permute.xlu0 %835 }
 0x167   : > { %1371 = vrot.lane.b32.xlu1 %v1358_v30, %s3131_s25 }
 0x168   : > { %1456 = vrot.lane.b32.xlu0 %v1445_v17, %s3130_s16 }
 0x169   : > { %v834_v11 = vpop.permute.xlu1 %833 }
 0x16a   : > { %v840_v46 = vpop.permute.xlu0 %839  ;;  %v843_v21 = vsel %vm624_vm3, %v834_v11, %v836_v62 }
 0x16b   : > { %1365 = vrot.lane.b32.xlu1 %v1355_v18, %s3131_s25  ;;  %2806 = vmatprep.subr.bf16.mxu0 %v843_v21  ;;  %v1564_v18 = vsel %vm1464_vm13, %v3668_v1, %v3690_v63  ;;  %v1581_v1 = vpack.c.bf16 %v1576_v35, %v1571_v20  ;;  %v1584_v63 = vpack.c.bf16 %v1574_v29, %v1574_v29 }
 0x16c   : > { %1460 = vrot.lane.b32.xlu0 %v1447_v47, %s3130_s16  ;;  %v1651_v47 = vsel %vm1375_vm14, %v3683_v44, %v3704_v55  ;;  %v1578_v21 = vmul.f32 %v1564_v18, %v3380_v60 }
 0x16d   : > { %v838_v28 = vpop.permute.xlu1 %837 }
 0x16e   : > { %v3984_v30 = vpop.permute.xlu0 %2170  ;;  %v845_v17 = vsel %vm624_vm3, %v838_v28, %v840_v46  ;;  %v844_v33 = vsel %vm624_vm3, %v836_v62, %v838_v28  ;;  %v1582_v62 = vpack.c.bf16 %v1577_v49, %v1572_v48  ;;  %v1573_v46 = vmul.f32 %v1564_v18, %v3378_v59 }
 0x16f   : > { %1458 = vrot.lane.b32.xlu1 %v1446_v50, %s3130_s16  ;;  %2888 = vmatprep.subr.bf16.mxu1 %v845_v17  ;;  %v1570_v50 = vmul.f32 %v3657_v15, %v3389_v7  ;;  %v1652_v49 = vsel %vm1375_vm14, %v3704_v55, %v3747_v57  ;;  %v1662_v17 = vmul.f32 %v1653_v27, %v3378_v59 }
 0x170   : > { %1454 = vrot.lane.b32.xlu0 %v1444_v41, %s3130_s16  ;;  %2889 = vmatpush1.bf16.msra.mxu1 %v844_v33  ;;  %v1660_v41 = vmul.f32 %v1651_v47, %v3372_v52  ;;  %v1583_v28 = vpack.c.bf16 %v1578_v21, %v1573_v46  ;;  %v1667_v33 = vmul.f32 %v1653_v27, %v3380_v60  ;;  %v1663_v21 = vmul.f32 0.0, %v3765_v16 }
 0x171   : > { %v832_v36 = vpop.permute.xlu1 %831  ;;  %v1580_v15 = vpack.c.bf16 %v1575_v3, %v1570_v50  ;;  %v1661_v55 = vmul.f32 %v1652_v49, %v3398_v25  ;;  %v1666_v57 = vmul.f32 %v1652_v49, %v3400_v26  ;;  %v4053_v3 = vld [vmem:[%s4481_s3] sm:$0xff] }
 0x172   : > { %v3996_v51 = vpop.permute.xlu0 %2174  ;;  %v842_v42 = vsel %vm624_vm3, %v832_v36, %v834_v11  ;;  %v1665_v11 = vmul.f32 %v1651_v47, %v3374_v53  ;;  %v1659_v36 = vmul.f32 %v3683_v44, %v3389_v7  ;;  %v1672_v18 = vpack.c.bf16 %v1667_v33, %v1662_v17 }
 0x173   : > { %1462 = vrot.lane.b32.xlu1 %v1448_v40, %s3130_s16  ;;  %2807 = vmatpush1.bf16.msra.mxu0 %v842_v42  ;;  %v1664_v40 = vmul.f32 %v3683_v44, %v3384_v0  ;;  %v1741_v47 = vsel %vm1286_vm15, %v3777_v37, %v3769_v34  ;;  %v1671_v44 = vpack.c.bf16 %v1666_v57, %v1661_v55 }
 0x174   : > { %1594 = vrot.lane.b32.xlu0 %v1582_v62, %s3129_s10  ;;  %v1670_v35 = vpack.c.bf16 %v1665_v11, %v1660_v41  ;;  %v1740_v41 = vsel %vm1286_vm15, %v3755_v43, %v3777_v37  ;;  %v1750_v11 = vmul.f32 %v1741_v47, %v3398_v25  ;;  %v1755_v27 = vmul.f32 %v1741_v47, %v3400_v26 }
 0x175   : > { %v4006_v45 = vpop.permute.xlu1 %2172  ;;  %v3055_v37 = vcombine.high %v4053_v3, %v4053_v3  ;;  %v1749_v49 = vmul.f32 %v1740_v41, %v3372_v52  ;;  %v1754_v17 = vmul.f32 %v1740_v41, %v3374_v53  ;;  %v1831_v47 = vsel %vm1197_vm9, %v3794_v22, %v3810_v32 }
 0x176   : > { %v923_v24 = vpop.permute.xlu0 %922 }
 0x177   : > { %1592 = vrot.lane.b32.xlu1 %v1581_v1, %s3129_s10  ;;  %2910 = vmatprep.mubr.bf16.mxu1 %v3055_v37  ;;  %v1759_v55 = vpack.c.bf16 %v1754_v17, %v1749_v49 }
 0x178   : > { %1598 = vrot.lane.b32.xlu0 %v1584_v63, %s3129_s10  ;;  %v1669_v63 = vpack.c.bf16 %v1664_v40, %v1659_v36  ;;  %2828 = vmatprep.mubr.bf16.mxu0 %v3055_v37  ;;  %v1829_v40 = vsel %vm1197_vm9, %v3784_v31, %v3802_v10  ;;  %v1837_v37 = vmul.f32 %v3784_v31, %v3389_v7 }
 0x179   : > { %v4019_v48 = vpop.permute.xlu1 %2176 }
 0x17a   : > { %v927_v20 = vpop.permute.xlu0 %926 }
 0x17b   : > { %1596 = vrot.lane.b32.xlu1 %v1583_v28, %s3129_s10  ;;  %v1673_v28 = vpack.c.bf16 %v1663_v21, %v1663_v21 }
 0x17c   : > { %1681 = vrot.lane.b32.xlu0 %v1670_v35, %s3128_s28  ;;  %v1760_v35 = vpack.c.bf16 %v1755_v27, %v1750_v11  ;;  %v1840_v11 = vmul.f32 %v1831_v47, %v3378_v59  ;;  %v1845_v27 = vmul.f32 %v1831_v47, %v3380_v60 }
 0x17d   : > { %v925_v29 = vpop.permute.xlu1 %924 }
 0x17e   : > { %v921_v62 = vpop.permute.xlu0 %920  ;;  %v932_v42 = vsel %vm535_vm2, %v923_v24, %v925_v29  ;;  %v933_v16 = vsel %vm535_vm2, %v925_v29, %v927_v20  ;;  %v1850_v17 = vpack.c.bf16 %v1845_v27, %v1840_v11  ;;  %v2004_v11 = vsel %vm446_vm1, %v3879_v19, %v3898_v2 }
 0x17f   : > { %1590 = vrot.lane.b32.xlu1 %v1580_v15, %s3129_s10  ;;  %2808 = vmatprep.subr.bf16.mxu0 %v932_v42  ;;  %v931_v46 = vsel %vm535_vm2, %v921_v62, %v923_v24  ;;  %v1752_v15 = vmul.f32 0.0, %v3791_v4  ;;  %v1843_v62 = vmul.f32 %v1829_v40, %v3374_v53 }
 0x180   : > { %1685 = vrot.lane.b32.xlu0 %v1672_v18, %s3128_s28  ;;  %2809 = vmatpush1.bf16.msra.mxu0 %v931_v46  ;;  %v1748_v46 = vmul.f32 %v3755_v43, %v3389_v7 }
 0x181   : > { %v929_v1 = vpop.permute.xlu1 %928 }
 0x182   : > { %v4047_v50 = vpop.permute.xlu0 %2259  ;;  %v934_v24 = vsel %vm535_vm2, %v927_v20, %v929_v1  ;;  %v1742_v20 = vsel %vm1286_vm15, %v3769_v34, %v3791_v4  ;;  %v1762_v34 = vpack.c.bf16 %v1752_v15, %v1752_v15  ;;  %v1838_v4 = vmul.f32 %v1829_v40, %v3372_v52 }
 0x183   : > { %1683 = vrot.lane.b32.xlu1 %v1671_v44, %s3128_s28  ;;  %2890 = vmatprep.subr.bf16.mxu1 %v934_v24  ;;  %v1751_v57 = vmul.f32 %v1742_v20, %v3378_v59  ;;  %v1756_v29 = vmul.f32 %v1742_v20, %v3380_v60  ;;  %v1753_v44 = vmul.f32 %v3755_v43, %v3384_v0 }
 0x184   : > { %1679 = vrot.lane.b32.xlu0 %v1669_v63, %s3128_s28  ;;  %2891 = vmatpush1.bf16.msra.mxu1 %v933_v16  ;;  %v1830_v1 = vsel %vm1197_vm9, %v3802_v10, %v3794_v22  ;;  %v1848_v41 = vpack.c.bf16 %v1843_v62, %v1838_v4  ;;  %v1842_v22 = vmul.f32 %v3784_v31, %v3384_v0 }
 0x185   : > { %v4062_v33 = vpop.permute.xlu1 %2257  ;;  %v1761_v21 = vpack.c.bf16 %v1756_v29, %v1751_v57  ;;  %v1758_v43 = vpack.c.bf16 %v1753_v44, %v1748_v46  ;;  %v1839_v10 = vmul.f32 %v1830_v1, %v3398_v25  ;;  %v1918_v40 = vsel %vm357_vm0, %v3838_v6, %v3857_v61 }
 0x186   : > { %v4068_v36 = vpop.permute.xlu0 %2263  ;;  %v1847_v29 = vpack.c.bf16 %v1842_v22, %v1837_v37  ;;  %v1927_v4 = vmul.f32 %v1918_v40, %v3398_v25  ;;  %v1932_v62 = vmul.f32 %v1918_v40, %v3400_v26 }
 0x187   : > { %1687 = vrot.lane.b32.xlu1 %v1673_v28, %s3128_s28  ;;  %v1844_v28 = vmul.f32 %v1830_v1, %v3400_v26  ;;  %v1919_v1 = vsel %vm357_vm0, %v3857_v61, %v3851_v39  ;;  %v2018_v61 = vmul.f32 %v2004_v11, %v3374_v53 }
 0x188   : > { %1772 = vrot.lane.b32.xlu0 %v1760_v35, %s3127_s24  ;;  %v1928_v27 = vmul.f32 %v1919_v1, %v3378_v59 }
 0x189   : > { %v4077_v18 = vpop.permute.xlu1 %2261  ;;  %v1849_v31 = vpack.c.bf16 %v1844_v28, %v1839_v10  ;;  %v2006_v10 = vsel %vm446_vm1, %v3889_v38, %v3906_v23  ;;  %v1925_v28 = vmul.f32 %v3846_v58, %v3389_v7 }
 0x18a   : > { %v1014_v42 = vpop.permute.xlu0 %1013 }
 0x18b   : > { %1770 = vrot.lane.b32.xlu1 %v1759_v55, %s3127_s24  ;;  %v1841_v55 = vmul.f32 0.0, %v3810_v32 }
 0x18c   : > { %1776 = vrot.lane.b32.xlu0 %v1762_v34, %s3127_s24  ;;  %v1917_v34 = vsel %vm357_vm0, %v3846_v58, %v3838_v6  ;;  %v1929_v6 = vmul.f32 0.0, %v3851_v39  ;;  %v2013_v39 = vmul.f32 %v2004_v11, %v3372_v52 }
 0x18d   : > { %v1012_v63 = vpop.permute.xlu1 %1011  ;;  %v1851_v32 = vpack.c.bf16 %v1841_v55, %v1841_v55  ;;  %v1926_v46 = vmul.f32 %v1917_v34, %v3372_v52  ;;  %v1931_v44 = vmul.f32 %v1917_v34, %v3374_v53  ;;  %v2020_v55 = vmul.f32 %v2006_v10, %v3380_v60 }
 0x18e   : > { %v1018_v24 = vpop.permute.xlu0 %1017  ;;  %v1021_v16 = vsel %vm446_vm1, %v1012_v63, %v1014_v42  ;;  %v1939_v37 = vpack.c.bf16 %v1929_v6, %v1929_v6  ;;  %v2023_v40 = vpack.c.bf16 %v2018_v61, %v2013_v39  ;;  %v2092_v6 = vsel %vm535_vm2, %v3934_v14, %v3957_v54 }
 0x18f   : > { %1774 = vrot.lane.b32.xlu1 %v1761_v21, %s3127_s24  ;;  %2810 = vmatprep.subr.bf16.mxu0 %v1021_v16 }
 0x190   : > { %1859 = vrot.lane.b32.xlu0 %v1848_v41, %s3126_s17  ;;  %v1937_v41 = vpack.c.bf16 %v1932_v62, %v1927_v4  ;;  %v2012_v62 = vmul.f32 %v3879_v19, %v3389_v7 }
 0x191   : > { %v1016_v49 = vpop.permute.xlu1 %1015 }
 0x192   : > { %v4104_v35 = vpop.permute.xlu0 %2344  ;;  %v1023_v20 = vsel %vm446_vm1, %v1016_v49, %v1018_v24  ;;  %v1022_v15 = vsel %vm446_vm1, %v1014_v42, %v1016_v49  ;;  %v1933_v24 = vmul.f32 %v1919_v1, %v3380_v60  ;;  %v1930_v49 = vmul.f32 %v3846_v58, %v3384_v0 }
 0x193   : > { %1768 = vrot.lane.b32.xlu1 %v1758_v43, %s3127_s24  ;;  %2892 = vmatprep.subr.bf16.mxu1 %v1023_v20  ;;  %v1936_v43 = vpack.c.bf16 %v1931_v44, %v1926_v46  ;;  %v2005_v20 = vsel %vm446_vm1, %v3898_v2, %v3889_v38 }
 0x194   : > { %1863 = vrot.lane.b32.xlu0 %v1850_v17, %s3126_s17  ;;  %2893 = vmatpush1.bf16.msra.mxu1 %v1022_v15  ;;  %v1938_v17 = vpack.c.bf16 %v1933_v24, %v1928_v27  ;;  %v2014_v58 = vmul.f32 %v2005_v20, %v3398_v25  ;;  %v2019_v38 = vmul.f32 %v2005_v20, %v3400_v26 }
 0x195   : > { %v1010_v57 = vpop.permute.xlu1 %1009  ;;  %v1935_v4 = vpack.c.bf16 %v1930_v49, %v1925_v28  ;;  %v2101_v27 = vmul.f32 %v2092_v6, %v3398_v25  ;;  %v2106_v24 = vmul.f32 %v2092_v6, %v3400_v26  ;;  %v2178_v49 = vsel %vm624_vm3, %v3984_v30, %v4006_v45 }
 0x196   : > { %v4119_v42 = vpop.permute.xlu0 %2348  ;;  %v1020_v47 = vsel %vm446_vm1, %v1010_v57, %v1012_v63 }
 0x197   : > { %1861 = vrot.lane.b32.xlu1 %v1849_v31, %s3126_s17  ;;  %2811 = vmatpush1.bf16.msra.mxu0 %v1020_v47  ;;  %v2015_v31 = vmul.f32 %v2006_v10, %v3378_v59  ;;  %v2017_v47 = vmul.f32 %v3879_v19, %v3384_v0  ;;  %v2016_v19 = vmul.f32 0.0, %v3906_v23  ;;  %v2093_v10 = vsel %vm535_vm2, %v3957_v54, %v3949_v56 }
 0x198   : > { %1857 = vrot.lane.b32.xlu0 %v1847_v29, %s3126_s17  ;;  %v2111_v28 = vpack.c.bf16 %v2106_v24, %v2101_v27  ;;  %v2191_v27 = vmul.f32 %v3984_v30, %v3384_v0 }
 0x199   : > { %v4126_v21 = vpop.permute.xlu1 %2346  ;;  %v2026_v23 = vpack.c.bf16 %v2016_v19, %v2016_v19 }
 0x19a   : > { %v1101_v63 = vpop.permute.xlu0 %1100 }
 0x19b   : > { %1865 = vrot.lane.b32.xlu1 %v1851_v32, %s3126_s17  ;;  %v2025_v32 = vpack.c.bf16 %v2020_v55, %v2015_v31  ;;  %v2187_v31 = vmul.f32 %v2178_v49, %v3372_v52  ;;  %v2192_v55 = vmul.f32 %v2178_v49, %v3374_v53 }
 0x19c   : > { %1949 = vrot.lane.b32.xlu0 %v1937_v41, %s3125_s13  ;;  %v2024_v41 = vpack.c.bf16 %v2019_v38, %v2014_v58  ;;  %v2099_v58 = vmul.f32 %v3945_v5, %v3389_v7  ;;  %v2104_v38 = vmul.f32 %v3945_v5, %v3384_v0 }
 0x19d   : > { %v4139_v16 = vpop.permute.xlu1 %2350 }
 0x19e   : > { %v1105_v22 = vpop.permute.xlu0 %1104  ;;  %v2109_v19 = vpack.c.bf16 %v2104_v38, %v2099_v58 }
 0x19f   : > { %1947 = vrot.lane.b32.xlu1 %v1936_v43, %s3125_s13 }
 0x1a0   : > { %1953 = vrot.lane.b32.xlu0 %v1939_v37, %s3125_s13  ;;  %v2022_v37 = vpack.c.bf16 %v2017_v47, %v2012_v62  ;;  %v2197_v62 = vpack.c.bf16 %v2192_v55, %v2187_v31  ;;  %v2277_v55 = vmul.f32 0.0, %v4068_v36 }
 0x1a1   : > { %v1103_v15 = vpop.permute.xlu1 %1102 }
 0x1a2   : > { %v1099_v57 = vpop.permute.xlu0 %1098  ;;  %v1110_v29 = vsel %vm357_vm0, %v1101_v63, %v1103_v15  ;;  %v1111_v1 = vsel %vm357_vm0, %v1103_v15, %v1105_v22  ;;  %v2102_v15 = vmul.f32 %v2093_v10, %v3378_v59 }
 0x1a3   : > { %1951 = vrot.lane.b32.xlu1 %v1938_v17, %s3125_s13  ;;  %2812 = vmatprep.subr.bf16.mxu0 %v1110_v29  ;;  %v1109_v34 = vsel %vm357_vm0, %v1099_v57, %v1101_v63  ;;  %v2091_v63 = vsel %vm535_vm2, %v3945_v5, %v3934_v14  ;;  %v2103_v14 = vmul.f32 0.0, %v3949_v56 }
 0x1a4   : > { %2034 = vrot.lane.b32.xlu0 %v2023_v40, %s3124_s8  ;;  %2813 = vmatpush1.bf16.msra.mxu0 %v1109_v34  ;;  %v2100_v39 = vmul.f32 %v2091_v63, %v3372_v52  ;;  %v2105_v61 = vmul.f32 %v2091_v63, %v3374_v53  ;;  %v2107_v40 = vmul.f32 %v2093_v10, %v3380_v60 }
 0x1a5   : > { %v1107_v2 = vpop.permute.xlu1 %1106  ;;  %v2113_v54 = vpack.c.bf16 %v2103_v14, %v2103_v14  ;;  %v2180_v34 = vsel %vm624_vm3, %v3996_v51, %v4019_v48  ;;  %v2186_v63 = vmul.f32 %v3984_v30, %v3389_v7  ;;  %v2190_v14 = vmul.f32 0.0, %v4019_v48 }
 0x1a6   : > { %v4167_v46 = vpop.permute.xlu0 %2433  ;;  %v1112_v44 = vsel %vm357_vm0, %v1105_v22, %v1107_v2  ;;  %v2110_v20 = vpack.c.bf16 %v2105_v61, %v2100_v39  ;;  %v2112_v2 = vpack.c.bf16 %v2107_v40, %v2102_v15  ;;  %v2266_v61 = vsel %vm713_vm4, %v4047_v50, %v4077_v18 }
 0x1a7   : > { %1945 = vrot.lane.b32.xlu1 %v1935_v4, %s3125_s13  ;;  %2894 = vmatprep.subr.bf16.mxu1 %v1112_v44  ;;  %v2179_v4 = vsel %vm624_vm3, %v4006_v45, %v3996_v51  ;;  %v2194_v44 = vmul.f32 %v2180_v34, %v3380_v60  ;;  %v2265_v30 = vsel %vm713_vm4, %v4062_v33, %v4047_v50 }
 0x1a8   : > { %2038 = vrot.lane.b32.xlu0 %v2025_v32, %s3124_s8  ;;  %2895 = vmatpush1.bf16.msra.mxu1 %v1111_v1  ;;  %v2189_v32 = vmul.f32 %v2180_v34, %v3378_v59  ;;  %v2188_v5 = vmul.f32 %v2179_v4, %v3398_v25  ;;  %v2193_v51 = vmul.f32 %v2179_v4, %v3400_v26 }
 0x1a9   : > { %v4180_v11 = vpop.permute.xlu1 %2431  ;;  %v2280_v49 = vmul.f32 %v2266_v61, %v3400_v26  ;;  %v2200_v15 = vpack.c.bf16 %v2190_v14, %v2190_v14  ;;  %v2274_v40 = vmul.f32 %v2265_v30, %v3372_v52  ;;  %v2279_v48 = vmul.f32 %v2265_v30, %v3374_v53 }
 0x1aa   : > { %v4184_v43 = vpop.permute.xlu0 %2437  ;;  %v2199_v24 = vpack.c.bf16 %v2194_v44, %v2189_v32  ;;  %v2267_v50 = vsel %vm713_vm4, %v4077_v18, %v4068_v36  ;;  %v2273_v44 = vmul.f32 %v4062_v33, %v3389_v7  ;;  %v2365_v14 = vmul.f32 %v4104_v35, %v3384_v0 }
 0x1ab   : > { %2036 = vrot.lane.b32.xlu1 %v2024_v41, %s3124_s8  ;;  %v2281_v34 = vmul.f32 %v2267_v50, %v3380_v60  ;;  %v2284_v38 = vpack.c.bf16 %v2279_v48, %v2274_v40 }
 0x1ac   : > { %2032 = vrot.lane.b32.xlu0 %v2022_v37, %s3124_s8 }
 0x1ad   : > { %v4190_v22 = vpop.permute.xlu1 %2435 }
 0x1ae   : > { %v1192_v17 = vpop.permute.xlu0 %1191 }
 0x1af   : > { %2040 = vrot.lane.b32.xlu1 %v2026_v23, %s3124_s8  ;;  %v2198_v23 = vpack.c.bf16 %v2193_v51, %v2188_v5  ;;  %v2353_v5 = vsel %vm663_vm5, %v4126_v21, %v4119_v42 }
 0x1b0   : > { %2123 = vrot.lane.b32.xlu0 %v2111_v28, %s3123_s29  ;;  %v2275_v28 = vmul.f32 %v2266_v61, %v3398_v25 }
 0x1b1   : > { %v1190_v56 = vpop.permute.xlu1 %1189 }
 0x1b2   : > { %v1196_v57 = vpop.permute.xlu0 %1195  ;;  %v1199_v29 = vsel %vm1197_vm9, %v1190_v56, %v1192_v17 }
 0x1b3   : > { %2121 = vrot.lane.b32.xlu1 %v2110_v20, %s3123_s29  ;;  %2814 = vmatprep.subr.bf16.mxu0 %v1199_v29  ;;  %v2196_v20 = vpack.c.bf16 %v2191_v27, %v2186_v63  ;;  %v2276_v29 = vmul.f32 %v2267_v50, %v3378_v59 }
 0x1b4   : > { %2127 = vrot.lane.b32.xlu0 %v2113_v54, %s3123_s29 }
 0x1b5   : > { %v1194_v47 = vpop.permute.xlu1 %1193 }
 0x1b6   : > { %v4220_v6 = vpop.permute.xlu0 %2518  ;;  %v1201_v1 = vsel %vm1197_vm9, %v1194_v47, %v1196_v57  ;;  %v1200_v41 = vsel %vm1197_vm9, %v1192_v17, %v1194_v47  ;;  %v2352_v57 = vsel %vm663_vm5, %v4104_v35, %v4126_v21  ;;  %v2354_v47 = vsel %vm663_vm5, %v4119_v42, %v4139_v16 }
 0x1b7   : > { %2125 = vrot.lane.b32.xlu1 %v2112_v2, %s3123_s29  ;;  %2896 = vmatprep.subr.bf16.mxu1 %v1201_v1  ;;  %v2287_v2 = vpack.c.bf16 %v2277_v55, %v2277_v55  ;;  %v2361_v4 = vmul.f32 %v2352_v57, %v3372_v52  ;;  %v2366_v36 = vmul.f32 %v2352_v57, %v3374_v53  ;;  %v2451_v57 = vmul.f32 0.0, %v4184_v43 }
 0x1b8   : > { %2208 = vrot.lane.b32.xlu0 %v2197_v62, %s3122_s26  ;;  %2897 = vmatpush1.bf16.msra.mxu1 %v1200_v41  ;;  %v2278_v1 = vmul.f32 %v4062_v33, %v3384_v0  ;;  %v2286_v41 = vpack.c.bf16 %v2281_v34, %v2276_v29  ;;  %v2368_v63 = vmul.f32 %v2354_v47, %v3380_v60 }
 0x1b9   : > { %v1188_v45 = vpop.permute.xlu1 %1187  ;;  %v2362_v42 = vmul.f32 %v2353_v5, %v3398_v25  ;;  %v2367_v21 = vmul.f32 %v2353_v5, %v3400_v26 }
 0x1ba   : > { %v4232_v37 = vpop.permute.xlu0 %2522  ;;  %v1198_v39 = vsel %vm1197_vm9, %v1188_v45, %v1190_v56  ;;  %v2285_v56 = vpack.c.bf16 %v2280_v49, %v2275_v28  ;;  %v2371_v45 = vpack.c.bf16 %v2366_v36, %v2361_v4  ;;  %v2283_v61 = vpack.c.bf16 %v2278_v1, %v2273_v44 }
 0x1bb   : > { %2119 = vrot.lane.b32.xlu1 %v2109_v19, %s3123_s29  ;;  %2815 = vmatpush1.bf16.msra.mxu0 %v1198_v39  ;;  %v2363_v19 = vmul.f32 %v2354_v47, %v3378_v59  ;;  %v2440_v49 = vsel %vm574_vm6, %v4167_v46, %v4190_v22  ;;  %v2461_v36 = vpack.c.bf16 %v2451_v57, %v2451_v57  ;;  %vm2792_vm9 = vcmask 392192  }
 0x1bc   : > { %2212 = vrot.lane.b32.xlu0 %v2199_v24, %s3122_s26  ;;  %v2449_v40 = vmul.f32 %v2440_v49, %v3398_v25  ;;  %v2454_v48 = vmul.f32 %v2440_v49, %v3400_v26  ;;  %v2534_v49 = vmul.f32 %v4220_v6, %v3389_v7 }
 0x1bd   : > { %v4241_v10 = vpop.permute.xlu1 %2520  ;;  %v2373_v30 = vpack.c.bf16 %v2368_v63, %v2363_v19 }
 0x1be   : > { %v1279_v17 = vpop.permute.xlu0 %1278  ;;  %v2459_v34 = vpack.c.bf16 %v2454_v48, %v2449_v40 }
 0x1bf   : > { %2210 = vrot.lane.b32.xlu1 %v2198_v23, %s3122_s26  ;;  %v2360_v23 = vmul.f32 %v4104_v35, %v3389_v7  ;;  %v2439_v35 = vsel %vm574_vm6, %v4180_v11, %v4167_v46  ;;  %v2441_v46 = vsel %vm574_vm6, %v4190_v22, %v4184_v43  ;;  %v3040_v22 = vld [vmem:[%s4483_s5 + $0x34] sm:$0xf] }
 0x1c0   : > { %2206 = vrot.lane.b32.xlu0 %v2196_v20, %s3122_s26  ;;  %v2364_v20 = vmul.f32 0.0, %v4139_v16  ;;  %v2453_v16 = vmul.f32 %v2439_v35, %v3374_v53  ;;  %v1495_v19 = vrot.slane %v3040_v22, %v3192_v8 }
 0x1c1   : > { %v4252_v31 = vpop.permute.xlu1 %2524  ;;  %v2370_v50 = vpack.c.bf16 %v2365_v14, %v2360_v23 }
 0x1c2   : > { %v1283_v54 = vpop.permute.xlu0 %1282  ;;  %v2528_v5 = vsel %vm485_vm7, %v4232_v37, %v4252_v31  ;;  %v1513_v8 = vmul.f32 %v1495_v19, %v3374_v53 }
 0x1c3   : > { %2214 = vrot.lane.b32.xlu1 %v2200_v15, %s3122_s26  ;;  %v2542_v23 = vmul.f32 %v2528_v5, %v3380_v60 }
 0x1c4   : > { %2297 = vrot.lane.b32.xlu0 %v2285_v56, %s3121_s23  ;;  %v2374_v56 = vpack.c.bf16 %v2364_v20, %v2364_v20 }
 0x1c5   : > { %v1281_v58 = vpop.permute.xlu1 %1280 }
 0x1c6   : > { %v1277_v18 = vpop.permute.xlu0 %1276  ;;  %v1288_v62 = vsel %vm1286_vm15, %v1279_v17, %v1281_v58  ;;  %v1289_v33 = vsel %vm1286_vm15, %v1281_v58, %v1283_v54 }
 0x1c7   : > { %2295 = vrot.lane.b32.xlu1 %v2284_v38, %s3121_s23  ;;  %2816 = vmatprep.subr.bf16.mxu0 %v1288_v62  ;;  %v1287_v32 = vsel %vm1286_vm15, %v1277_v18, %v1279_v17  ;;  %v2372_v17 = vpack.c.bf16 %v2367_v21, %v2362_v42  ;;  %v2450_v18 = vmul.f32 %v2441_v46, %v3378_v59 }
 0x1c8   : > { %2301 = vrot.lane.b32.xlu0 %v2287_v2, %s3121_s23  ;;  %2817 = vmatpush1.bf16.msra.mxu0 %v1287_v32  ;;  %v2526_v2 = vsel %vm485_vm7, %v4220_v6, %v4241_v10  ;;  %v2455_v62 = vmul.f32 %v2441_v46, %v3380_v60  ;;  %v1491_v42 = vrot.slane %v3040_v22, %v3194_v9 }
 0x1c9   : > { %v1285_v51 = vpop.permute.xlu1 %1284  ;;  %v2535_v47 = vmul.f32 %v2526_v2, %v3372_v52  ;;  %v2540_v32 = vmul.f32 %v2526_v2, %v3374_v53 }
 0x1ca   : > { %v4283_v27 = vpop.permute.xlu0 %2607  ;;  %v1290_v24 = vsel %vm1286_vm15, %v1283_v54, %v1285_v51  ;;  %v2448_v54 = vmul.f32 %v2439_v35, %v3372_v52  ;;  %v2447_v51 = vmul.f32 %v4180_v11, %v3389_v7  ;;  %v2460_v63 = vpack.c.bf16 %v2455_v62, %v2450_v18 }
 0x1cb   : > { %2299 = vrot.lane.b32.xlu1 %v2286_v41, %s3121_s23  ;;  %2898 = vmatprep.subr.bf16.mxu1 %v1290_v24  ;;  %v2527_v24 = vsel %vm485_vm7, %v4241_v10, %v4232_v37  ;;  %v2545_v21 = vpack.c.bf16 %v2540_v32, %v2535_v47  ;;  %v1509_v37 = vmul.f32 %v1495_v19, %v3372_v52 }
 0x1cc   : > { %2382 = vrot.lane.b32.xlu0 %v2371_v45, %s3120_s18  ;;  %2899 = vmatpush1.bf16.msra.mxu1 %v1289_v33  ;;  %v2458_v4 = vpack.c.bf16 %v2453_v16, %v2448_v54  ;;  %v2452_v45 = vmul.f32 %v4180_v11, %v3384_v0  ;;  %v1512_v9 = vmul.f32 %v1491_v42, %v3384_v0 }
 0x1cd   : > { %v4291_v39 = vpop.permute.xlu1 %2605  ;;  %v1503_v10 = vrot.slane %v3040_v22, %v3198_v12  ;;  %v2536_v20 = vmul.f32 %v2527_v24, %v3398_v25  ;;  %v2541_v35 = vmul.f32 %v2527_v24, %v3400_v26  ;;  %v1517_v54 = vpack.c.bf16 %v1513_v8, %v1509_v37 }
 0x1ce   : > { %v4297_v28 = vpop.permute.xlu0 %2611 }
 0x1cf   : > { %2293 = vrot.lane.b32.xlu1 %v2283_v61, %s3121_s23  ;;  %v2537_v61 = vmul.f32 %v2528_v5, %v3378_v59  ;;  %v1511_v16 = vmul.f32 %v1503_v10, %v3378_v59  ;;  %v1515_v57 = vmul.f32 %v1503_v10, %v3380_v60 }
 0x1d0   : > { %2386 = vrot.lane.b32.xlu0 %v2373_v30, %s3120_s18  ;;  %v2457_v30 = vpack.c.bf16 %v2452_v45, %v2447_v51 }
 0x1d1   : > { %v4305_v15 = vpop.permute.xlu1 %2609  ;;  %v2547_v48 = vpack.c.bf16 %v2542_v23, %v2537_v61  ;;  %v2773_v61 = vld [vmem:[%s4482_s4] sm:$0xff] }
 0x1d2   : > { %v1370_v55 = vpop.permute.xlu0 %1369  ;;  %v2614_v12 = vsel %vm396_vm8, %v4283_v27, %v4305_v15 }
 0x1d3   : > { %2384 = vrot.lane.b32.xlu1 %v2372_v17, %s3120_s18  ;;  %v2539_v17 = vmul.f32 %v4220_v6, %v3384_v0  ;;  %v2628_v18 = vmul.f32 %v2614_v12, %v3400_v26 }
 0x1d4   : > { %2380 = vrot.lane.b32.xlu0 %v2370_v50, %s3120_s18 }
 0x1d5   : > { %v1368_v29 = vpop.permute.xlu1 %1367  ;;  %v2544_v46 = vpack.c.bf16 %v2539_v17, %v2534_v49 }
 0x1d6   : > { %v1374_v58 = vpop.permute.xlu0 %1373  ;;  %v1377_v38 = vsel %vm1375_vm14, %v1368_v29, %v1370_v55 }
 0x1d7   : > { %2388 = vrot.lane.b32.xlu1 %v2374_v56, %s3120_s18  ;;  %2818 = vmatprep.subr.bf16.mxu0 %v1377_v38  ;;  %v1508_v56 = vmul.f32 %v1491_v42, %v3389_v7  ;;  %v2621_v42 = vmul.f32 %v4291_v39, %v3389_v7 }
 0x1d8   : > { %2471 = vrot.lane.b32.xlu0 %v2459_v34, %s3119_s15  ;;  %v2546_v34 = vpack.c.bf16 %v2541_v35, %v2536_v20 }
 0x1d9   : > { %v1372_v43 = vpop.permute.xlu1 %1371  ;;  %v1516_v2 = vpack.c.bf16 %v1512_v9, %v1508_v56  ;;  %v3054_v9 = vcombine.low %v4053_v3, %v4053_v3 }
 0x1da   : > { %v1457_v44 = vpop.permute.xlu0 %1456  ;;  %v1379_v1 = vsel %vm1375_vm14, %v1372_v43, %v1374_v58  ;;  %v1378_v41 = vsel %vm1375_vm14, %v1370_v55, %v1372_v43  ;;  %v2538_v58 = vmul.f32 0.0, %v4252_v31 }
 0x1db   : > { %2469 = vrot.lane.b32.xlu1 %v2458_v4, %s3119_s15  ;;  %2900 = vmatprep.subr.bf16.mxu1 %v1379_v1  ;;  %v2613_v4 = vsel %vm396_vm8, %v4291_v39, %v4283_v27 }
 0x1dc   : > { %2475 = vrot.lane.b32.xlu0 %v2461_v36, %s3119_s15  ;;  %2901 = vmatpush1.bf16.msra.mxu1 %v1378_v41  ;;  %v2623_v36 = vmul.f32 %v2614_v12, %v3398_v25  ;;  %v2548_v47 = vpack.c.bf16 %v2538_v58, %v2538_v58  ;;  %v2622_v27 = vmul.f32 %v2613_v4, %v3372_v52  ;;  %v2625_v41 = vmul.f32 0.0, %v4297_v28 }
 0x1dd   : > { %v1366_v33 = vpop.permute.xlu1 %1365  ;;  %v2627_v32 = vmul.f32 %v2613_v4, %v3374_v53 }
 0x1de   : > { %v1461_v14 = vpop.permute.xlu0 %1460  ;;  %v1376_v11 = vsel %vm1375_vm14, %v1366_v33, %v1368_v29  ;;  %v1499_v29 = vrot.slane %v3040_v22, %v3200_v13  ;;  %v1519_v22 = vpack.c.bf16 %v1515_v57, %v1511_v16  ;;  %v2633_v5 = vpack.c.bf16 %v2628_v18, %v2623_v36 }
 0x1df   : > { %2473 = vrot.lane.b32.xlu1 %v2460_v63, %s3119_s15  ;;  %2819 = vmatpush1.bf16.msra.mxu0 %v1376_v11  ;;  %v2632_v53 = vpack.c.bf16 %v2627_v32, %v2622_v27  ;;  %v2635_v24 = vpack.c.bf16 %v2625_v41, %v2625_v41 }
 0x1e0   : > { %2556 = vrot.lane.b32.xlu0 %v2545_v21, %s3118_s12  ;;  %v1514_v13 = vmul.f32 %v1499_v29, %v3400_v26  ;;  %v1510_v1 = vmul.f32 %v1499_v29, %v3398_v25  ;;  %v2615_v26 = vsel %vm396_vm8, %v4305_v15, %v4297_v28 }
 0x1e1   : > { %v1459_v40 = vpop.permute.xlu1 %1458  ;;  %v2624_v25 = vmul.f32 %v2615_v26, %v3378_v59  ;;  %v2629_v19 = vmul.f32 %v2615_v26, %v3380_v60  ;;  %v2626_v59 = vmul.f32 %v4291_v39, %v3384_v0  ;;  %v4417_v39 = vld [vmem:[%s4481_s3 + $0x8] sm:$0xff] }
 0x1e2   : > { %v1455_v55 = vpop.permute.xlu0 %1454  ;;  %v1466_v50 = vsel %vm1464_vm13, %v1457_v44, %v1459_v40  ;;  %v1467_v31 = vsel %vm1464_vm13, %v1459_v40, %v1461_v14  ;;  %v1518_v52 = vpack.c.bf16 %v1514_v13, %v1510_v1  ;;  %v3057_v17 = vcombine.high %v4417_v39, %v4417_v39 }
 0x1e3   : > { %2467 = vrot.lane.b32.xlu1 %v2457_v30, %s3119_s15  ;;  %2820 = vmatprep.subr.bf16.mxu0 %v1466_v50  ;;  %v1465_v6 = vsel %vm1464_vm13, %v1455_v55, %v1457_v44  ;;  %v2634_v60 = vpack.c.bf16 %v2629_v19, %v2624_v25  ;;  %v2631_v11 = vpack.c.bf16 %v2626_v59, %v2621_v42 }
 0x1e4   : > { %2560 = vrot.lane.b32.xlu0 %v2547_v48, %s3118_s12  ;;  %2821 = vmatpush1.bf16.msra.mxu0 %v1465_v6 }
 0x1e5   : > { %2822 = vmatprep.subr.bf16.mxu0 %v1517_v54  ;;  %v1463_v38 = vpop.permute.xlu1 %1462 }
 0x1e6   : > { %v1595_v62 = vpop.permute.xlu0 %1594  ;;  %v1468_v43 = vsel %vm1464_vm13, %v1461_v14, %v1463_v38 }
 0x1e7   : > { %2558 = vrot.lane.b32.xlu1 %v2546_v34, %s3118_s12  ;;  %2902 = vmatprep.subr.bf16.mxu1 %v1468_v43 }
 0x1e8   : > { %2554 = vrot.lane.b32.xlu0 %v2544_v46, %s3118_s12  ;;  %2823 = vmatpush1.bf16.msra.mxu0 %v1516_v2 }
 0x1e9   : > { %2903 = vmatpush1.bf16.msra.mxu1 %v1467_v31  ;;  %v1593_v44 = vpop.permute.xlu1 %1592 }
 0x1ea   : > { %2904 = vmatprep.subr.bf16.mxu1 %v1519_v22  ;;  %v1599_v51 = vpop.permute.xlu0 %1598  ;;  %v1602_v45 = vsel %vm1425_vm12, %v1593_v44, %v1595_v62 }
 0x1eb   : > { %2562 = vrot.lane.b32.xlu1 %v2548_v47, %s3118_s12  ;;  %2824 = vmatprep.subr.bf16.mxu0 %v1602_v45 }
 0x1ec   : > { %2645 = vrot.lane.b32.xlu0 %v2633_v5, %s3117_s9 }
 0x1ed   : > { %2905 = vmatpush1.bf16.msra.mxu1 %v1518_v52  ;;  %v1597_v63 = vpop.permute.xlu1 %1596 }
 0x1ee   : > { %v1682_v28 = vpop.permute.xlu0 %1681  ;;  %v1604_v15 = vsel %vm1425_vm12, %v1597_v63, %v1599_v51  ;;  %v1603_v33 = vsel %vm1425_vm12, %v1595_v62, %v1597_v63 }
 0x1ef   : > { %2643 = vrot.lane.b32.xlu1 %v2632_v53, %s3117_s9  ;;  %2906 = vmatprep.subr.bf16.mxu1 %v1604_v15 }
 0x1f0   : > { %2649 = vrot.lane.b32.xlu0 %v2635_v24, %s3117_s9 }
 0x1f1   : > { %2907 = vmatpush1.bf16.msra.mxu1 %v1603_v33  ;;  %v1591_v21 = vpop.permute.xlu1 %1590 }
 0x1f2   : > { %v1686_v23 = vpop.permute.xlu0 %1685  ;;  %v1601_v14 = vsel %vm1425_vm12, %v1591_v21, %v1593_v44 }
 0x1f3   : > { %2647 = vrot.lane.b32.xlu1 %v2634_v60, %s3117_s9  ;;  %2825 = vmatpush1.bf16.msra.mxu0 %v1601_v14 }
 0x1f4   : > { %2776 = vperm.xlu0 %3102, %v2773_v61  }
 0x1f5   : > { %v1684_v8 = vpop.permute.xlu1 %1683 }
 0x1f6   : > { %v1680_v7 = vpop.permute.xlu0 %1679  ;;  %v1691_v30 = vsel %vm1336_vm11, %v1682_v28, %v1684_v8  ;;  %v1692_v20 = vsel %vm1336_vm11, %v1684_v8, %v1686_v23 }
 0x1f7   : > { %2641 = vrot.lane.b32.xlu1 %v2631_v11, %s3117_s9  ;;  %2826 = vmatprep.subr.bf16.mxu0 %v1691_v30  ;;  %v1690_v0 = vsel %vm1336_vm11, %v1680_v7, %v1682_v28  ;;  %s3063_s9 = sshll.u32 %s4491_s22, 5 }
 0x1f8   : > { %2827 = vmatpush1.bf16.msra.mxu0 %v1690_v0  ;;  %s251_s17 = scalar_lea.vmem %s4484_s6, %s3063_s9 }
 0x1f9   : > { %v1688_v37 = vpop.permute.xlu1 %1687 }
 0x1fa   : > { %v1773_v10 = vpop.permute.xlu0 %1772  ;;  %v1693_v49 = vsel %vm1336_vm11, %v1686_v23, %v1688_v37  ;;  %vm4486_vm11 = vcmask 973824  }
 0x1fb   : > { %2908 = vmatprep.subr.bf16.mxu1 %v1693_v49  ;;  %2829 = vmatmul.mubr.bf16.vlgmr.msra.gmra.mrb[0].mxu0 %v3054_v9  ;;  %vm4487_vm12 = vmmov %vm4486_vm11 }
 0x1fc   : > { %2909 = vmatpush1.bf16.msra.mxu1 %v1692_v20  ;;  %3058 = vmatprep.mubr.msk.bf16.mxu0 %vm2792_vm9, %v3057_v17  ;;  %vm4488_vm13 = vmmov %vm4486_vm11 }
 0x1fd   : > { %v1771_v35 = vpop.permute.xlu1 %1770  ;;  %vm4489_vm14 = vmmov %vm4486_vm11 }
 0x1fe   : > { %v1777_v40 = vpop.permute.xlu0 %1776  ;;  %v1780_v48 = vsel %vm1247_vm10, %v1771_v35, %v1773_v10 }
 0x1ff   : > { %2837 = vmatprep.subr.bf16.mxu0 %v1780_v48  ;;  %2911 = vmatmul.mubr.bf16.vlgmr.msra.gmra.mrb[0].mxu1 %v3054_v9 }
 0x200   : > { %3059 = vmatprep.mubr.msk.bf16.mxu1 %vm2792_vm9, %v3057_v17 }
 0x201   : > { %v1775_v3 = vpop.permute.xlu1 %1774 }
 0x202   : > { %v1781_v55 = vsel %vm1247_vm10, %v1773_v10, %v1775_v3  ;;  %v1860_v50 = vpop.permute.xlu0 %1859  ;;  %v1782_v56 = vsel %vm1247_vm10, %v1775_v3, %v1777_v40 }
 0x203   : > { %2919 = vmatprep.subr.bf16.mxu1 %v1782_v56 }
 0x204   : > { %2920 = vmatpush1.bf16.msra.mxu1 %v1781_v55 }
 0x205   : > { %v1769_v12 = vpop.permute.xlu1 %1768 }
 0x206   : > { %v1779_v6 = vsel %vm1247_vm10, %v1769_v12, %v1771_v35  ;;  %v1864_v54 = vpop.permute.xlu0 %1863 }
 0x207   : > { %2838 = vmatpush1.bf16.msra.mxu0 %v1779_v6 }
 0x209   : > { %v1862_v16 = vpop.permute.xlu1 %1861 }
 0x20a   : > { %v1858_v57 = vpop.permute.xlu0 %1857  ;;  %v1869_v29 = vsel %vm4486_vm11, %v1860_v50, %v1862_v16  ;;  %v1870_v2 = vsel %vm4489_vm14, %v1862_v16, %v1864_v54 }
 0x20b   : > { %v1868_v46 = vsel %vm4487_vm12, %v1858_v57, %v1860_v50  ;;  %2839 = vmatprep.subr.bf16.mxu0 %v1869_v29 }
 0x20c   : > { %2840 = vmatpush1.bf16.msra.mxu0 %v1868_v46 }
 0x20d   : > { %v1866_v34 = vpop.permute.xlu1 %1865 }
 0x20e   : > { %v1950_v58 = vpop.permute.xlu0 %1949  ;;  %v1871_v38 = vsel %vm4488_vm13, %v1864_v54, %v1866_v34 }
 0x20f   : > { %2921 = vmatprep.subr.bf16.mxu1 %v1871_v38 }
 0x210   : > { %2922 = vmatpush1.bf16.msra.mxu1 %v1870_v2 }
 0x211   : > { %v1948_v4 = vpop.permute.xlu1 %1947 }
 0x212   : > { %v1954_v36 = vpop.permute.xlu0 %1953  ;;  %v1956_v18 = vsel %vm396_vm8, %v1948_v4, %v1950_v58 }
 0x213   : > { %2841 = vmatprep.subr.bf16.mxu0 %v1956_v18 }
 0x215   : > { %v1952_v62 = vpop.permute.xlu1 %1951 }
 0x216   : > { %v1957_v43 = vsel %vm396_vm8, %v1950_v58, %v1952_v62  ;;  %v2035_v13 = vpop.permute.xlu0 %2034  ;;  %v1958_v31 = vsel %vm396_vm8, %v1952_v62, %v1954_v36 }
 0x217   : > { %2923 = vmatprep.subr.bf16.mxu1 %v1958_v31 }
 0x218   : > { %2924 = vmatpush1.bf16.msra.mxu1 %v1957_v43 }
 0x219   : > { %v1946_v22 = vpop.permute.xlu1 %1945 }
 0x21a   : > { %v1955_v47 = vsel %vm396_vm8, %v1946_v22, %v1948_v4  ;;  %v2039_v27 = vpop.permute.xlu0 %2038 }
 0x21b   : > { %2842 = vmatpush1.bf16.msra.mxu0 %v1955_v47 }
 0x21d   : > { %v2037_v32 = vpop.permute.xlu1 %2036 }
 0x21e   : > { %v2033_v44 = vpop.permute.xlu0 %2032  ;;  %v2043_v1 = vsel %vm485_vm7, %v2035_v13, %v2037_v32  ;;  %v2044_v45 = vsel %vm485_vm7, %v2037_v32, %v2039_v27 }
 0x21f   : > { %v2042_v41 = vsel %vm485_vm7, %v2033_v44, %v2035_v13  ;;  %2843 = vmatprep.subr.bf16.mxu0 %v2043_v1 }
 0x220   : > { %2844 = vmatpush1.bf16.msra.mxu0 %v2042_v41 }
 0x221   : > { %v2041_v26 = vpop.permute.xlu1 %2040 }
 0x222   : > { %v2124_v5 = vpop.permute.xlu0 %2123  ;;  %v2045_v51 = vsel %vm485_vm7, %v2039_v27, %v2041_v26 }
 0x223   : > { %2925 = vmatprep.subr.bf16.mxu1 %v2045_v51 }
 0x224   : > { %2926 = vmatpush1.bf16.msra.mxu1 %v2044_v45 }
 0x225   : > { %v2122_v52 = vpop.permute.xlu1 %2121 }
 0x226   : > { %v2128_v53 = vpop.permute.xlu0 %2127  ;;  %v2130_v25 = vsel %vm574_vm6, %v2122_v52, %v2124_v5 }
 0x227   : > { %2845 = vmatprep.subr.bf16.mxu0 %v2130_v25 }
 0x229   : > { %v2126_v19 = vpop.permute.xlu1 %2125 }
 0x22a   : > { %v2131_v63 = vsel %vm574_vm6, %v2124_v5, %v2126_v19  ;;  %v2209_v24 = vpop.permute.xlu0 %2208  ;;  %v2132_v28 = vsel %vm574_vm6, %v2126_v19, %v2128_v53  ;;  %v3056_v5 = vcombine.low %v4417_v39, %v4417_v39 }
 0x22b   : > { %2927 = vmatprep.subr.bf16.mxu1 %v2132_v28 }
 0x22c   : > { %2928 = vmatpush1.bf16.msra.mxu1 %v2131_v63 }
 0x22d   : > { %v2120_v15 = vpop.permute.xlu1 %2119 }
 0x22e   : > { %v2129_v33 = vsel %vm574_vm6, %v2120_v15, %v2122_v52  ;;  %v2213_v42 = vpop.permute.xlu0 %2212 }
 0x22f   : > { %2846 = vmatpush1.bf16.msra.mxu0 %v2129_v33 }
 0x231   : > { %v2211_v59 = vpop.permute.xlu1 %2210 }
 0x232   : > { %v2207_v60 = vpop.permute.xlu0 %2206  ;;  %v2217_v21 = vsel %vm663_vm5, %v2209_v24, %v2211_v59  ;;  %v2218_v8 = vsel %vm663_vm5, %v2211_v59, %v2213_v42 }
 0x233   : > { %v2216_v61 = vsel %vm663_vm5, %v2207_v60, %v2209_v24  ;;  %2847 = vmatprep.subr.bf16.mxu0 %v2217_v21 }
 0x234   : > { %2848 = vmatpush1.bf16.msra.mxu0 %v2216_v61 }
 0x235   : > { %v2215_v23 = vpop.permute.xlu1 %2214 }
 0x236   : > { %v2298_v14 = vpop.permute.xlu0 %2297  ;;  %v2219_v11 = vsel %vm663_vm5, %v2213_v42, %v2215_v23 }
 0x237   : > { %2929 = vmatprep.subr.bf16.mxu1 %v2219_v11 }
 0x238   : > { %2930 = vmatpush1.bf16.msra.mxu1 %v2218_v8 }
 0x239   : > { %v2296_v7 = vpop.permute.xlu1 %2295 }
 0x23a   : > { %v2302_v30 = vpop.permute.xlu0 %2301  ;;  %v2304_v0 = vsel %vm713_vm4, %v2296_v7, %v2298_v14 }
 0x23b   : > { %2849 = vmatprep.subr.bf16.mxu0 %v2304_v0 }
 0x23d   : > { %v2300_v37 = vpop.permute.xlu1 %2299 }
 0x23e   : > { %v2305_v9 = vsel %vm713_vm4, %v2298_v14, %v2300_v37  ;;  %v2383_v10 = vpop.permute.xlu0 %2382  ;;  %v2306_v49 = vsel %vm713_vm4, %v2300_v37, %v2302_v30 }
 0x23f   : > { %2931 = vmatprep.subr.bf16.mxu1 %v2306_v49 }
 0x240   : > { %2932 = vmatpush1.bf16.msra.mxu1 %v2305_v9 }
 0x241   : > { %v2294_v17 = vpop.permute.xlu1 %2293 }
 0x242   : > { %v2303_v20 = vsel %vm713_vm4, %v2294_v17, %v2296_v7  ;;  %v2387_v35 = vpop.permute.xlu0 %2386 }
 0x243   : > { %2850 = vmatpush1.bf16.msra.mxu0 %v2303_v20 }
 0x245   : > { %v2385_v40 = vpop.permute.xlu1 %2384 }
 0x246   : > { %v2381_v48 = vpop.permute.xlu0 %2380  ;;  %v2391_v3 = vsel %vm624_vm3, %v2383_v10, %v2385_v40  ;;  %v2392_v6 = vsel %vm624_vm3, %v2385_v40, %v2387_v35 }
 0x247   : > { %v2390_v55 = vsel %vm624_vm3, %v2381_v48, %v2383_v10  ;;  %2851 = vmatprep.subr.bf16.mxu0 %v2391_v3 }
 0x248   : > { %2852 = vmatpush1.bf16.msra.mxu0 %v2390_v55 }
 0x249   : > { %v2389_v50 = vpop.permute.xlu1 %2388 }
 0x24a   : > { %v2472_v56 = vpop.permute.xlu0 %2471  ;;  %v2393_v12 = vsel %vm624_vm3, %v2387_v35, %v2389_v50 }
 0x24b   : > { %2933 = vmatprep.subr.bf16.mxu1 %v2393_v12 }
 0x24c   : > { %2934 = vmatpush1.bf16.msra.mxu1 %v2392_v6 }
 0x24d   : > { %v2470_v54 = vpop.permute.xlu1 %2469 }
 0x24e   : > { %v2476_v16 = vpop.permute.xlu0 %2475  ;;  %v2478_v57 = vsel %vm535_vm2, %v2470_v54, %v2472_v56 }
 0x24f   : > { %2853 = vmatprep.subr.bf16.mxu0 %v2478_v57 }
 0x251   : > { %v2474_v29 = vpop.permute.xlu1 %2473 }
 0x252   : > { %v2479_v46 = vsel %vm535_vm2, %v2472_v56, %v2474_v29  ;;  %v2557_v34 = vpop.permute.xlu0 %2556  ;;  %v2480_v58 = vsel %vm535_vm2, %v2474_v29, %v2476_v16 }
 0x253   : > { %2935 = vmatprep.subr.bf16.mxu1 %v2480_v58 }
 0x254   : > { %2936 = vmatpush1.bf16.msra.mxu1 %v2479_v46 }
 0x255   : > { %v2468_v38 = vpop.permute.xlu1 %2467 }
 0x256   : > { %v2477_v2 = vsel %vm535_vm2, %v2468_v38, %v2470_v54  ;;  %v2561_v4 = vpop.permute.xlu0 %2560 }
 0x257   : > { %2854 = vmatpush1.bf16.msra.mxu0 %v2477_v2 }
 0x259   : > { %v2559_v36 = vpop.permute.xlu1 %2558 }
 0x25a   : > { %v2555_v18 = vpop.permute.xlu0 %2554  ;;  %v2565_v62 = vsel %vm446_vm1, %v2557_v34, %v2559_v36  ;;  %v2566_v22 = vsel %vm446_vm1, %v2559_v36, %v2561_v4 }
 0x25b   : > { %v2564_v43 = vsel %vm446_vm1, %v2555_v18, %v2557_v34  ;;  %2855 = vmatprep.subr.bf16.mxu0 %v2565_v62 }
 0x25c   : > { %2856 = vmatpush1.bf16.msra.mxu0 %v2564_v43 }
 0x25d   : > { %v2563_v13 = vpop.permute.xlu1 %2562 }
 0x25e   : > { %v2567_v31 = vsel %vm446_vm1, %v2561_v4, %v2563_v13  ;;  %v2646_v47 = vpop.permute.xlu0 %2645 }
 0x25f   : > { %2937 = vmatprep.subr.bf16.mxu1 %v2567_v31 }
 0x260   : > { %2938 = vmatpush1.bf16.msra.mxu1 %v2566_v22 }
 0x261   : > { %v2644_v27 = vpop.permute.xlu1 %2643 }
 0x262   : > { %v2652_v32 = vsel %vm357_vm0, %v2644_v27, %v2646_v47  ;;  %v2650_v44 = vpop.permute.xlu0 %2649 }
 0x263   : > { %2857 = vmatprep.subr.bf16.mxu0 %v2652_v32 }
 0x265   : > { %v2648_v1 = vpop.permute.xlu1 %2647 }
 0x266   : > { %v2653_v41 = vsel %vm357_vm0, %v2646_v47, %v2648_v1  ;;  %v2654_v26 = vsel %vm357_vm0, %v2648_v1, %v2650_v44 }
 0x267   : > { %2939 = vmatprep.subr.bf16.mxu1 %v2654_v26 }
 0x268   : > { %2940 = vmatpush1.bf16.msra.mxu1 %v2653_v41 }
 0x269   : > { %v2642_v51 = vpop.permute.xlu1 %2641 }
 0x26a   : > { %v2651_v45 = vsel %vm357_vm0, %v2642_v51, %v2644_v27 }
 0x26b   : > { %2858 = vmatpush1.bf16.msra.mxu0 %v2651_v45  ;;  %2952 = vmatmul.mubr.bf16.vlgmr.msra.gmra.mrb[0].mxu1 %v3056_v5 }
 0x26e   : > { %2870 = vmatmul.mubr.bf16.vlgmr.msra.gmra.mrb[0].mxu0 %v3056_v5 }
 0x273   : > { %v2777_v52 = vpop.permute.xlu0 %2776 }
 0x33e   : > { %v2953_v53 = vpop.f32.mrb[0].mxu1 }
 0x33f   : > { %v3066_v25 = vadd.f32 %v2953_v53, %v2777_v52  ;;  %v2955_v19 = vpop.f32.mrb[1].mxu1 }
 0x340   : > { %v3067_v63 = vadd.f32 %v2955_v19, %v2777_v52  ;;  %v2957_v24 = vpop.f32.mrb[2].mxu1 }
 0x341   : > { %2962 = vst [vmem:[%s251_s17 + $0x10] sm:$0xff] %v3066_v25  ;;  %v2871_v39 = vpop.f32.mrb[0].mxu0  ;;  %v2958_v28 = vpop.f32.mrb[3].mxu1 }
 0x342   : > { %2963 = vst [vmem:[%s251_s17 + $0x18] sm:$0xff] %v3067_v63  ;;  %v3064_v15 = vadd.f32 %v2871_v39, %v2777_v52  ;;  %v2873_v33 = vpop.f32.mrb[1].mxu0 }
 0x343   : > { %v3065_v42 = vadd.f32 %v2873_v33, %v2777_v52  ;;  %v2875_v59 = vpop.f32.mrb[2].mxu0 }
 0x344   : > { %2960 = vst [vmem:[%s251_s17] sm:$0xff] %v3064_v15  ;;  %v2876_v60 = vpop.f32.mrb[3].mxu0 }
 0x345   : > { %2961 = vst [vmem:[%s251_s17 + $0x8] sm:$0xff] %v3065_v42 }
 0x346 PF: > { %s16_s21 = sadd.s32 1, %s3114_s21  }
 0x347   : > { %p13_p4 = scmp.ge.s32.totalorder %s16_s21, 4  }
 0x349   :  { %15 = sbr.rel (!%p13_p4) target bundleno = 1 (0x1), region = 100 }

</bundles_post_ra>
